<compile_context>
chip_gen: v6e
topology: v6e:2x2x1
jax: 0.10.0
libtpu: 0.0.40
codegen_flags: <defaults>
</compile_context>

<pallas_src>
import functools

import jax
import jax.numpy as jnp
from jax.experimental import pallas as pl
from jax.experimental.pallas import tpu as pltpu

NEG_SLOPE = 0.01            # nn.LeakyReLU default
BN_EPS = 1e-5               # nn.BatchNorm2d default
ACT_DTYPE = jnp.bfloat16    # activation / weight dtype fed to the MXU
VMEM_LIMIT = 48 * 1024 * 1024

config = [(32, 3, 1), (64, 3, 2), ['B', 1], (128, 3, 2), ['B', 2], (256, 3, 2),
          ['B', 8], (512, 3, 2), ['B', 8], (1024, 3, 2), ['B', 4], (512, 1, 1),
          (1024, 3, 1), 'S', (256, 1, 1), 'U', (256, 1, 1), (512, 3, 1), 'S',
          (128, 1, 1), 'U', (128, 1, 1), (256, 3, 1), 'S']


def _round_up(x, m):
    return ((x + m - 1) // m) * m


def _pick_tn(cout):
    if cout % 256 == 0:
        return 256
    if cout % 128 == 0:
        return 128
    return cout          # full-dim block (legal even when not lane aligned)


def _pick_rows(h):
    for r in (8, 7, 6, 5, 4, 3, 2, 1):
        if h % r == 0:
            return r
    return 1


# ---------------------------------------------------------------------------
# Kernel 1: tiled matmul + bias (+ LeakyReLU).  Used for 1x1 convolutions and
# for the (few) stride-2 3x3 convolutions that still go through im2col.
# A, B are bf16; accumulation is f32 on the MXU; the epilogue runs in f32.
# ---------------------------------------------------------------------------
def _mm_bias_kernel(a_ref, b_ref, bias_ref, o_ref, *, leaky):
    acc = jnp.dot(a_ref[...], b_ref[...], preferred_element_type=jnp.float32)
    acc = acc + bias_ref[...]
    if leaky:
        acc = jnp.where(acc > 0, acc, NEG_SLOPE * acc)
    o_ref[...] = acc.astype(o_ref.dtype)


@functools.lru_cache(maxsize=None)
def _mm_call(Mp, K, Cout, tm, tn, leaky, out_dtype):
    return pl.pallas_call(
        functools.partial(_mm_bias_kernel, leaky=leaky),
        out_shape=jax.ShapeDtypeStruct((Mp, Cout), out_dtype),
        grid=(Mp // tm, Cout // tn),
        in_specs=[
            pl.BlockSpec((tm, K), lambda i, j: (i, 0)),     # A tile (full K)
            pl.BlockSpec((K, tn), lambda i, j: (0, j)),     # B tile (full K)
            pl.BlockSpec((1, tn), lambda i, j: (0, j)),     # bias row
        ],
        out_specs=pl.BlockSpec((tm, tn), lambda i, j: (i, j)),
        compiler_params=pltpu.CompilerParams(
            dimension_semantics=("parallel", "parallel"),
            vmem_limit_bytes=VMEM_LIMIT),
    )


def matmul_bias(a, b, bias, leaky, out_dtype):
    """(M,K)bf16 @ (K,N)bf16 + bias[N], optional LeakyReLU, via Pallas."""
    M, K = a.shape
    Cout = b.shape[1]
    tn = _pick_tn(Cout)
    if M >= 512:
        tm = 512
        Mp = _round_up(M, tm)
    else:
        Mp = _round_up(M, 8)
        tm = Mp
    if Mp != M:
        a = jnp.pad(a, ((0, Mp - M), (0, 0)))
    out = _mm_call(Mp, K, Cout, tm, tn, bool(leaky), out_dtype)(a, b, bias)
    return out[:M] if Mp != M else out


# ---------------------------------------------------------------------------
# Kernel 2: direct 3x3 stride-1 convolution (+ folded BN bias + LeakyReLU,
# optionally + fused residual add).  No im2col tensor is materialized.
# ---------------------------------------------------------------------------
def _conv3x3_kernel(*refs, nblk, rows, width, ksize, leaky, residual):
    x_refs = refs[:nblk]                 # nblk shifted views of padded input
    w_ref = refs[nblk]                   # (3, 3, Cin, tn) bf16
    b_ref = refs[nblk + 1]               # (1, tn) f32
    res_ref = refs[nblk + 2] if residual else None
    o_ref = refs[-1]                     # (1, rows, width, tn)

    bias = b_ref[...]
    for i in range(rows):                                # output rows in block
        acc = jnp.zeros((width, o_ref.shape[-1]), jnp.float32)
        for kh in range(ksize):
            g = i + kh                                   # padded input row
            row = x_refs[g // rows][0, g % rows]         # (Wpp, Cin) bf16
            for kw in range(ksize):
                acc = acc + jnp.dot(row[kw:kw + width, :], w_ref[kh, kw],
                                    preferred_element_type=jnp.float32)
        acc = acc + bias
        if leaky:
            acc = jnp.where(acc > 0, acc, NEG_SLOPE * acc)
        if residual:
            # PyTorch: x + layer(x) -> add AFTER the conv block's LeakyReLU.
            acc = acc + res_ref[0, i].astype(jnp.float32)
        o_ref[0, i] = acc.astype(o_ref.dtype)


@functools.lru_cache(maxsize=None)
def _conv3x3_call(N, H, W, Cin, Cout, R, tn, nblk, leaky, residual, out_dtype):
    K = 3
    Wpp = W + 2

    x_specs = [
        pl.BlockSpec((1, R, Wpp, Cin), (lambda n, r, j, b=b: (n, r + b, 0, 0)))
        for b in range(nblk)
    ]
    in_specs = x_specs + [
        pl.BlockSpec((K, K, Cin, tn), lambda n, r, j: (0, 0, 0, j)),
        pl.BlockSpec((1, tn), lambda n, r, j: (0, j)),
    ]
    if residual:
        in_specs.append(pl.BlockSpec((1, R, W, tn), lambda n, r, j: (n, r, 0, j)))

    return pl.pallas_call(
        functools.partial(_conv3x3_kernel, nblk=nblk, rows=R, width=W,
                          ksize=K, leaky=leaky, residual=residual),
        out_shape=jax.ShapeDtypeStruct((N, H, W, Cout), out_dtype),
        grid=(N, H // R, Cout // tn),
        in_specs=in_specs,
        out_specs=pl.BlockSpec((1, R, W, tn), lambda n, r, j: (n, r, 0, j)),
        compiler_params=pltpu.CompilerParams(
            dimension_semantics=("parallel", "parallel", "parallel"),
            vmem_limit_bytes=VMEM_LIMIT),
    )


def conv3x3_s1(p, x, residual=None):
    """3x3, stride-1, pad-1 conv (+BN fold +LeakyReLU [+residual]) on NHWC."""
    N, H, W, Cin = x.shape
    Cout = p['w'].shape[-1]
    R = _pick_rows(H)
    nblk = (2 * R + 1) // R              # ceil((R + 2) / R): 3 if R == 1 else 2
    # Pad 1 row/col top/left, enough rows at the bottom so the halo row-block
    # (block index r + nblk - 1) is always in range.
    xp = jnp.pad(x, ((0, 0), (1, (nblk - 1) * R - 1), (1, 1), (0, 0)))
    tn = _pick_tn(Cout)
    call = _conv3x3_call(N, H, W, Cin, Cout, R, tn, nblk,
                         bool(p['leaky']), residual is not None, p['out_dtype'])
    args = [xp] * nblk + [p['w'], p['bias']]
    if residual is not None:
        args.append(residual)
    return call(*args)


# ---------------------------------------------------------------------------
# Conv wrappers / blocks
# ---------------------------------------------------------------------------
def conv3x3_s2(p, x):
    """3x3 stride-2 downsample conv (5 layers).  Still im2col + matmul (bf16).

    # TODO(synk): fold the strided patch gather into the kernel's index maps
    # (strided in-kernel loads) to remove this last im2col as well.
    """
    N, H, W, Cin = x.shape
    Cout = p['w'].shape[-1]
    K, s = 3, 2
    xp = jnp.pad(x, ((0, 0), (1, 1), (1, 1), (0, 0)))
    Ho = (H + 2 - K) // s + 1
    Wo = (W + 2 - K) // s + 1
    patches = []
    for kh in range(K):
        for kw in range(K):
            patches.append(xp[:, kh:kh + s * Ho:s, kw:kw + s * Wo:s, :])
    a = jnp.stack(patches, axis=3).reshape(N * Ho * Wo, K * K * Cin)
    out = matmul_bias(a, p['w'], p['bias'], p['leaky'], p['out_dtype'])
    return out.reshape(N, Ho, Wo, Cout)


def conv1x1(p, x):
    N, H, W, Cin = x.shape
    Cout = p['w'].shape[-1]
    a = x.reshape(N * H * W, Cin)
    out = matmul_bias(a, p['w'], p['bias'], p['leaky'], p['out_dtype'])
    return out.reshape(N, H, W, Cout)


def conv_block_fwd(p, x, residual=None):
    if p['ksize'] == 1:
        return conv1x1(p, x)
    if p['stride'] == 1:
        return conv3x3_s1(p, x, residual=residual)
    return conv3x3_s2(p, x)


def residual_block_fwd(p, x):
    # Reproduces PyTorch ResidualBlock.forward (returns after first repeat).
    y = conv_block_fwd(p['c1'], x)
    # Residual add fused into the 3x3 conv kernel's epilogue.
    return conv_block_fwd(p['c2'], y, residual=x)


def scale_pred_fwd(p, x):
    nc = p['num_classes']
    y = conv_block_fwd(p['c2'], conv_block_fwd(p['c1'], x))   # NHWC, f32 head
    N, H, W, _ = y.shape
    # PyTorch: NCHW reshape(N,3,nc+5,H,W).permute(0,1,3,4,2) == below in NHWC.
    return y.reshape(N, H, W, 3, nc + 5).transpose(0, 3, 1, 2, 4)


def upsample2(x):
    # nn.Upsample(scale_factor=2), mode='nearest', NHWC layout.
    # TODO(synk): fuse upsample + channel concat into the next 1x1 conv's
    # BlockSpec indexing instead of materializing the 4x tensor + concat.
    return jnp.repeat(jnp.repeat(x, 2, axis=1), 2, axis=2)


# ---------------------------------------------------------------------------
# Parameter construction (deterministic, synthetic, kernel-ready layouts)
# ---------------------------------------------------------------------------
def _init_conv(key, cin, cout, ksize, stride, padding, use_bn):
    kw_, kb_ = jax.random.split(key)
    fan_in = cin * ksize * ksize
    w = jax.random.normal(kw_, (cout, cin, ksize, ksize),
                          jnp.float32) * (2.0 / fan_in) ** 0.5
    if use_bn:
        gamma = jnp.ones((cout,), jnp.float32)
        beta = jnp.zeros((cout,), jnp.float32)
        rmean = jnp.zeros((cout,), jnp.float32)
        rvar = jnp.ones((cout,), jnp.float32)
        scale = gamma / jnp.sqrt(rvar + BN_EPS)
        bias = beta - rmean * scale
        leaky = True
        out_dtype = ACT_DTYPE
    else:  # conv with bias, no BN, no activation (final ScalePrediction conv)
        scale = jnp.ones((cout,), jnp.float32)
        bias = jax.random.normal(kb_, (cout,), jnp.float32) * (1.0 / fan_in) ** 0.5
        leaky = False
        out_dtype = jnp.float32

    # Fold the (eval-mode) BN scale into the weights and precompute the
    # kernel-ready layout / dtype once, outside the per-forward hot path.
    w_t = jnp.transpose(w * scale[:, None, None, None], (2, 3, 1, 0))  # kh,kw,ci,co
    if ksize == 1:
        w_k = w_t.reshape(cin, cout).astype(ACT_DTYPE)
    elif stride == 1:
        w_k = w_t.astype(ACT_DTYPE)                        # (3, 3, cin, cout)
    else:
        w_k = w_t.reshape(ksize * ksize * cin, cout).astype(ACT_DTYPE)

    return {'w': w_k, 'bias': bias.reshape(1, cout).astype(jnp.float32),
            'ksize': ksize, 'stride': stride, 'padding': padding,
            'leaky': leaky, 'out_dtype': out_dtype}


def _init_residual(key, channels):
    k1, k2 = jax.random.split(key)
    return {'c1': _init_conv(k1, channels, channels // 2, 1, 1, 0, True),
            'c2': _init_conv(k2, channels // 2, channels, 3, 1, 1, True)}


def _init_scale_pred(key, channels, num_classes):
    k1, k2 = jax.random.split(key)
    return {'c1': _init_conv(k1, channels, channels * 2, 3, 1, 1, True),
            'c2': _init_conv(k2, channels * 2, (num_classes + 5) * 3,
                             1, 1, 0, False),
            'num_classes': num_classes}


def build_yolov3(key, in_channels=3, num_classes=80):
    layers = []
    ki = iter(jax.random.split(key, 128))
    c = in_channels
    for module in config:
        if isinstance(module, tuple):
            out_c, k, s = module
            layers.append(('conv',
                           _init_conv(next(ki), c, out_c, k, s,
                                      1 if k == 3 else 0, True)))
            c = out_c
        elif isinstance(module, list):
            nrep = module[1]
            layers.append(('res', _init_residual(next(ki), c), nrep))
        elif module == 'S':
            layers.append(('res', _init_residual(next(ki), c), 1))
            layers.append(('conv', _init_conv(next(ki), c, c // 2, 1, 1, 0, True)))
            layers.append(('scale', _init_scale_pred(next(ki), c // 2, num_classes)))
            c = c // 2
        elif module == 'U':
            layers.append(('up', None))
            c = c * 3
    return layers


# ---------------------------------------------------------------------------
# Full model forward (mirrors YoloV3.forward)
# ---------------------------------------------------------------------------
def yolov3_forward(layers, x_nchw):
    x = jnp.transpose(x_nchw, (0, 2, 3, 1)).astype(ACT_DTYPE)  # NCHW -> NHWC
    outputs, routes = [], []
    for layer in layers:
        kind = layer[0]
        if kind == 'scale':
            outputs.append(scale_pred_fwd(layer[1], x))
            continue
        if kind == 'conv':
            x = conv_block_fwd(layer[1], x)
        elif kind == 'res':
            x = residual_block_fwd(layer[1], x)
            if layer[2] == 8:
                routes.append(x)
        elif kind == 'up':
            x = upsample2(x)
            x = jnp.concatenate([x, routes[-1]], axis=-1)      # channel concat
            routes.pop()
    return outputs


if __name__ == "__main__":
    key = jax.random.PRNGKey(0)
    pkey, xkey = jax.random.split(key)

    num_classes = 80
    layers = build_yolov3(pkey, in_channels=3, num_classes=num_classes)

    # Small input consistent with the module: NCHW, spatial divisible by 32.
    x = jax.random.normal(xkey, (2, 3, 32, 32), jnp.float32)

    outs = yolov3_forward(layers, x)
    outs = [jax.block_until_ready(o) for o in outs]

    expected = [(2, 3, 1, 1, num_classes + 5),
                (2, 3, 2, 2, num_classes + 5),
                (2, 3, 4, 4, num_classes + 5)]
    got = [tuple(o.shape) for o in outs]
    assert got == expected, f"shape mismatch: {got} vs {expected}"

    print("KERNEL_OK")
</pallas_src>

<mosaic_0001>
module attributes {stable_mosaic.version = 11 : i64} {
  func.func @_conv3x3_kernel(%arg0: i32, %arg1: i32, %arg2: i32, %arg3: memref<1x8x34x3xbf16, #tpu.memory_space<vmem>>, %arg4: memref<1x8x34x3xbf16, #tpu.memory_space<vmem>>, %arg5: memref<3x3x3x32xbf16, #tpu.memory_space<vmem>>, %arg6: memref<1x32xf32, #tpu.memory_space<vmem>>, %arg7: memref<1x8x32x32xbf16, #tpu.memory_space<vmem>>) attributes {dimension_semantics = [#tpu.dimension_semantics<parallel>, #tpu.dimension_semantics<parallel>, #tpu.dimension_semantics<parallel>], iteration_bounds = array<i64: 2, 4, 1>, scalar_prefetch = 0 : i64, scratch_operands = 0 : i64, tpu.core_type = #tpu.core_type<tc>, window_params = [{transform_indices = @transform_0, window_bounds = array<i64: 1, 8, 34, 3>}, {transform_indices = @transform_1, window_bounds = array<i64: 1, 8, 34, 3>}, {transform_indices = @transform_2, window_bounds = array<i64: 3, 3, 3, 32>}, {transform_indices = @transform_3, window_bounds = array<i64: 1, 32>}, {transform_indices = @transform_4, window_bounds = array<i64: 1, 8, 32, 32>}]} {
    %c0 = arith.constant 0 : index
    %c0_0 = arith.constant 0 : index
    %0 = vector.load %arg6[%c0, %c0_0] : memref<1x32xf32, #tpu.memory_space<vmem>>, vector<1x32xf32>
    %cst = arith.constant 0.000000e+00 : f32
    %1 = vector.broadcast %cst : f32 to vector<32x32xf32>
    %c0_1 = arith.constant 0 : index
    %c0_2 = arith.constant 0 : index
    %c0_3 = arith.constant 0 : index
    %c0_4 = arith.constant 0 : index
    %2 = vector.load %arg3[%c0_1, %c0_2, %c0_3, %c0_4] : memref<1x8x34x3xbf16, #tpu.memory_space<vmem>>, vector<1x1x34x3xbf16>
    %3 = vector.shape_cast %2 : vector<1x1x34x3xbf16> to vector<34x3xbf16>
    %4 = vector.extract_strided_slice %3 {offsets = [0, 0], sizes = [32, 3], strides = [1, 1]} : vector<34x3xbf16> to vector<32x3xbf16>
    %c0_5 = arith.constant 0 : index
    %c0_6 = arith.constant 0 : index
    %c0_7 = arith.constant 0 : index
    %c0_8 = arith.constant 0 : index
    %5 = vector.load %arg5[%c0_5, %c0_6, %c0_7, %c0_8] : memref<3x3x3x32xbf16, #tpu.memory_space<vmem>>, vector<1x1x3x32xbf16>
    %6 = vector.shape_cast %5 : vector<1x1x3x32xbf16> to vector<3x32xbf16>
    %cst_9 = arith.constant dense<0.000000e+00> : vector<32x32xf32>
    %7 = tpu.matmul %4, %6, %cst_9 {dimension_numbers = #tpu.dot_dimension_numbers<[1], [0], [0], [1], [0, 0, 1, 1], [], []>} : vector<32x3xbf16>, vector<3x32xbf16>, vector<32x32xf32> -> vector<32x32xf32>
    %8 = arith.addf %1, %7 : vector<32x32xf32>
    %9 = vector.extract_strided_slice %3 {offsets = [1, 0], sizes = [32, 3], strides = [1, 1]} : vector<34x3xbf16> to vector<32x3xbf16>
    %c0_10 = arith.constant 0 : index
    %c1 = arith.constant 1 : index
    %c0_11 = arith.constant 0 : index
    %c0_12 = arith.constant 0 : index
    %10 = vector.load %arg5[%c0_10, %c1, %c0_11, %c0_12] : memref<3x3x3x32xbf16, #tpu.memory_space<vmem>>, vector<1x1x3x32xbf16>
    %11 = vector.shape_cast %10 : vector<1x1x3x32xbf16> to vector<3x32xbf16>
    %cst_13 = arith.constant dense<0.000000e+00> : vector<32x32xf32>
    %12 = tpu.matmul %9, %11, %cst_13 {dimension_numbers = #tpu.dot_dimension_numbers<[1], [0], [0], [1], [0, 0, 1, 1], [], []>} : vector<32x3xbf16>, vector<3x32xbf16>, vector<32x32xf32> -> vector<32x32xf32>
    %13 = arith.addf %8, %12 : vector<32x32xf32>
    %14 = vector.extract_strided_slice %3 {offsets = [2, 0], sizes = [32, 3], strides = [1, 1]} : vector<34x3xbf16> to vector<32x3xbf16>
    %c0_14 = arith.constant 0 : index
    %c2 = arith.constant 2 : index
    %c0_15 = arith.constant 0 : index
    %c0_16 = arith.constant 0 : index
    %15 = vector.load %arg5[%c0_14, %c2, %c0_15, %c0_16] : memref<3x3x3x32xbf16, #tpu.memory_space<vmem>>, vector<1x1x3x32xbf16>
    %16 = vector.shape_cast %15 : vector<1x1x3x32xbf16> to vector<3x32xbf16>
    %cst_17 = arith.constant dense<0.000000e+00> : vector<32x32xf32>
    %17 = tpu.matmul %14, %16, %cst_17 {dimension_numbers = #tpu.dot_dimension_numbers<[1], [0], [0], [1], [0, 0, 1, 1], [], []>} : vector<32x3xbf16>, vector<3x32xbf16>, vector<32x32xf32> -> vector<32x32xf32>
    %18 = arith.addf %13, %17 : vector<32x32xf32>
    %c0_18 = arith.constant 0 : index
    %c1_19 = arith.constant 1 : index
    %c0_20 = arith.constant 0 : index
    %c0_21 = arith.constant 0 : index
    %19 = vector.load %arg3[%c0_18, %c1_19, %c0_20, %c0_21] : memref<1x8x34x3xbf16, #tpu.memory_space<vmem>>, vector<1x1x34x3xbf16>
    %20 = vector.shape_cast %19 : vector<1x1x34x3xbf16> to vector<34x3xbf16>
    %21 = vector.extract_strided_slice %20 {offsets = [0, 0], sizes = [32, 3], strides = [1, 1]} : vector<34x3xbf16> to vector<32x3xbf16>
    %c1_22 = arith.constant 1 : index
    %c0_23 = arith.constant 0 : index
    %c0_24 = arith.constant 0 : index
    %c0_25 = arith.constant 0 : index
    %22 = vector.load %arg5[%c1_22, %c0_23, %c0_24, %c0_25] : memref<3x3x3x32xbf16, #tpu.memory_space<vmem>>, vector<1x1x3x32xbf16>
    %23 = vector.shape_cast %22 : vector<1x1x3x32xbf16> to vector<3x32xbf16>
    %cst_26 = arith.constant dense<0.000000e+00> : vector<32x32xf32>
    %24 = tpu.matmul %21, %23, %cst_26 {dimension_numbers = #tpu.dot_dimension_numbers<[1], [0], [0], [1], [0, 0, 1, 1], [], []>} : vector<32x3xbf16>, vector<3x32xbf16>, vector<32x32xf32> -> vector<32x32xf32>
    %25 = arith.addf %18, %24 : vector<32x32xf32>
    %26 = vector.extract_strided_slice %20 {offsets = [1, 0], sizes = [32, 3], strides = [1, 1]} : vector<34x3xbf16> to vector<32x3xbf16>
    %c1_27 = arith.constant 1 : index
    %c1_28 = arith.constant 1 : index
    %c0_29 = arith.constant 0 : index
    %c0_30 = arith.constant 0 : index
    %27 = vector.load %arg5[%c1_27, %c1_28, %c0_29, %c0_30] : memref<3x3x3x32xbf16, #tpu.memory_space<vmem>>, vector<1x1x3x32xbf16>
    %28 = vector.shape_cast %27 : vector<1x1x3x32xbf16> to vector<3x32xbf16>
    %cst_31 = arith.constant dense<0.000000e+00> : vector<32x32xf32>
    %29 = tpu.matmul %26, %28, %cst_31 {dimension_numbers = #tpu.dot_dimension_numbers<[1], [0], [0], [1], [0, 0, 1, 1], [], []>} : vector<32x3xbf16>, vector<3x32xbf16>, vector<32x32xf32> -> vector<32x32xf32>
    %30 = arith.addf %25, %29 : vector<32x32xf32>
    %31 = vector.extract_strided_slice %20 {offsets = [2, 0], sizes = [32, 3], strides = [1, 1]} : vector<34x3xbf16> to vector<32x3xbf16>
    %c1_32 = arith.constant 1 : index
    %c2_33 = arith.constant 2 : index
    %c0_34 = arith.constant 0 : index
    %c0_35 = arith.constant 0 : index
    %32 = vector.load %arg5[%c1_32, %c2_33, %c0_34, %c0_35] : memref<3x3x3x32xbf16, #tpu.memory_space<vmem>>, vector<1x1x3x32xbf16>
    %33 = vector.shape_cast %32 : vector<1x1x3x32xbf16> to vector<3x32xbf16>
    %cst_36 = arith.constant dense<0.000000e+00> : vector<32x32xf32>
    %34 = tpu.matmul %31, %33, %cst_36 {dimension_numbers = #tpu.dot_dimension_numbers<[1], [0], [0], [1], [0, 0, 1, 1], [], []>} : vector<32x3xbf16>, vector<3x32xbf16>, vector<32x32xf32> -> vector<32x32xf32>
    %35 = arith.addf %30, %34 : vector<32x32xf32>
    %c0_37 = arith.constant 0 : index
    %c2_38 = arith.constant 2 : index
    %c0_39 = arith.constant 0 : index
    %c0_40 = arith.constant 0 : index
    %36 = vector.load %arg3[%c0_37, %c2_38, %c0_39, %c0_40] : memref<1x8x34x3xbf16, #tpu.memory_space<vmem>>, vector<1x1x34x3xbf16>
    %37 = vector.shape_cast %36 : vector<1x1x34x3xbf16> to vector<34x3xbf16>
    %38 = vector.extract_strided_slice %37 {offsets = [0, 0], sizes = [32, 3], strides = [1, 1]} : vector<34x3xbf16> to vector<32x3xbf16>
    %c2_41 = arith.constant 2 : index
    %c0_42 = arith.constant 0 : index
    %c0_43 = arith.constant 0 : index
    %c0_44 = arith.constant 0 : index
    %39 = vector.load %arg5[%c2_41, %c0_42, %c0_43, %c0_44] : memref<3x3x3x32xbf16, #tpu.memory_space<vmem>>, vector<1x1x3x32xbf16>
    %40 = vector.shape_cast %39 : vector<1x1x3x32xbf16> to vector<3x32xbf16>
    %cst_45 = arith.constant dense<0.000000e+00> : vector<32x32xf32>
    %41 = tpu.matmul %38, %40, %cst_45 {dimension_numbers = #tpu.dot_dimension_numbers<[1], [0], [0], [1], [0, 0, 1, 1], [], []>} : vector<32x3xbf16>, vector<3x32xbf16>, vector<32x32xf32> -> vector<32x32xf32>
    %42 = arith.addf %35, %41 : vector<32x32xf32>
    %43 = vector.extract_strided_slice %37 {offsets = [1, 0], sizes = [32, 3], strides = [1, 1]} : vector<34x3xbf16> to vector<32x3xbf16>
    %c2_46 = arith.constant 2 : index
    %c1_47 = arith.constant 1 : index
    %c0_48 = arith.constant 0 : index
    %c0_49 = arith.constant 0 : index
    %44 = vector.load %arg5[%c2_46, %c1_47, %c0_48, %c0_49] : memref<3x3x3x32xbf16, #tpu.memory_space<vmem>>, vector<1x1x3x32xbf16>
    %45 = vector.shape_cast %44 : vector<1x1x3x32xbf16> to vector<3x32xbf16>
    %cst_50 = arith.constant dense<0.000000e+00> : vector<32x32xf32>
    %46 = tpu.matmul %43, %45, %cst_50 {dimension_numbers = #tpu.dot_dimension_numbers<[1], [0], [0], [1], [0, 0, 1, 1], [], []>} : vector<32x3xbf16>, vector<3x32xbf16>, vector<32x32xf32> -> vector<32x32xf32>
    %47 = arith.addf %42, %46 : vector<32x32xf32>
    %48 = vector.extract_strided_slice %37 {offsets = [2, 0], sizes = [32, 3], strides = [1, 1]} : vector<34x3xbf16> to vector<32x3xbf16>
    %c2_51 = arith.constant 2 : index
    %c2_52 = arith.constant 2 : index
    %c0_53 = arith.constant 0 : index
    %c0_54 = arith.constant 0 : index
    %49 = vector.load %arg5[%c2_51, %c2_52, %c0_53, %c0_54] : memref<3x3x3x32xbf16, #tpu.memory_space<vmem>>, vector<1x1x3x32xbf16>
    %50 = vector.shape_cast %49 : vector<1x1x3x32xbf16> to vector<3x32xbf16>
    %cst_55 = arith.constant dense<0.000000e+00> : vector<32x32xf32>
    %51 = tpu.matmul %48, %50, %cst_55 {dimension_numbers = #tpu.dot_dimension_numbers<[1], [0], [0], [1], [0, 0, 1, 1], [], []>} : vector<32x3xbf16>, vector<3x32xbf16>, vector<32x32xf32> -> vector<32x32xf32>
    %52 = arith.addf %47, %51 : vector<32x32xf32>
    %53 = vector.broadcast %0 : vector<1x32xf32> to vector<32x32xf32>
    %54 = arith.addf %52, %53 : vector<32x32xf32>
    %cst_56 = arith.constant 0.000000e+00 : f32
    %55 = vector.broadcast %cst_56 : f32 to vector<32x32xf32>
    %56 = arith.cmpf ogt, %54, %55 : vector<32x32xf32>
    %cst_57 = arith.constant 0.00999999977 : f32
    %57 = vector.broadcast %cst_57 : f32 to vector<32x32xf32>
    %58 = arith.mulf %57, %54 : vector<32x32xf32>
    %59 = arith.select %56, %54, %58 : vector<32x32xi1>, vector<32x32xf32>
    %60 = arith.truncf %59 : vector<32x32xf32> to vector<32x32xbf16>
    %c0_58 = arith.constant 0 : index
    %c0_59 = arith.constant 0 : index
    %c0_60 = arith.constant 0 : index
    %c0_61 = arith.constant 0 : index
    %61 = vector.load %arg7[%c0_58, %c0_59, %c0_60, %c0_61] : memref<1x8x32x32xbf16, #tpu.memory_space<vmem>>, vector<1x1x32x32xbf16>
    %62 = vector.shape_cast %61 : vector<1x1x32x32xbf16> to vector<32x32xbf16>
    %63 = vector.shape_cast %60 : vector<32x32xbf16> to vector<1x1x32x32xbf16>
    tpu.vector_store %arg7[%c0_58, %c0_59, %c0_60, %c0_61], %63 {strides = array<i32>} : memref<1x8x32x32xbf16, #tpu.memory_space<vmem>>, vector<1x1x32x32xbf16>,
    %cst_62 = arith.constant 0.000000e+00 : f32
    %64 = vector.broadcast %cst_62 : f32 to vector<32x32xf32>
    %c0_63 = arith.constant 0 : index
    %c1_64 = arith.constant 1 : index
    %c0_65 = arith.constant 0 : index
    %c0_66 = arith.constant 0 : index
    %65 = vector.load %arg3[%c0_63, %c1_64, %c0_65, %c0_66] : memref<1x8x34x3xbf16, #tpu.memory_space<vmem>>, vector<1x1x34x3xbf16>
    %66 = vector.shape_cast %65 : vector<1x1x34x3xbf16> to vector<34x3xbf16>
    %67 = vector.extract_strided_slice %66 {offsets = [0, 0], sizes = [32, 3], strides = [1, 1]} : vector<34x3xbf16> to vector<32x3xbf16>
    %c0_67 = arith.constant 0 : index
    %c0_68 = arith.constant 0 : index
    %c0_69 = arith.constant 0 : index
    %c0_70 = arith.constant 0 : index
    %68 = vector.load %arg5[%c0_67, %c0_68, %c0_69, %c0_70] : memref<3x3x3x32xbf16, #tpu.memory_space<vmem>>, vector<1x1x3x32xbf16>
    %69 = vector.shape_cast %68 : vector<1x1x3x32xbf16> to vector<3x32xbf16>
    %cst_71 = arith.constant dense<0.000000e+00> : vector<32x32xf32>
    %70 = tpu.matmul %67, %69, %cst_71 {dimension_numbers = #tpu.dot_dimension_numbers<[1], [0], [0], [1], [0, 0, 1, 1], [], []>} : vector<32x3xbf16>, vector<3x32xbf16>, vector<32x32xf32> -> vector<32x32xf32>
    %71 = arith.addf %64, %70 : vector<32x32xf32>
    %72 = vector.extract_strided_slice %66 {offsets = [1, 0], sizes = [32, 3], strides = [1, 1]} : vector<34x3xbf16> to vector<32x3xbf16>
    %c0_72 = arith.constant 0 : index
    %c1_73 = arith.constant 1 : index
    %c0_74 = arith.constant 0 : index
    %c0_75 = arith.constant 0 : index
    %73 = vector.load %arg5[%c0_72, %c1_73, %c0_74, %c0_75] : memref<3x3x3x32xbf16, #tpu.memory_space<vmem>>, vector<1x1x3x32xbf16>
    %74 = vector.shape_cast %73 : vector<1x1x3x32xbf16> to vector<3x32xbf16>
    %cst_76 = arith.constant dense<0.000000e+00> : vector<32x32xf32>
    %75 = tpu.matmul %72, %74, %cst_76 {dimension_numbers = #tpu.dot_dimension_numbers<[1], [0], [0], [1], [0, 0, 1, 1], [], []>} : vector<32x3xbf16>, vector<3x32xbf16>, vector<32x32xf32> -> vector<32x32xf32>
    %76 = arith.addf %71, %75 : vector<32x32xf32>
    %77 = vector.extract_strided_slice %66 {offsets = [2, 0], sizes = [32, 3], strides = [1, 1]} : vector<34x3xbf16> to vector<32x3xbf16>
    %c0_77 = arith.constant 0 : index
    %c2_78 = arith.constant 2 : index
    %c0_79 = arith.constant 0 : index
    %c0_80 = arith.constant 0 : index
    %78 = vector.load %arg5[%c0_77, %c2_78, %c0_79, %c0_80] : memref<3x3x3x32xbf16, #tpu.memory_space<vmem>>, vector<1x1x3x32xbf16>
    %79 = vector.shape_cast %78 : vector<1x1x3x32xbf16> to vector<3x32xbf16>
    %cst_81 = arith.constant dense<0.000000e+00> : vector<32x32xf32>
    %80 = tpu.matmul %77, %79, %cst_81 {dimension_numbers = #tpu.dot_dimension_numbers<[1], [0], [0], [1], [0, 0, 1, 1], [], []>} : vector<32x3xbf16>, vector<3x32xbf16>, vector<32x32xf32> -> vector<32x32xf32>
    %81 = arith.addf %76, %80 : vector<32x32xf32>
    %c0_82 = arith.constant 0 : index
    %c2_83 = arith.constant 2 : index
    %c0_84 = arith.constant 0 : index
    %c0_85 = arith.constant 0 : index
    %82 = vector.load %arg3[%c0_82, %c2_83, %c0_84, %c0_85] : memref<1x8x34x3xbf16, #tpu.memory_space<vmem>>, vector<1x1x34x3xbf16>
    %83 = vector.shape_cast %82 : vector<1x1x34x3xbf16> to vector<34x3xbf16>
    %84 = vector.extract_strided_slice %83 {offsets = [0, 0], sizes = [32, 3], strides = [1, 1]} : vector<34x3xbf16> to vector<32x3xbf16>
    %c1_86 = arith.constant 1 : index
    %c0_87 = arith.constant 0 : index
    %c0_88 = arith.constant 0 : index
    %c0_89 = arith.constant 0 : index
    %85 = vector.load %arg5[%c1_86, %c0_87, %c0_88, %c0_89] : memref<3x3x3x32xbf16, #tpu.memory_space<vmem>>, vector<1x1x3x32xbf16>
    %86 = vector.shape_cast %85 : vector<1x1x3x32xbf16> to vector<3x32xbf16>
    %cst_90 = arith.constant dense<0.000000e+00> : vector<32x32xf32>
    %87 = tpu.matmul %84, %86, %cst_90 {dimension_numbers = #tpu.dot_dimension_numbers<[1], [0], [0], [1], [0, 0, 1, 1], [], []>} : vector<32x3xbf16>, vector<3x32xbf16>, vector<32x32xf32> -> vector<32x32xf32>
    %88 = arith.addf %81, %87 : vector<32x32xf32>
    %89 = vector.extract_strided_slice %83 {offsets = [1, 0], sizes = [32, 3], strides = [1, 1]} : vector<34x3xbf16> to vector<32x3xbf16>
    %c1_91 = arith.constant 1 : index
    %c1_92 = arith.constant 1 : index
    %c0_93 = arith.constant 0 : index
    %c0_94 = arith.constant 0 : index
    %90 = vector.load %arg5[%c1_91, %c1_92, %c0_93, %c0_94] : memref<3x3x3x32xbf16, #tpu.memory_space<vmem>>, vector<1x1x3x32xbf16>
    %91 = vector.shape_cast %90 : vector<1x1x3x32xbf16> to vector<3x32xbf16>
    %cst_95 = arith.constant dense<0.000000e+00> : vector<32x32xf32>
    %92 = tpu.matmul %89, %91, %cst_95 {dimension_numbers = #tpu.dot_dimension_numbers<[1], [0], [0], [1], [0, 0, 1, 1], [], []>} : vector<32x3xbf16>, vector<3x32xbf16>, vector<32x32xf32> -> vector<32x32xf32>
    %93 = arith.addf %88, %92 : vector<32x32xf32>
    %94 = vector.extract_strided_slice %83 {offsets = [2, 0], sizes = [32, 3], strides = [1, 1]} : vector<34x3xbf16> to vector<32x3xbf16>
    %c1_96 = arith.constant 1 : index
    %c2_97 = arith.constant 2 : index
    %c0_98 = arith.constant 0 : index
    %c0_99 = arith.constant 0 : index
    %95 = vector.load %arg5[%c1_96, %c2_97, %c0_98, %c0_99] : memref<3x3x3x32xbf16, #tpu.memory_space<vmem>>, vector<1x1x3x32xbf16>
    %96 = vector.shape_cast %95 : vector<1x1x3x32xbf16> to vector<3x32xbf16>
    %cst_100 = arith.constant dense<0.000000e+00> : vector<32x32xf32>
    %97 = tpu.matmul %94, %96, %cst_100 {dimension_numbers = #tpu.dot_dimension_numbers<[1], [0], [0], [1], [0, 0, 1, 1], [], []>} : vector<32x3xbf16>, vector<3x32xbf16>, vector<32x32xf32> -> vector<32x32xf32>
    %98 = arith.addf %93, %97 : vector<32x32xf32>
    %c0_101 = arith.constant 0 : index
    %c3 = arith.constant 3 : index
    %c0_102 = arith.constant 0 : index
    %c0_103 = arith.constant 0 : index
    %99 = vector.load %arg3[%c0_101, %c3, %c0_102, %c0_103] : memref<1x8x34x3xbf16, #tpu.memory_space<vmem>>, vector<1x1x34x3xbf16>
    %100 = vector.shape_cast %99 : vector<1x1x34x3xbf16> to vector<34x3xbf16>
    %101 = vector.extract_strided_slice %100 {offsets = [0, 0], sizes = [32, 3], strides = [1, 1]} : vector<34x3xbf16> to vector<32x3xbf16>
    %c2_104 = arith.constant 2 : index
    %c0_105 = arith.constant 0 : index
    %c0_106 = arith.constant 0 : index
    %c0_107 = arith.constant 0 : index
    %102 = vector.load %arg5[%c2_104, %c0_105, %c0_106, %c0_107] : memref<3x3x3x32xbf16, #tpu.memory_space<vmem>>, vector<1x1x3x32xbf16>
    %103 = vector.shape_cast %102 : vector<1x1x3x32xbf16> to vector<3x32xbf16>
    %cst_108 = arith.constant dense<0.000000e+00> : vector<32x32xf32>
    %104 = tpu.matmul %101, %103, %cst_108 {dimension_numbers = #tpu.dot_dimension_numbers<[1], [0], [0], [1], [0, 0, 1, 1], [], []>} : vector<32x3xbf16>, vector<3x32xbf16>, vector<32x32xf32> -> vector<32x32xf32>
    %105 = arith.addf %98, %104 : vector<32x32xf32>
    %106 = vector.extract_strided_slice %100 {offsets = [1, 0], sizes = [32, 3], strides = [1, 1]} : vector<34x3xbf16> to vector<32x3xbf16>
    %c2_109 = arith.constant 2 : index
    %c1_110 = arith.constant 1 : index
    %c0_111 = arith.constant 0 : index
    %c0_112 = arith.constant 0 : index
    %107 = vector.load %arg5[%c2_109, %c1_110, %c0_111, %c0_112] : memref<3x3x3x32xbf16, #tpu.memory_space<vmem>>, vector<1x1x3x32xbf16>
    %108 = vector.shape_cast %107 : vector<1x1x3x32xbf16> to vector<3x32xbf16>
    %cst_113 = arith.constant dense<0.000000e+00> : vector<32x32xf32>
    %109 = tpu.matmul %106, %108, %cst_113 {dimension_numbers = #tpu.dot_dimension_numbers<[1], [0], [0], [1], [0, 0, 1, 1], [], []>} : vector<32x3xbf16>, vector<3x32xbf16>, vector<32x32xf32> -> vector<32x32xf32>
    %110 = arith.addf %105, %109 : vector<32x32xf32>
    %111 = vector.extract_strided_slice %100 {offsets = [2, 0], sizes = [32, 3], strides = [1, 1]} : vector<34x3xbf16> to vector<32x3xbf16>
    %c2_114 = arith.constant 2 : index
    %c2_115 = arith.constant 2 : index
    %c0_116 = arith.constant 0 : index
    %c0_117 = arith.constant 0 : index
    %112 = vector.load %arg5[%c2_114, %c2_115, %c0_116, %c0_117] : memref<3x3x3x32xbf16, #tpu.memory_space<vmem>>, vector<1x1x3x32xbf16>
    %113 = vector.shape_cast %112 : vector<1x1x3x32xbf16> to vector<3x32xbf16>
    %cst_118 = arith.constant dense<0.000000e+00> : vector<32x32xf32>
    %114 = tpu.matmul %111, %113, %cst_118 {dimension_numbers = #tpu.dot_dimension_numbers<[1], [0], [0], [1], [0, 0, 1, 1], [], []>} : vector<32x3xbf16>, vector<3x32xbf16>, vector<32x32xf32> -> vector<32x32xf32>
    %115 = arith.addf %110, %114 : vector<32x32xf32>
    %116 = vector.broadcast %0 : vector<1x32xf32> to vector<32x32xf32>
    %117 = arith.addf %115, %116 : vector<32x32xf32>
    %cst_119 = arith.constant 0.000000e+00 : f32
    %118 = vector.broadcast %cst_119 : f32 to vector<32x32xf32>
    %119 = arith.cmpf ogt, %117, %118 : vector<32x32xf32>
    %cst_120 = arith.constant 0.00999999977 : f32
    %120 = vector.broadcast %cst_120 : f32 to vector<32x32xf32>
    %121 = arith.mulf %120, %117 : vector<32x32xf32>
    %122 = arith.select %119, %117, %121 : vector<32x32xi1>, vector<32x32xf32>
    %123 = arith.truncf %122 : vector<32x32xf32> to vector<32x32xbf16>
    %c0_121 = arith.constant 0 : index
    %c1_122 = arith.constant 1 : index
    %c0_123 = arith.constant 0 : index
    %c0_124 = arith.constant 0 : index
    %124 = vector.load %arg7[%c0_121, %c1_122, %c0_123, %c0_124] : memref<1x8x32x32xbf16, #tpu.memory_space<vmem>>, vector<1x1x32x32xbf16>
    %125 = vector.shape_cast %124 : vector<1x1x32x32xbf16> to vector<32x32xbf16>
    %126 = vector.shape_cast %123 : vector<32x32xbf16> to vector<1x1x32x32xbf16>
    tpu.vector_store %arg7[%c0_121, %c1_122, %c0_123, %c0_124], %126 {strides = array<i32>} : memref<1x8x32x32xbf16, #tpu.memory_space<vmem>>, vector<1x1x32x32xbf16>,
    %cst_125 = arith.constant 0.000000e+00 : f32
    %127 = vector.broadcast %cst_125 : f32 to vector<32x32xf32>
    %c0_126 = arith.constant 0 : index
    %c2_127 = arith.constant 2 : index
    %c0_128 = arith.constant 0 : index
    %c0_129 = arith.constant 0 : index
    %128 = vector.load %arg3[%c0_126, %c2_127, %c0_128, %c0_129] : memref<1x8x34x3xbf16, #tpu.memory_space<vmem>>, vector<1x1x34x3xbf16>
    %129 = vector.shape_cast %128 : vector<1x1x34x3xbf16> to vector<34x3xbf16>
    %130 = vector.extract_strided_slice %129 {offsets = [0, 0], sizes = [32, 3], strides = [1, 1]} : vector<34x3xbf16> to vector<32x3xbf16>
    %c0_130 = arith.constant 0 : index
    %c0_131 = arith.constant 0 : index
    %c0_132 = arith.constant 0 : index
    %c0_133 = arith.constant 0 : index
    %131 = vector.load %arg5[%c0_130, %c0_131, %c0_132, %c0_133] : memref<3x3x3x32xbf16, #tpu.memory_space<vmem>>, vector<1x1x3x32xbf16>
    %132 = vector.shape_cast %131 : vector<1x1x3x32xbf16> to vector<3x32xbf16>
    %cst_134 = arith.constant dense<0.000000e+00> : vector<32x32xf32>
    %133 = tpu.matmul %130, %132, %cst_134 {dimension_numbers = #tpu.dot_dimension_numbers<[1], [0], [0], [1], [0, 0, 1, 1], [], []>} : vector<32x3xbf16>, vector<3x32xbf16>, vector<32x32xf32> -> vector<32x32xf32>
    %134 = arith.addf %127, %133 : vector<32x32xf32>
    %135 = vector.extract_strided_slice %129 {offsets = [1, 0], sizes = [32, 3], strides = [1, 1]} : vector<34x3xbf16> to vector<32x3xbf16>
    %c0_135 = arith.constant 0 : index
    %c1_136 = arith.constant 1 : index
    %c0_137 = arith.constant 0 : index
    %c0_138 = arith.constant 0 : index
    %136 = vector.load %arg5[%c0_135, %c1_136, %c0_137, %c0_138] : memref<3x3x3x32xbf16, #tpu.memory_space<vmem>>, vector<1x1x3x32xbf16>
    %137 = vector.shape_cast %136 : vector<1x1x3x32xbf16> to vector<3x32xbf16>
    %cst_139 = arith.constant dense<0.000000e+00> : vector<32x32xf32>
    %138 = tpu.matmul %135, %137, %cst_139 {dimension_numbers = #tpu.dot_dimension_numbers<[1], [0], [0], [1], [0, 0, 1, 1], [], []>} : vector<32x3xbf16>, vector<3x32xbf16>, vector<32x32xf32> -> vector<32x32xf32>
    %139 = arith.addf %134, %138 : vector<32x32xf32>
    %140 = vector.extract_strided_slice %129 {offsets = [2, 0], sizes = [32, 3], strides = [1, 1]} : vector<34x3xbf16> to vector<32x3xbf16>
    %c0_140 = arith.constant 0 : index
    %c2_141 = arith.constant 2 : index
    %c0_142 = arith.constant 0 : index
    %c0_143 = arith.constant 0 : index
    %141 = vector.load %arg5[%c0_140, %c2_141, %c0_142, %c0_143] : memref<3x3x3x32xbf16, #tpu.memory_space<vmem>>, vector<1x1x3x32xbf16>
    %142 = vector.shape_cast %141 : vector<1x1x3x32xbf16> to vector<3x32xbf16>
    %cst_144 = arith.constant dense<0.000000e+00> : vector<32x32xf32>
    %143 = tpu.matmul %140, %142, %cst_144 {dimension_numbers = #tpu.dot_dimension_numbers<[1], [0], [0], [1], [0, 0, 1, 1], [], []>} : vector<32x3xbf16>, vector<3x32xbf16>, vector<32x32xf32> -> vector<32x32xf32>
    %144 = arith.addf %139, %143 : vector<32x32xf32>
    %c0_145 = arith.constant 0 : index
    %c3_146 = arith.constant 3 : index
    %c0_147 = arith.constant 0 : index
    %c0_148 = arith.constant 0 : index
    %145 = vector.load %arg3[%c0_145, %c3_146, %c0_147, %c0_148] : memref<1x8x34x3xbf16, #tpu.memory_space<vmem>>, vector<1x1x34x3xbf16>
    %146 = vector.shape_cast %145 : vector<1x1x34x3xbf16> to vector<34x3xbf16>
    %147 = vector.extract_strided_slice %146 {offsets = [0, 0], sizes = [32, 3], strides = [1, 1]} : vector<34x3xbf16> to vector<32x3xbf16>
    %c1_149 = arith.constant 1 : index
    %c0_150 = arith.constant 0 : index
    %c0_151 = arith.constant 0 : index
    %c0_152 = arith.constant 0 : index
    %148 = vector.load %arg5[%c1_149, %c0_150, %c0_151, %c0_152] : memref<3x3x3x32xbf16, #tpu.memory_space<vmem>>, vector<1x1x3x32xbf16>
    %149 = vector.shape_cast %148 : vector<1x1x3x32xbf16> to vector<3x32xbf16>
    %cst_153 = arith.constant dense<0.000000e+00> : vector<32x32xf32>
    %150 = tpu.matmul %147, %149, %cst_153 {dimension_numbers = #tpu.dot_dimension_numbers<[1], [0], [0], [1], [0, 0, 1, 1], [], []>} : vector<32x3xbf16>, vector<3x32xbf16>, vector<32x32xf32> -> vector<32x32xf32>
    %151 = arith.addf %144, %150 : vector<32x32xf32>
    %152 = vector.extract_strided_slice %146 {offsets = [1, 0], sizes = [32, 3], strides = [1, 1]} : vector<34x3xbf16> to vector<32x3xbf16>
    %c1_154 = arith.constant 1 : index
    %c1_155 = arith.constant 1 : index
    %c0_156 = arith.constant 0 : index
    %c0_157 = arith.constant 0 : index
    %153 = vector.load %arg5[%c1_154, %c1_155, %c0_156, %c0_157] : memref<3x3x3x32xbf16, #tpu.memory_space<vmem>>, vector<1x1x3x32xbf16>
    %154 = vector.shape_cast %153 : vector<1x1x3x32xbf16> to vector<3x32xbf16>
    %cst_158 = arith.constant dense<0.000000e+00> : vector<32x32xf32>
    %155 = tpu.matmul %152, %154, %cst_158 {dimension_numbers = #tpu.dot_dimension_numbers<[1], [0], [0], [1], [0, 0, 1, 1], [], []>} : vector<32x3xbf16>, vector<3x32xbf16>, vector<32x32xf32> -> vector<32x32xf32>
    %156 = arith.addf %151, %155 : vector<32x32xf32>
    %157 = vector.extract_strided_slice %146 {offsets = [2, 0], sizes = [32, 3], strides = [1, 1]} : vector<34x3xbf16> to vector<32x3xbf16>
    %c1_159 = arith.constant 1 : index
    %c2_160 = arith.constant 2 : index
    %c0_161 = arith.constant 0 : index
    %c0_162 = arith.constant 0 : index
    %158 = vector.load %arg5[%c1_159, %c2_160, %c0_161, %c0_162] : memref<3x3x3x32xbf16, #tpu.memory_space<vmem>>, vector<1x1x3x32xbf16>
    %159 = vector.shape_cast %158 : vector<1x1x3x32xbf16> to vector<3x32xbf16>
    %cst_163 = arith.constant dense<0.000000e+00> : vector<32x32xf32>
    %160 = tpu.matmul %157, %159, %cst_163 {dimension_numbers = #tpu.dot_dimension_numbers<[1], [0], [0], [1], [0, 0, 1, 1], [], []>} : vector<32x3xbf16>, vector<3x32xbf16>, vector<32x32xf32> -> vector<32x32xf32>
    %161 = arith.addf %156, %160 : vector<32x32xf32>
    %c0_164 = arith.constant 0 : index
    %c4 = arith.constant 4 : index
    %c0_165 = arith.constant 0 : index
    %c0_166 = arith.constant 0 : index
    %162 = vector.load %arg3[%c0_164, %c4, %c0_165, %c0_166] : memref<1x8x34x3xbf16, #tpu.memory_space<vmem>>, vector<1x1x34x3xbf16>
    %163 = vector.shape_cast %162 : vector<1x1x34x3xbf16> to vector<34x3xbf16>
    %164 = vector.extract_strided_slice %163 {offsets = [0, 0], sizes = [32, 3], strides = [1, 1]} : vector<34x3xbf16> to vector<32x3xbf16>
    %c2_167 = arith.constant 2 : index
    %c0_168 = arith.constant 0 : index
    %c0_169 = arith.constant 0 : index
    %c0_170 = arith.constant 0 : index
    %165 = vector.load %arg5[%c2_167, %c0_168, %c0_169, %c0_170] : memref<3x3x3x32xbf16, #tpu.memory_space<vmem>>, vector<1x1x3x32xbf16>
    %166 = vector.shape_cast %165 : vector<1x1x3x32xbf16> to vector<3x32xbf16>
    %cst_171 = arith.constant dense<0.000000e+00> : vector<32x32xf32>
    %167 = tpu.matmul %164, %166, %cst_171 {dimension_numbers = #tpu.dot_dimension_numbers<[1], [0], [0], [1], [0, 0, 1, 1], [], []>} : vector<32x3xbf16>, vector<3x32xbf16>, vector<32x32xf32> -> vector<32x32xf32>
    %168 = arith.addf %161, %167 : vector<32x32xf32>
    %169 = vector.extract_strided_slice %163 {offsets = [1, 0], sizes = [32, 3], strides = [1, 1]} : vector<34x3xbf16> to vector<32x3xbf16>
    %c2_172 = arith.constant 2 : index
    %c1_173 = arith.constant 1 : index
    %c0_174 = arith.constant 0 : index
    %c0_175 = arith.constant 0 : index
    %170 = vector.load %arg5[%c2_172, %c1_173, %c0_174, %c0_175] : memref<3x3x3x32xbf16, #tpu.memory_space<vmem>>, vector<1x1x3x32xbf16>
    %171 = vector.shape_cast %170 : vector<1x1x3x32xbf16> to vector<3x32xbf16>
    %cst_176 = arith.constant dense<0.000000e+00> : vector<32x32xf32>
    %172 = tpu.matmul %169, %171, %cst_176 {dimension_numbers = #tpu.dot_dimension_numbers<[1], [0], [0], [1], [0, 0, 1, 1], [], []>} : vector<32x3xbf16>, vector<3x32xbf16>, vector<32x32xf32> -> vector<32x32xf32>
    %173 = arith.addf %168, %172 : vector<32x32xf32>
    %174 = vector.extract_strided_slice %163 {offsets = [2, 0], sizes = [32, 3], strides = [1, 1]} : vector<34x3xbf16> to vector<32x3xbf16>
    %c2_177 = arith.constant 2 : index
    %c2_178 = arith.constant 2 : index
    %c0_179 = arith.constant 0 : index
    %c0_180 = arith.constant 0 : index
    %175 = vector.load %arg5[%c2_177, %c2_178, %c0_179, %c0_180] : memref<3x3x3x32xbf16, #tpu.memory_space<vmem>>, vector<1x1x3x32xbf16>
    %176 = vector.shape_cast %175 : vector<1x1x3x32xbf16> to vector<3x32xbf16>
    %cst_181 = arith.constant dense<0.000000e+00> : vector<32x32xf32>
    %177 = tpu.matmul %174, %176, %cst_181 {dimension_numbers = #tpu.dot_dimension_numbers<[1], [0], [0], [1], [0, 0, 1, 1], [], []>} : vector<32x3xbf16>, vector<3x32xbf16>, vector<32x32xf32> -> vector<32x32xf32>
    %178 = arith.addf %173, %177 : vector<32x32xf32>
    %179 = vector.broadcast %0 : vector<1x32xf32> to vector<32x32xf32>
    %180 = arith.addf %178, %179 : vector<32x32xf32>
    %cst_182 = arith.constant 0.000000e+00 : f32
    %181 = vector.broadcast %cst_182 : f32 to vector<32x32xf32>
    %182 = arith.cmpf ogt, %180, %181 : vector<32x32xf32>
    %cst_183 = arith.constant 0.00999999977 : f32
    %183 = vector.broadcast %cst_183 : f32 to vector<32x32xf32>
    %184 = arith.mulf %183, %180 : vector<32x32xf32>
    %185 = arith.select %182, %180, %184 : vector<32x32xi1>, vector<32x32xf32>
    %186 = arith.truncf %185 : vector<32x32xf32> to vector<32x32xbf16>
    %c0_184 = arith.constant 0 : index
    %c2_185 = arith.constant 2 : index
    %c0_186 = arith.constant 0 : index
    %c0_187 = arith.constant 0 : index
    %187 = vector.load %arg7[%c0_184, %c2_185, %c0_186, %c0_187] : memref<1x8x32x32xbf16, #tpu.memory_space<vmem>>, vector<1x1x32x32xbf16>
    %188 = vector.shape_cast %187 : vector<1x1x32x32xbf16> to vector<32x32xbf16>
    %189 = vector.shape_cast %186 : vector<32x32xbf16> to vector<1x1x32x32xbf16>
    tpu.vector_store %arg7[%c0_184, %c2_185, %c0_186, %c0_187], %189 {strides = array<i32>} : memref<1x8x32x32xbf16, #tpu.memory_space<vmem>>, vector<1x1x32x32xbf16>,
    %cst_188 = arith.constant 0.000000e+00 : f32
    %190 = vector.broadcast %cst_188 : f32 to vector<32x32xf32>
    %c0_189 = arith.constant 0 : index
    %c3_190 = arith.constant 3 : index
    %c0_191 = arith.constant 0 : index
    %c0_192 = arith.constant 0 : index
    %191 = vector.load %arg3[%c0_189, %c3_190, %c0_191, %c0_192] : memref<1x8x34x3xbf16, #tpu.memory_space<vmem>>, vector<1x1x34x3xbf16>
    %192 = vector.shape_cast %191 : vector<1x1x34x3xbf16> to vector<34x3xbf16>
    %193 = vector.extract_strided_slice %192 {offsets = [0, 0], sizes = [32, 3], strides = [1, 1]} : vector<34x3xbf16> to vector<32x3xbf16>
    %c0_193 = arith.constant 0 : index
    %c0_194 = arith.constant 0 : index
    %c0_195 = arith.constant 0 : index
    %c0_196 = arith.constant 0 : index
    %194 = vector.load %arg5[%c0_193, %c0_194, %c0_195, %c0_196] : memref<3x3x3x32xbf16, #tpu.memory_space<vmem>>, vector<1x1x3x32xbf16>
    %195 = vector.shape_cast %194 : vector<1x1x3x32xbf16> to vector<3x32xbf16>
    %cst_197 = arith.constant dense<0.000000e+00> : vector<32x32xf32>
    %196 = tpu.matmul %193, %195, %cst_197 {dimension_numbers = #tpu.dot_dimension_numbers<[1], [0], [0], [1], [0, 0, 1, 1], [], []>} : vector<32x3xbf16>, vector<3x32xbf16>, vector<32x32xf32> -> vector<32x32xf32>
    %197 = arith.addf %190, %196 : vector<32x32xf32>
    %198 = vector.extract_strided_slice %192 {offsets = [1, 0], sizes = [32, 3], strides = [1, 1]} : vector<34x3xbf16> to vector<32x3xbf16>
    %c0_198 = arith.constant 0 : index
    %c1_199 = arith.constant 1 : index
    %c0_200 = arith.constant 0 : index
    %c0_201 = arith.constant 0 : index
    %199 = vector.load %arg5[%c0_198, %c1_199, %c0_200, %c0_201] : memref<3x3x3x32xbf16, #tpu.memory_space<vmem>>, vector<1x1x3x32xbf16>
    %200 = vector.shape_cast %199 : vector<1x1x3x32xbf16> to vector<3x32xbf16>
    %cst_202 = arith.constant dense<0.000000e+00> : vector<32x32xf32>
    %201 = tpu.matmul %198, %200, %cst_202 {dimension_numbers = #tpu.dot_dimension_numbers<[1], [0], [0], [1], [0, 0, 1, 1], [], []>} : vector<32x3xbf16>, vector<3x32xbf16>, vector<32x32xf32> -> vector<32x32xf32>
    %202 = arith.addf %197, %201 : vector<32x32xf32>
    %203 = vector.extract_strided_slice %192 {offsets = [2, 0], sizes = [32, 3], strides = [1, 1]} : vector<34x3xbf16> to vector<32x3xbf16>
    %c0_203 = arith.constant 0 : index
    %c2_204 = arith.constant 2 : index
    %c0_205 = arith.constant 0 : index
    %c0_206 = arith.constant 0 : index
    %204 = vector.load %arg5[%c0_203, %c2_204, %c0_205, %c0_206] : memref<3x3x3x32xbf16, #tpu.memory_space<vmem>>, vector<1x1x3x32xbf16>
    %205 = vector.shape_cast %204 : vector<1x1x3x32xbf16> to vector<3x32xbf16>
    %cst_207 = arith.constant dense<0.000000e+00> : vector<32x32xf32>
    %206 = tpu.matmul %203, %205, %cst_207 {dimension_numbers = #tpu.dot_dimension_numbers<[1], [0], [0], [1], [0, 0, 1, 1], [], []>} : vector<32x3xbf16>, vector<3x32xbf16>, vector<32x32xf32> -> vector<32x32xf32>
    %207 = arith.addf %202, %206 : vector<32x32xf32>
    %c0_208 = arith.constant 0 : index
    %c4_209 = arith.constant 4 : index
    %c0_210 = arith.constant 0 : index
    %c0_211 = arith.constant 0 : index
    %208 = vector.load %arg3[%c0_208, %c4_209, %c0_210, %c0_211] : memref<1x8x34x3xbf16, #tpu.memory_space<vmem>>, vector<1x1x34x3xbf16>
    %209 = vector.shape_cast %208 : vector<1x1x34x3xbf16> to vector<34x3xbf16>
    %210 = vector.extract_strided_slice %209 {offsets = [0, 0], sizes = [32, 3], strides = [1, 1]} : vector<34x3xbf16> to vector<32x3xbf16>
    %c1_212 = arith.constant 1 : index
    %c0_213 = arith.constant 0 : index
    %c0_214 = arith.constant 0 : index
    %c0_215 = arith.constant 0 : index
    %211 = vector.load %arg5[%c1_212, %c0_213, %c0_214, %c0_215] : memref<3x3x3x32xbf16, #tpu.memory_space<vmem>>, vector<1x1x3x32xbf16>
    %212 = vector.shape_cast %211 : vector<1x1x3x32xbf16> to vector<3x32xbf16>
    %cst_216 = arith.constant dense<0.000000e+00> : vector<32x32xf32>
    %213 = tpu.matmul %210, %212, %cst_216 {dimension_numbers = #tpu.dot_dimension_numbers<[1], [0], [0], [1], [0, 0, 1, 1], [], []>} : vector<32x3xbf16>, vector<3x32xbf16>, vector<32x32xf32> -> vector<32x32xf32>
    %214 = arith.addf %207, %213 : vector<32x32xf32>
    %215 = vector.extract_strided_slice %209 {offsets = [1, 0], sizes = [32, 3], strides = [1, 1]} : vector<34x3xbf16> to vector<32x3xbf16>
    %c1_217 = arith.constant 1 : index
    %c1_218 = arith.constant 1 : index
    %c0_219 = arith.constant 0 : index
    %c0_220 = arith.constant 0 : index
    %216 = vector.load %arg5[%c1_217, %c1_218, %c0_219, %c0_220] : memref<3x3x3x32xbf16, #tpu.memory_space<vmem>>, vector<1x1x3x32xbf16>
    %217 = vector.shape_cast %216 : vector<1x1x3x32xbf16> to vector<3x32xbf16>
    %cst_221 = arith.constant dense<0.000000e+00> : vector<32x32xf32>
    %218 = tpu.matmul %215, %217, %cst_221 {dimension_numbers = #tpu.dot_dimension_numbers<[1], [0], [0], [1], [0, 0, 1, 1], [], []>} : vector<32x3xbf16>, vector<3x32xbf16>, vector<32x32xf32> -> vector<32x32xf32>
    %219 = arith.addf %214, %218 : vector<32x32xf32>
    %220 = vector.extract_strided_slice %209 {offsets = [2, 0], sizes = [32, 3], strides = [1, 1]} : vector<34x3xbf16> to vector<32x3xbf16>
    %c1_222 = arith.constant 1 : index
    %c2_223 = arith.constant 2 : index
    %c0_224 = arith.constant 0 : index
    %c0_225 = arith.constant 0 : index
    %221 = vector.load %arg5[%c1_222, %c2_223, %c0_224, %c0_225] : memref<3x3x3x32xbf16, #tpu.memory_space<vmem>>, vector<1x1x3x32xbf16>
    %222 = vector.shape_cast %221 : vector<1x1x3x32xbf16> to vector<3x32xbf16>
    %cst_226 = arith.constant dense<0.000000e+00> : vector<32x32xf32>
    %223 = tpu.matmul %220, %222, %cst_226 {dimension_numbers = #tpu.dot_dimension_numbers<[1], [0], [0], [1], [0, 0, 1, 1], [], []>} : vector<32x3xbf16>, vector<3x32xbf16>, vector<32x32xf32> -> vector<32x32xf32>
    %224 = arith.addf %219, %223 : vector<32x32xf32>
    %c0_227 = arith.constant 0 : index
    %c5 = arith.constant 5 : index
    %c0_228 = arith.constant 0 : index
    %c0_229 = arith.constant 0 : index
    %225 = vector.load %arg3[%c0_227, %c5, %c0_228, %c0_229] : memref<1x8x34x3xbf16, #tpu.memory_space<vmem>>, vector<1x1x34x3xbf16>
    %226 = vector.shape_cast %225 : vector<1x1x34x3xbf16> to vector<34x3xbf16>
    %227 = vector.extract_strided_slice %226 {offsets = [0, 0], sizes = [32, 3], strides = [1, 1]} : vector<34x3xbf16> to vector<32x3xbf16>
    %c2_230 = arith.constant 2 : index
    %c0_231 = arith.constant 0 : index
    %c0_232 = arith.constant 0 : index
    %c0_233 = arith.constant 0 : index
    %228 = vector.load %arg5[%c2_230, %c0_231, %c0_232, %c0_233] : memref<3x3x3x32xbf16, #tpu.memory_space<vmem>>, vector<1x1x3x32xbf16>
    %229 = vector.shape_cast %228 : vector<1x1x3x32xbf16> to vector<3x32xbf16>
    %cst_234 = arith.constant dense<0.000000e+00> : vector<32x32xf32>
    %230 = tpu.matmul %227, %229, %cst_234 {dimension_numbers = #tpu.dot_dimension_numbers<[1], [0], [0], [1], [0, 0, 1, 1], [], []>} : vector<32x3xbf16>, vector<3x32xbf16>, vector<32x32xf32> -> vector<32x32xf32>
    %231 = arith.addf %224, %230 : vector<32x32xf32>
    %232 = vector.extract_strided_slice %226 {offsets = [1, 0], sizes = [32, 3], strides = [1, 1]} : vector<34x3xbf16> to vector<32x3xbf16>
    %c2_235 = arith.constant 2 : index
    %c1_236 = arith.constant 1 : index
    %c0_237 = arith.constant 0 : index
    %c0_238 = arith.constant 0 : index
    %233 = vector.load %arg5[%c2_235, %c1_236, %c0_237, %c0_238] : memref<3x3x3x32xbf16, #tpu.memory_space<vmem>>, vector<1x1x3x32xbf16>
    %234 = vector.shape_cast %233 : vector<1x1x3x32xbf16> to vector<3x32xbf16>
    %cst_239 = arith.constant dense<0.000000e+00> : vector<32x32xf32>
    %235 = tpu.matmul %232, %234, %cst_239 {dimension_numbers = #tpu.dot_dimension_numbers<[1], [0], [0], [1], [0, 0, 1, 1], [], []>} : vector<32x3xbf16>, vector<3x32xbf16>, vector<32x32xf32> -> vector<32x32xf32>
    %236 = arith.addf %231, %235 : vector<32x32xf32>
    %237 = vector.extract_strided_slice %226 {offsets = [2, 0], sizes = [32, 3], strides = [1, 1]} : vector<34x3xbf16> to vector<32x3xbf16>
    %c2_240 = arith.constant 2 : index
    %c2_241 = arith.constant 2 : index
    %c0_242 = arith.constant 0 : index
    %c0_243 = arith.constant 0 : index
    %238 = vector.load %arg5[%c2_240, %c2_241, %c0_242, %c0_243] : memref<3x3x3x32xbf16, #tpu.memory_space<vmem>>, vector<1x1x3x32xbf16>
    %239 = vector.shape_cast %238 : vector<1x1x3x32xbf16> to vector<3x32xbf16>
    %cst_244 = arith.constant dense<0.000000e+00> : vector<32x32xf32>
    %240 = tpu.matmul %237, %239, %cst_244 {dimension_numbers = #tpu.dot_dimension_numbers<[1], [0], [0], [1], [0, 0, 1, 1], [], []>} : vector<32x3xbf16>, vector<3x32xbf16>, vector<32x32xf32> -> vector<32x32xf32>
    %241 = arith.addf %236, %240 : vector<32x32xf32>
    %242 = vector.broadcast %0 : vector<1x32xf32> to vector<32x32xf32>
    %243 = arith.addf %241, %242 : vector<32x32xf32>
    %cst_245 = arith.constant 0.000000e+00 : f32
    %244 = vector.broadcast %cst_245 : f32 to vector<32x32xf32>
    %245 = arith.cmpf ogt, %243, %244 : vector<32x32xf32>
    %cst_246 = arith.constant 0.00999999977 : f32
    %246 = vector.broadcast %cst_246 : f32 to vector<32x32xf32>
    %247 = arith.mulf %246, %243 : vector<32x32xf32>
    %248 = arith.select %245, %243, %247 : vector<32x32xi1>, vector<32x32xf32>
    %249 = arith.truncf %248 : vector<32x32xf32> to vector<32x32xbf16>
    %c0_247 = arith.constant 0 : index
    %c3_248 = arith.constant 3 : index
    %c0_249 = arith.constant 0 : index
    %c0_250 = arith.constant 0 : index
    %250 = vector.load %arg7[%c0_247, %c3_248, %c0_249, %c0_250] : memref<1x8x32x32xbf16, #tpu.memory_space<vmem>>, vector<1x1x32x32xbf16>
    %251 = vector.shape_cast %250 : vector<1x1x32x32xbf16> to vector<32x32xbf16>
    %252 = vector.shape_cast %249 : vector<32x32xbf16> to vector<1x1x32x32xbf16>
    tpu.vector_store %arg7[%c0_247, %c3_248, %c0_249, %c0_250], %252 {strides = array<i32>} : memref<1x8x32x32xbf16, #tpu.memory_space<vmem>>, vector<1x1x32x32xbf16>,
    %cst_251 = arith.constant 0.000000e+00 : f32
    %253 = vector.broadcast %cst_251 : f32 to vector<32x32xf32>
    %c0_252 = arith.constant 0 : index
    %c4_253 = arith.constant 4 : index
    %c0_254 = arith.constant 0 : index
    %c0_255 = arith.constant 0 : index
    %254 = vector.load %arg3[%c0_252, %c4_253, %c0_254, %c0_255] : memref<1x8x34x3xbf16, #tpu.memory_space<vmem>>, vector<1x1x34x3xbf16>
    %255 = vector.shape_cast %254 : vector<1x1x34x3xbf16> to vector<34x3xbf16>
    %256 = vector.extract_strided_slice %255 {offsets = [0, 0], sizes = [32, 3], strides = [1, 1]} : vector<34x3xbf16> to vector<32x3xbf16>
    %c0_256 = arith.constant 0 : index
    %c0_257 = arith.constant 0 : index
    %c0_258 = arith.constant 0 : index
    %c0_259 = arith.constant 0 : index
    %257 = vector.load %arg5[%c0_256, %c0_257, %c0_258, %c0_259] : memref<3x3x3x32xbf16, #tpu.memory_space<vmem>>, vector<1x1x3x32xbf16>
    %258 = vector.shape_cast %257 : vector<1x1x3x32xbf16> to vector<3x32xbf16>
    %cst_260 = arith.constant dense<0.000000e+00> : vector<32x32xf32>
    %259 = tpu.matmul %256, %258, %cst_260 {dimension_numbers = #tpu.dot_dimension_numbers<[1], [0], [0], [1], [0, 0, 1, 1], [], []>} : vector<32x3xbf16>, vector<3x32xbf16>, vector<32x32xf32> -> vector<32x32xf32>
    %260 = arith.addf %253, %259 : vector<32x32xf32>
    %261 = vector.extract_strided_slice %255 {offsets = [1, 0], sizes = [32, 3], strides = [1, 1]} : vector<34x3xbf16> to vector<32x3xbf16>
    %c0_261 = arith.constant 0 : index
    %c1_262 = arith.constant 1 : index
    %c0_263 = arith.constant 0 : index
    %c0_264 = arith.constant 0 : index
    %262 = vector.load %arg5[%c0_261, %c1_262, %c0_263, %c0_264] : memref<3x3x3x32xbf16, #tpu.memory_space<vmem>>, vector<1x1x3x32xbf16>
    %263 = vector.shape_cast %262 : vector<1x1x3x32xbf16> to vector<3x32xbf16>
    %cst_265 = arith.constant dense<0.000000e+00> : vector<32x32xf32>
    %264 = tpu.matmul %261, %263, %cst_265 {dimension_numbers = #tpu.dot_dimension_numbers<[1], [0], [0], [1], [0, 0, 1, 1], [], []>} : vector<32x3xbf16>, vector<3x32xbf16>, vector<32x32xf32> -> vector<32x32xf32>
    %265 = arith.addf %260, %264 : vector<32x32xf32>
    %266 = vector.extract_strided_slice %255 {offsets = [2, 0], sizes = [32, 3], strides = [1, 1]} : vector<34x3xbf16> to vector<32x3xbf16>
    %c0_266 = arith.constant 0 : index
    %c2_267 = arith.constant 2 : index
    %c0_268 = arith.constant 0 : index
    %c0_269 = arith.constant 0 : index
    %267 = vector.load %arg5[%c0_266, %c2_267, %c0_268, %c0_269] : memref<3x3x3x32xbf16, #tpu.memory_space<vmem>>, vector<1x1x3x32xbf16>
    %268 = vector.shape_cast %267 : vector<1x1x3x32xbf16> to vector<3x32xbf16>
    %cst_270 = arith.constant dense<0.000000e+00> : vector<32x32xf32>
    %269 = tpu.matmul %266, %268, %cst_270 {dimension_numbers = #tpu.dot_dimension_numbers<[1], [0], [0], [1], [0, 0, 1, 1], [], []>} : vector<32x3xbf16>, vector<3x32xbf16>, vector<32x32xf32> -> vector<32x32xf32>
    %270 = arith.addf %265, %269 : vector<32x32xf32>
    %c0_271 = arith.constant 0 : index
    %c5_272 = arith.constant 5 : index
    %c0_273 = arith.constant 0 : index
    %c0_274 = arith.constant 0 : index
    %271 = vector.load %arg3[%c0_271, %c5_272, %c0_273, %c0_274] : memref<1x8x34x3xbf16, #tpu.memory_space<vmem>>, vector<1x1x34x3xbf16>
    %272 = vector.shape_cast %271 : vector<1x1x34x3xbf16> to vector<34x3xbf16>
    %273 = vector.extract_strided_slice %272 {offsets = [0, 0], sizes = [32, 3], strides = [1, 1]} : vector<34x3xbf16> to vector<32x3xbf16>
    %c1_275 = arith.constant 1 : index
    %c0_276 = arith.constant 0 : index
    %c0_277 = arith.constant 0 : index
    %c0_278 = arith.constant 0 : index
    %274 = vector.load %arg5[%c1_275, %c0_276, %c0_277, %c0_278] : memref<3x3x3x32xbf16, #tpu.memory_space<vmem>>, vector<1x1x3x32xbf16>
    %275 = vector.shape_cast %274 : vector<1x1x3x32xbf16> to vector<3x32xbf16>
    %cst_279 = arith.constant dense<0.000000e+00> : vector<32x32xf32>
    %276 = tpu.matmul %273, %275, %cst_279 {dimension_numbers = #tpu.dot_dimension_numbers<[1], [0], [0], [1], [0, 0, 1, 1], [], []>} : vector<32x3xbf16>, vector<3x32xbf16>, vector<32x32xf32> -> vector<32x32xf32>
    %277 = arith.addf %270, %276 : vector<32x32xf32>
    %278 = vector.extract_strided_slice %272 {offsets = [1, 0], sizes = [32, 3], strides = [1, 1]} : vector<34x3xbf16> to vector<32x3xbf16>
    %c1_280 = arith.constant 1 : index
    %c1_281 = arith.constant 1 : index
    %c0_282 = arith.constant 0 : index
    %c0_283 = arith.constant 0 : index
    %279 = vector.load %arg5[%c1_280, %c1_281, %c0_282, %c0_283] : memref<3x3x3x32xbf16, #tpu.memory_space<vmem>>, vector<1x1x3x32xbf16>
    %280 = vector.shape_cast %279 : vector<1x1x3x32xbf16> to vector<3x32xbf16>
    %cst_284 = arith.constant dense<0.000000e+00> : vector<32x32xf32>
    %281 = tpu.matmul %278, %280, %cst_284 {dimension_numbers = #tpu.dot_dimension_numbers<[1], [0], [0], [1], [0, 0, 1, 1], [], []>} : vector<32x3xbf16>, vector<3x32xbf16>, vector<32x32xf32> -> vector<32x32xf32>
    %282 = arith.addf %277, %281 : vector<32x32xf32>
    %283 = vector.extract_strided_slice %272 {offsets = [2, 0], sizes = [32, 3], strides = [1, 1]} : vector<34x3xbf16> to vector<32x3xbf16>
    %c1_285 = arith.constant 1 : index
    %c2_286 = arith.constant 2 : index
    %c0_287 = arith.constant 0 : index
    %c0_288 = arith.constant 0 : index
    %284 = vector.load %arg5[%c1_285, %c2_286, %c0_287, %c0_288] : memref<3x3x3x32xbf16, #tpu.memory_space<vmem>>, vector<1x1x3x32xbf16>
    %285 = vector.shape_cast %284 : vector<1x1x3x32xbf16> to vector<3x32xbf16>
    %cst_289 = arith.constant dense<0.000000e+00> : vector<32x32xf32>
    %286 = tpu.matmul %283, %285, %cst_289 {dimension_numbers = #tpu.dot_dimension_numbers<[1], [0], [0], [1], [0, 0, 1, 1], [], []>} : vector<32x3xbf16>, vector<3x32xbf16>, vector<32x32xf32> -> vector<32x32xf32>
    %287 = arith.addf %282, %286 : vector<32x32xf32>
    %c0_290 = arith.constant 0 : index
    %c6 = arith.constant 6 : index
    %c0_291 = arith.constant 0 : index
    %c0_292 = arith.constant 0 : index
    %288 = vector.load %arg3[%c0_290, %c6, %c0_291, %c0_292] : memref<1x8x34x3xbf16, #tpu.memory_space<vmem>>, vector<1x1x34x3xbf16>
    %289 = vector.shape_cast %288 : vector<1x1x34x3xbf16> to vector<34x3xbf16>
    %290 = vector.extract_strided_slice %289 {offsets = [0, 0], sizes = [32, 3], strides = [1, 1]} : vector<34x3xbf16> to vector<32x3xbf16>
    %c2_293 = arith.constant 2 : index
    %c0_294 = arith.constant 0 : index
    %c0_295 = arith.constant 0 : index
    %c0_296 = arith.constant 0 : index
    %291 = vector.load %arg5[%c2_293, %c0_294, %c0_295, %c0_296] : memref<3x3x3x32xbf16, #tpu.memory_space<vmem>>, vector<1x1x3x32xbf16>
    %292 = vector.shape_cast %291 : vector<1x1x3x32xbf16> to vector<3x32xbf16>
    %cst_297 = arith.constant dense<0.000000e+00> : vector<32x32xf32>
    %293 = tpu.matmul %290, %292, %cst_297 {dimension_numbers = #tpu.dot_dimension_numbers<[1], [0], [0], [1], [0, 0, 1, 1], [], []>} : vector<32x3xbf16>, vector<3x32xbf16>, vector<32x32xf32> -> vector<32x32xf32>
    %294 = arith.addf %287, %293 : vector<32x32xf32>
    %295 = vector.extract_strided_slice %289 {offsets = [1, 0], sizes = [32, 3], strides = [1, 1]} : vector<34x3xbf16> to vector<32x3xbf16>
    %c2_298 = arith.constant 2 : index
    %c1_299 = arith.constant 1 : index
    %c0_300 = arith.constant 0 : index
    %c0_301 = arith.constant 0 : index
    %296 = vector.load %arg5[%c2_298, %c1_299, %c0_300, %c0_301] : memref<3x3x3x32xbf16, #tpu.memory_space<vmem>>, vector<1x1x3x32xbf16>
    %297 = vector.shape_cast %296 : vector<1x1x3x32xbf16> to vector<3x32xbf16>
    %cst_302 = arith.constant dense<0.000000e+00> : vector<32x32xf32>
    %298 = tpu.matmul %295, %297, %cst_302 {dimension_numbers = #tpu.dot_dimension_numbers<[1], [0], [0], [1], [0, 0, 1, 1], [], []>} : vector<32x3xbf16>, vector<3x32xbf16>, vector<32x32xf32> -> vector<32x32xf32>
    %299 = arith.addf %294, %298 : vector<32x32xf32>
    %300 = vector.extract_strided_slice %289 {offsets = [2, 0], sizes = [32, 3], strides = [1, 1]} : vector<34x3xbf16> to vector<32x3xbf16>
    %c2_303 = arith.constant 2 : index
    %c2_304 = arith.constant 2 : index
    %c0_305 = arith.constant 0 : index
    %c0_306 = arith.constant 0 : index
    %301 = vector.load %arg5[%c2_303, %c2_304, %c0_305, %c0_306] : memref<3x3x3x32xbf16, #tpu.memory_space<vmem>>, vector<1x1x3x32xbf16>
    %302 = vector.shape_cast %301 : vector<1x1x3x32xbf16> to vector<3x32xbf16>
    %cst_307 = arith.constant dense<0.000000e+00> : vector<32x32xf32>
    %303 = tpu.matmul %300, %302, %cst_307 {dimension_numbers = #tpu.dot_dimension_numbers<[1], [0], [0], [1], [0, 0, 1, 1], [], []>} : vector<32x3xbf16>, vector<3x32xbf16>, vector<32x32xf32> -> vector<32x32xf32>
    %304 = arith.addf %299, %303 : vector<32x32xf32>
    %305 = vector.broadcast %0 : vector<1x32xf32> to vector<32x32xf32>
    %306 = arith.addf %304, %305 : vector<32x32xf32>
    %cst_308 = arith.constant 0.000000e+00 : f32
    %307 = vector.broadcast %cst_308 : f32 to vector<32x32xf32>
    %308 = arith.cmpf ogt, %306, %307 : vector<32x32xf32>
    %cst_309 = arith.constant 0.00999999977 : f32
    %309 = vector.broadcast %cst_309 : f32 to vector<32x32xf32>
    %310 = arith.mulf %309, %306 : vector<32x32xf32>
    %311 = arith.select %308, %306, %310 : vector<32x32xi1>, vector<32x32xf32>
    %312 = arith.truncf %311 : vector<32x32xf32> to vector<32x32xbf16>
    %c0_310 = arith.constant 0 : index
    %c4_311 = arith.constant 4 : index
    %c0_312 = arith.constant 0 : index
    %c0_313 = arith.constant 0 : index
    %313 = vector.load %arg7[%c0_310, %c4_311, %c0_312, %c0_313] : memref<1x8x32x32xbf16, #tpu.memory_space<vmem>>, vector<1x1x32x32xbf16>
    %314 = vector.shape_cast %313 : vector<1x1x32x32xbf16> to vector<32x32xbf16>
    %315 = vector.shape_cast %312 : vector<32x32xbf16> to vector<1x1x32x32xbf16>
    tpu.vector_store %arg7[%c0_310, %c4_311, %c0_312, %c0_313], %315 {strides = array<i32>} : memref<1x8x32x32xbf16, #tpu.memory_space<vmem>>, vector<1x1x32x32xbf16>,
    %cst_314 = arith.constant 0.000000e+00 : f32
    %316 = vector.broadcast %cst_314 : f32 to vector<32x32xf32>
    %c0_315 = arith.constant 0 : index
    %c5_316 = arith.constant 5 : index
    %c0_317 = arith.constant 0 : index
    %c0_318 = arith.constant 0 : index
    %317 = vector.load %arg3[%c0_315, %c5_316, %c0_317, %c0_318] : memref<1x8x34x3xbf16, #tpu.memory_space<vmem>>, vector<1x1x34x3xbf16>
    %318 = vector.shape_cast %317 : vector<1x1x34x3xbf16> to vector<34x3xbf16>
    %319 = vector.extract_strided_slice %318 {offsets = [0, 0], sizes = [32, 3], strides = [1, 1]} : vector<34x3xbf16> to vector<32x3xbf16>
    %c0_319 = arith.constant 0 : index
    %c0_320 = arith.constant 0 : index
    %c0_321 = arith.constant 0 : index
    %c0_322 = arith.constant 0 : index
    %320 = vector.load %arg5[%c0_319, %c0_320, %c0_321, %c0_322] : memref<3x3x3x32xbf16, #tpu.memory_space<vmem>>, vector<1x1x3x32xbf16>
    %321 = vector.shape_cast %320 : vector<1x1x3x32xbf16> to vector<3x32xbf16>
    %cst_323 = arith.constant dense<0.000000e+00> : vector<32x32xf32>
    %322 = tpu.matmul %319, %321, %cst_323 {dimension_numbers = #tpu.dot_dimension_numbers<[1], [0], [0], [1], [0, 0, 1, 1], [], []>} : vector<32x3xbf16>, vector<3x32xbf16>, vector<32x32xf32> -> vector<32x32xf32>
    %323 = arith.addf %316, %322 : vector<32x32xf32>
    %324 = vector.extract_strided_slice %318 {offsets = [1, 0], sizes = [32, 3], strides = [1, 1]} : vector<34x3xbf16> to vector<32x3xbf16>
    %c0_324 = arith.constant 0 : index
    %c1_325 = arith.constant 1 : index
    %c0_326 = arith.constant 0 : index
    %c0_327 = arith.constant 0 : index
    %325 = vector.load %arg5[%c0_324, %c1_325, %c0_326, %c0_327] : memref<3x3x3x32xbf16, #tpu.memory_space<vmem>>, vector<1x1x3x32xbf16>
    %326 = vector.shape_cast %325 : vector<1x1x3x32xbf16> to vector<3x32xbf16>
    %cst_328 = arith.constant dense<0.000000e+00> : vector<32x32xf32>
    %327 = tpu.matmul %324, %326, %cst_328 {dimension_numbers = #tpu.dot_dimension_numbers<[1], [0], [0], [1], [0, 0, 1, 1], [], []>} : vector<32x3xbf16>, vector<3x32xbf16>, vector<32x32xf32> -> vector<32x32xf32>
    %328 = arith.addf %323, %327 : vector<32x32xf32>
    %329 = vector.extract_strided_slice %318 {offsets = [2, 0], sizes = [32, 3], strides = [1, 1]} : vector<34x3xbf16> to vector<32x3xbf16>
    %c0_329 = arith.constant 0 : index
    %c2_330 = arith.constant 2 : index
    %c0_331 = arith.constant 0 : index
    %c0_332 = arith.constant 0 : index
    %330 = vector.load %arg5[%c0_329, %c2_330, %c0_331, %c0_332] : memref<3x3x3x32xbf16, #tpu.memory_space<vmem>>, vector<1x1x3x32xbf16>
    %331 = vector.shape_cast %330 : vector<1x1x3x32xbf16> to vector<3x32xbf16>
    %cst_333 = arith.constant dense<0.000000e+00> : vector<32x32xf32>
    %332 = tpu.matmul %329, %331, %cst_333 {dimension_numbers = #tpu.dot_dimension_numbers<[1], [0], [0], [1], [0, 0, 1, 1], [], []>} : vector<32x3xbf16>, vector<3x32xbf16>, vector<32x32xf32> -> vector<32x32xf32>
    %333 = arith.addf %328, %332 : vector<32x32xf32>
    %c0_334 = arith.constant 0 : index
    %c6_335 = arith.constant 6 : index
    %c0_336 = arith.constant 0 : index
    %c0_337 = arith.constant 0 : index
    %334 = vector.load %arg3[%c0_334, %c6_335, %c0_336, %c0_337] : memref<1x8x34x3xbf16, #tpu.memory_space<vmem>>, vector<1x1x34x3xbf16>
    %335 = vector.shape_cast %334 : vector<1x1x34x3xbf16> to vector<34x3xbf16>
    %336 = vector.extract_strided_slice %335 {offsets = [0, 0], sizes = [32, 3], strides = [1, 1]} : vector<34x3xbf16> to vector<32x3xbf16>
    %c1_338 = arith.constant 1 : index
    %c0_339 = arith.constant 0 : index
    %c0_340 = arith.constant 0 : index
    %c0_341 = arith.constant 0 : index
    %337 = vector.load %arg5[%c1_338, %c0_339, %c0_340, %c0_341] : memref<3x3x3x32xbf16, #tpu.memory_space<vmem>>, vector<1x1x3x32xbf16>
    %338 = vector.shape_cast %337 : vector<1x1x3x32xbf16> to vector<3x32xbf16>
    %cst_342 = arith.constant dense<0.000000e+00> : vector<32x32xf32>
    %339 = tpu.matmul %336, %338, %cst_342 {dimension_numbers = #tpu.dot_dimension_numbers<[1], [0], [0], [1], [0, 0, 1, 1], [], []>} : vector<32x3xbf16>, vector<3x32xbf16>, vector<32x32xf32> -> vector<32x32xf32>
    %340 = arith.addf %333, %339 : vector<32x32xf32>
    %341 = vector.extract_strided_slice %335 {offsets = [1, 0], sizes = [32, 3], strides = [1, 1]} : vector<34x3xbf16> to vector<32x3xbf16>
    %c1_343 = arith.constant 1 : index
    %c1_344 = arith.constant 1 : index
    %c0_345 = arith.constant 0 : index
    %c0_346 = arith.constant 0 : index
    %342 = vector.load %arg5[%c1_343, %c1_344, %c0_345, %c0_346] : memref<3x3x3x32xbf16, #tpu.memory_space<vmem>>, vector<1x1x3x32xbf16>
    %343 = vector.shape_cast %342 : vector<1x1x3x32xbf16> to vector<3x32xbf16>
    %cst_347 = arith.constant dense<0.000000e+00> : vector<32x32xf32>
    %344 = tpu.matmul %341, %343, %cst_347 {dimension_numbers = #tpu.dot_dimension_numbers<[1], [0], [0], [1], [0, 0, 1, 1], [], []>} : vector<32x3xbf16>, vector<3x32xbf16>, vector<32x32xf32> -> vector<32x32xf32>
    %345 = arith.addf %340, %344 : vector<32x32xf32>
    %346 = vector.extract_strided_slice %335 {offsets = [2, 0], sizes = [32, 3], strides = [1, 1]} : vector<34x3xbf16> to vector<32x3xbf16>
    %c1_348 = arith.constant 1 : index
    %c2_349 = arith.constant 2 : index
    %c0_350 = arith.constant 0 : index
    %c0_351 = arith.constant 0 : index
    %347 = vector.load %arg5[%c1_348, %c2_349, %c0_350, %c0_351] : memref<3x3x3x32xbf16, #tpu.memory_space<vmem>>, vector<1x1x3x32xbf16>
    %348 = vector.shape_cast %347 : vector<1x1x3x32xbf16> to vector<3x32xbf16>
    %cst_352 = arith.constant dense<0.000000e+00> : vector<32x32xf32>
    %349 = tpu.matmul %346, %348, %cst_352 {dimension_numbers = #tpu.dot_dimension_numbers<[1], [0], [0], [1], [0, 0, 1, 1], [], []>} : vector<32x3xbf16>, vector<3x32xbf16>, vector<32x32xf32> -> vector<32x32xf32>
    %350 = arith.addf %345, %349 : vector<32x32xf32>
    %c0_353 = arith.constant 0 : index
    %c7 = arith.constant 7 : index
    %c0_354 = arith.constant 0 : index
    %c0_355 = arith.constant 0 : index
    %351 = vector.load %arg3[%c0_353, %c7, %c0_354, %c0_355] : memref<1x8x34x3xbf16, #tpu.memory_space<vmem>>, vector<1x1x34x3xbf16>
    %352 = vector.shape_cast %351 : vector<1x1x34x3xbf16> to vector<34x3xbf16>
    %353 = vector.extract_strided_slice %352 {offsets = [0, 0], sizes = [32, 3], strides = [1, 1]} : vector<34x3xbf16> to vector<32x3xbf16>
    %c2_356 = arith.constant 2 : index
    %c0_357 = arith.constant 0 : index
    %c0_358 = arith.constant 0 : index
    %c0_359 = arith.constant 0 : index
    %354 = vector.load %arg5[%c2_356, %c0_357, %c0_358, %c0_359] : memref<3x3x3x32xbf16, #tpu.memory_space<vmem>>, vector<1x1x3x32xbf16>
    %355 = vector.shape_cast %354 : vector<1x1x3x32xbf16> to vector<3x32xbf16>
    %cst_360 = arith.constant dense<0.000000e+00> : vector<32x32xf32>
    %356 = tpu.matmul %353, %355, %cst_360 {dimension_numbers = #tpu.dot_dimension_numbers<[1], [0], [0], [1], [0, 0, 1, 1], [], []>} : vector<32x3xbf16>, vector<3x32xbf16>, vector<32x32xf32> -> vector<32x32xf32>
    %357 = arith.addf %350, %356 : vector<32x32xf32>
    %358 = vector.extract_strided_slice %352 {offsets = [1, 0], sizes = [32, 3], strides = [1, 1]} : vector<34x3xbf16> to vector<32x3xbf16>
    %c2_361 = arith.constant 2 : index
    %c1_362 = arith.constant 1 : index
    %c0_363 = arith.constant 0 : index
    %c0_364 = arith.constant 0 : index
    %359 = vector.load %arg5[%c2_361, %c1_362, %c0_363, %c0_364] : memref<3x3x3x32xbf16, #tpu.memory_space<vmem>>, vector<1x1x3x32xbf16>
    %360 = vector.shape_cast %359 : vector<1x1x3x32xbf16> to vector<3x32xbf16>
    %cst_365 = arith.constant dense<0.000000e+00> : vector<32x32xf32>
    %361 = tpu.matmul %358, %360, %cst_365 {dimension_numbers = #tpu.dot_dimension_numbers<[1], [0], [0], [1], [0, 0, 1, 1], [], []>} : vector<32x3xbf16>, vector<3x32xbf16>, vector<32x32xf32> -> vector<32x32xf32>
    %362 = arith.addf %357, %361 : vector<32x32xf32>
    %363 = vector.extract_strided_slice %352 {offsets = [2, 0], sizes = [32, 3], strides = [1, 1]} : vector<34x3xbf16> to vector<32x3xbf16>
    %c2_366 = arith.constant 2 : index
    %c2_367 = arith.constant 2 : index
    %c0_368 = arith.constant 0 : index
    %c0_369 = arith.constant 0 : index
    %364 = vector.load %arg5[%c2_366, %c2_367, %c0_368, %c0_369] : memref<3x3x3x32xbf16, #tpu.memory_space<vmem>>, vector<1x1x3x32xbf16>
    %365 = vector.shape_cast %364 : vector<1x1x3x32xbf16> to vector<3x32xbf16>
    %cst_370 = arith.constant dense<0.000000e+00> : vector<32x32xf32>
    %366 = tpu.matmul %363, %365, %cst_370 {dimension_numbers = #tpu.dot_dimension_numbers<[1], [0], [0], [1], [0, 0, 1, 1], [], []>} : vector<32x3xbf16>, vector<3x32xbf16>, vector<32x32xf32> -> vector<32x32xf32>
    %367 = arith.addf %362, %366 : vector<32x32xf32>
    %368 = vector.broadcast %0 : vector<1x32xf32> to vector<32x32xf32>
    %369 = arith.addf %367, %368 : vector<32x32xf32>
    %cst_371 = arith.constant 0.000000e+00 : f32
    %370 = vector.broadcast %cst_371 : f32 to vector<32x32xf32>
    %371 = arith.cmpf ogt, %369, %370 : vector<32x32xf32>
    %cst_372 = arith.constant 0.00999999977 : f32
    %372 = vector.broadcast %cst_372 : f32 to vector<32x32xf32>
    %373 = arith.mulf %372, %369 : vector<32x32xf32>
    %374 = arith.select %371, %369, %373 : vector<32x32xi1>, vector<32x32xf32>
    %375 = arith.truncf %374 : vector<32x32xf32> to vector<32x32xbf16>
    %c0_373 = arith.constant 0 : index
    %c5_374 = arith.constant 5 : index
    %c0_375 = arith.constant 0 : index
    %c0_376 = arith.constant 0 : index
    %376 = vector.load %arg7[%c0_373, %c5_374, %c0_375, %c0_376] : memref<1x8x32x32xbf16, #tpu.memory_space<vmem>>, vector<1x1x32x32xbf16>
    %377 = vector.shape_cast %376 : vector<1x1x32x32xbf16> to vector<32x32xbf16>
    %378 = vector.shape_cast %375 : vector<32x32xbf16> to vector<1x1x32x32xbf16>
    tpu.vector_store %arg7[%c0_373, %c5_374, %c0_375, %c0_376], %378 {strides = array<i32>} : memref<1x8x32x32xbf16, #tpu.memory_space<vmem>>, vector<1x1x32x32xbf16>,
    %cst_377 = arith.constant 0.000000e+00 : f32
    %379 = vector.broadcast %cst_377 : f32 to vector<32x32xf32>
    %c0_378 = arith.constant 0 : index
    %c6_379 = arith.constant 6 : index
    %c0_380 = arith.constant 0 : index
    %c0_381 = arith.constant 0 : index
    %380 = vector.load %arg3[%c0_378, %c6_379, %c0_380, %c0_381] : memref<1x8x34x3xbf16, #tpu.memory_space<vmem>>, vector<1x1x34x3xbf16>
    %381 = vector.shape_cast %380 : vector<1x1x34x3xbf16> to vector<34x3xbf16>
    %382 = vector.extract_strided_slice %381 {offsets = [0, 0], sizes = [32, 3], strides = [1, 1]} : vector<34x3xbf16> to vector<32x3xbf16>
    %c0_382 = arith.constant 0 : index
    %c0_383 = arith.constant 0 : index
    %c0_384 = arith.constant 0 : index
    %c0_385 = arith.constant 0 : index
    %383 = vector.load %arg5[%c0_382, %c0_383, %c0_384, %c0_385] : memref<3x3x3x32xbf16, #tpu.memory_space<vmem>>, vector<1x1x3x32xbf16>
    %384 = vector.shape_cast %383 : vector<1x1x3x32xbf16> to vector<3x32xbf16>
    %cst_386 = arith.constant dense<0.000000e+00> : vector<32x32xf32>
    %385 = tpu.matmul %382, %384, %cst_386 {dimension_numbers = #tpu.dot_dimension_numbers<[1], [0], [0], [1], [0, 0, 1, 1], [], []>} : vector<32x3xbf16>, vector<3x32xbf16>, vector<32x32xf32> -> vector<32x32xf32>
    %386 = arith.addf %379, %385 : vector<32x32xf32>
    %387 = vector.extract_strided_slice %381 {offsets = [1, 0], sizes = [32, 3], strides = [1, 1]} : vector<34x3xbf16> to vector<32x3xbf16>
    %c0_387 = arith.constant 0 : index
    %c1_388 = arith.constant 1 : index
    %c0_389 = arith.constant 0 : index
    %c0_390 = arith.constant 0 : index
    %388 = vector.load %arg5[%c0_387, %c1_388, %c0_389, %c0_390] : memref<3x3x3x32xbf16, #tpu.memory_space<vmem>>, vector<1x1x3x32xbf16>
    %389 = vector.shape_cast %388 : vector<1x1x3x32xbf16> to vector<3x32xbf16>
    %cst_391 = arith.constant dense<0.000000e+00> : vector<32x32xf32>
    %390 = tpu.matmul %387, %389, %cst_391 {dimension_numbers = #tpu.dot_dimension_numbers<[1], [0], [0], [1], [0, 0, 1, 1], [], []>} : vector<32x3xbf16>, vector<3x32xbf16>, vector<32x32xf32> -> vector<32x32xf32>
    %391 = arith.addf %386, %390 : vector<32x32xf32>
    %392 = vector.extract_strided_slice %381 {offsets = [2, 0], sizes = [32, 3], strides = [1, 1]} : vector<34x3xbf16> to vector<32x3xbf16>
    %c0_392 = arith.constant 0 : index
    %c2_393 = arith.constant 2 : index
    %c0_394 = arith.constant 0 : index
    %c0_395 = arith.constant 0 : index
    %393 = vector.load %arg5[%c0_392, %c2_393, %c0_394, %c0_395] : memref<3x3x3x32xbf16, #tpu.memory_space<vmem>>, vector<1x1x3x32xbf16>
    %394 = vector.shape_cast %393 : vector<1x1x3x32xbf16> to vector<3x32xbf16>
    %cst_396 = arith.constant dense<0.000000e+00> : vector<32x32xf32>
    %395 = tpu.matmul %392, %394, %cst_396 {dimension_numbers = #tpu.dot_dimension_numbers<[1], [0], [0], [1], [0, 0, 1, 1], [], []>} : vector<32x3xbf16>, vector<3x32xbf16>, vector<32x32xf32> -> vector<32x32xf32>
    %396 = arith.addf %391, %395 : vector<32x32xf32>
    %c0_397 = arith.constant 0 : index
    %c7_398 = arith.constant 7 : index
    %c0_399 = arith.constant 0 : index
    %c0_400 = arith.constant 0 : index
    %397 = vector.load %arg3[%c0_397, %c7_398, %c0_399, %c0_400] : memref<1x8x34x3xbf16, #tpu.memory_space<vmem>>, vector<1x1x34x3xbf16>
    %398 = vector.shape_cast %397 : vector<1x1x34x3xbf16> to vector<34x3xbf16>
    %399 = vector.extract_strided_slice %398 {offsets = [0, 0], sizes = [32, 3], strides = [1, 1]} : vector<34x3xbf16> to vector<32x3xbf16>
    %c1_401 = arith.constant 1 : index
    %c0_402 = arith.constant 0 : index
    %c0_403 = arith.constant 0 : index
    %c0_404 = arith.constant 0 : index
    %400 = vector.load %arg5[%c1_401, %c0_402, %c0_403, %c0_404] : memref<3x3x3x32xbf16, #tpu.memory_space<vmem>>, vector<1x1x3x32xbf16>
    %401 = vector.shape_cast %400 : vector<1x1x3x32xbf16> to vector<3x32xbf16>
    %cst_405 = arith.constant dense<0.000000e+00> : vector<32x32xf32>
    %402 = tpu.matmul %399, %401, %cst_405 {dimension_numbers = #tpu.dot_dimension_numbers<[1], [0], [0], [1], [0, 0, 1, 1], [], []>} : vector<32x3xbf16>, vector<3x32xbf16>, vector<32x32xf32> -> vector<32x32xf32>
    %403 = arith.addf %396, %402 : vector<32x32xf32>
    %404 = vector.extract_strided_slice %398 {offsets = [1, 0], sizes = [32, 3], strides = [1, 1]} : vector<34x3xbf16> to vector<32x3xbf16>
    %c1_406 = arith.constant 1 : index
    %c1_407 = arith.constant 1 : index
    %c0_408 = arith.constant 0 : index
    %c0_409 = arith.constant 0 : index
    %405 = vector.load %arg5[%c1_406, %c1_407, %c0_408, %c0_409] : memref<3x3x3x32xbf16, #tpu.memory_space<vmem>>, vector<1x1x3x32xbf16>
    %406 = vector.shape_cast %405 : vector<1x1x3x32xbf16> to vector<3x32xbf16>
    %cst_410 = arith.constant dense<0.000000e+00> : vector<32x32xf32>
    %407 = tpu.matmul %404, %406, %cst_410 {dimension_numbers = #tpu.dot_dimension_numbers<[1], [0], [0], [1], [0, 0, 1, 1], [], []>} : vector<32x3xbf16>, vector<3x32xbf16>, vector<32x32xf32> -> vector<32x32xf32>
    %408 = arith.addf %403, %407 : vector<32x32xf32>
    %409 = vector.extract_strided_slice %398 {offsets = [2, 0], sizes = [32, 3], strides = [1, 1]} : vector<34x3xbf16> to vector<32x3xbf16>
    %c1_411 = arith.constant 1 : index
    %c2_412 = arith.constant 2 : index
    %c0_413 = arith.constant 0 : index
    %c0_414 = arith.constant 0 : index
    %410 = vector.load %arg5[%c1_411, %c2_412, %c0_413, %c0_414] : memref<3x3x3x32xbf16, #tpu.memory_space<vmem>>, vector<1x1x3x32xbf16>
    %411 = vector.shape_cast %410 : vector<1x1x3x32xbf16> to vector<3x32xbf16>
    %cst_415 = arith.constant dense<0.000000e+00> : vector<32x32xf32>
    %412 = tpu.matmul %409, %411, %cst_415 {dimension_numbers = #tpu.dot_dimension_numbers<[1], [0], [0], [1], [0, 0, 1, 1], [], []>} : vector<32x3xbf16>, vector<3x32xbf16>, vector<32x32xf32> -> vector<32x32xf32>
    %413 = arith.addf %408, %412 : vector<32x32xf32>
    %c0_416 = arith.constant 0 : index
    %c0_417 = arith.constant 0 : index
    %c0_418 = arith.constant 0 : index
    %c0_419 = arith.constant 0 : index
    %414 = vector.load %arg4[%c0_416, %c0_417, %c0_418, %c0_419] : memref<1x8x34x3xbf16, #tpu.memory_space<vmem>>, vector<1x1x34x3xbf16>
    %415 = vector.shape_cast %414 : vector<1x1x34x3xbf16> to vector<34x3xbf16>
    %416 = vector.extract_strided_slice %415 {offsets = [0, 0], sizes = [32, 3], strides = [1, 1]} : vector<34x3xbf16> to vector<32x3xbf16>
    %c2_420 = arith.constant 2 : index
    %c0_421 = arith.constant 0 : index
    %c0_422 = arith.constant 0 : index
    %c0_423 = arith.constant 0 : index
    %417 = vector.load %arg5[%c2_420, %c0_421, %c0_422, %c0_423] : memref<3x3x3x32xbf16, #tpu.memory_space<vmem>>, vector<1x1x3x32xbf16>
    %418 = vector.shape_cast %417 : vector<1x1x3x32xbf16> to vector<3x32xbf16>
    %cst_424 = arith.constant dense<0.000000e+00> : vector<32x32xf32>
    %419 = tpu.matmul %416, %418, %cst_424 {dimension_numbers = #tpu.dot_dimension_numbers<[1], [0], [0], [1], [0, 0, 1, 1], [], []>} : vector<32x3xbf16>, vector<3x32xbf16>, vector<32x32xf32> -> vector<32x32xf32>
    %420 = arith.addf %413, %419 : vector<32x32xf32>
    %421 = vector.extract_strided_slice %415 {offsets = [1, 0], sizes = [32, 3], strides = [1, 1]} : vector<34x3xbf16> to vector<32x3xbf16>
    %c2_425 = arith.constant 2 : index
    %c1_426 = arith.constant 1 : index
    %c0_427 = arith.constant 0 : index
    %c0_428 = arith.constant 0 : index
    %422 = vector.load %arg5[%c2_425, %c1_426, %c0_427, %c0_428] : memref<3x3x3x32xbf16, #tpu.memory_space<vmem>>, vector<1x1x3x32xbf16>
    %423 = vector.shape_cast %422 : vector<1x1x3x32xbf16> to vector<3x32xbf16>
    %cst_429 = arith.constant dense<0.000000e+00> : vector<32x32xf32>
    %424 = tpu.matmul %421, %423, %cst_429 {dimension_numbers = #tpu.dot_dimension_numbers<[1], [0], [0], [1], [0, 0, 1, 1], [], []>} : vector<32x3xbf16>, vector<3x32xbf16>, vector<32x32xf32> -> vector<32x32xf32>
    %425 = arith.addf %420, %424 : vector<32x32xf32>
    %426 = vector.extract_strided_slice %415 {offsets = [2, 0], sizes = [32, 3], strides = [1, 1]} : vector<34x3xbf16> to vector<32x3xbf16>
    %c2_430 = arith.constant 2 : index
    %c2_431 = arith.constant 2 : index
    %c0_432 = arith.constant 0 : index
    %c0_433 = arith.constant 0 : index
    %427 = vector.load %arg5[%c2_430, %c2_431, %c0_432, %c0_433] : memref<3x3x3x32xbf16, #tpu.memory_space<vmem>>, vector<1x1x3x32xbf16>
    %428 = vector.shape_cast %427 : vector<1x1x3x32xbf16> to vector<3x32xbf16>
    %cst_434 = arith.constant dense<0.000000e+00> : vector<32x32xf32>
    %429 = tpu.matmul %426, %428, %cst_434 {dimension_numbers = #tpu.dot_dimension_numbers<[1], [0], [0], [1], [0, 0, 1, 1], [], []>} : vector<32x3xbf16>, vector<3x32xbf16>, vector<32x32xf32> -> vector<32x32xf32>
    %430 = arith.addf %425, %429 : vector<32x32xf32>
    %431 = vector.broadcast %0 : vector<1x32xf32> to vector<32x32xf32>
    %432 = arith.addf %430, %431 : vector<32x32xf32>
    %cst_435 = arith.constant 0.000000e+00 : f32
    %433 = vector.broadcast %cst_435 : f32 to vector<32x32xf32>
    %434 = arith.cmpf ogt, %432, %433 : vector<32x32xf32>
    %cst_436 = arith.constant 0.00999999977 : f32
    %435 = vector.broadcast %cst_436 : f32 to vector<32x32xf32>
    %436 = arith.mulf %435, %432 : vector<32x32xf32>
    %437 = arith.select %434, %432, %436 : vector<32x32xi1>, vector<32x32xf32>
    %438 = arith.truncf %437 : vector<32x32xf32> to vector<32x32xbf16>
    %c0_437 = arith.constant 0 : index
    %c6_438 = arith.constant 6 : index
    %c0_439 = arith.constant 0 : index
    %c0_440 = arith.constant 0 : index
    %439 = vector.load %arg7[%c0_437, %c6_438, %c0_439, %c0_440] : memref<1x8x32x32xbf16, #tpu.memory_space<vmem>>, vector<1x1x32x32xbf16>
    %440 = vector.shape_cast %439 : vector<1x1x32x32xbf16> to vector<32x32xbf16>
    %441 = vector.shape_cast %438 : vector<32x32xbf16> to vector<1x1x32x32xbf16>
    tpu.vector_store %arg7[%c0_437, %c6_438, %c0_439, %c0_440], %441 {strides = array<i32>} : memref<1x8x32x32xbf16, #tpu.memory_space<vmem>>, vector<1x1x32x32xbf16>,
    %cst_441 = arith.constant 0.000000e+00 : f32
    %442 = vector.broadcast %cst_441 : f32 to vector<32x32xf32>
    %c0_442 = arith.constant 0 : index
    %c7_443 = arith.constant 7 : index
    %c0_444 = arith.constant 0 : index
    %c0_445 = arith.constant 0 : index
    %443 = vector.load %arg3[%c0_442, %c7_443, %c0_444, %c0_445] : memref<1x8x34x3xbf16, #tpu.memory_space<vmem>>, vector<1x1x34x3xbf16>
    %444 = vector.shape_cast %443 : vector<1x1x34x3xbf16> to vector<34x3xbf16>
    %445 = vector.extract_strided_slice %444 {offsets = [0, 0], sizes = [32, 3], strides = [1, 1]} : vector<34x3xbf16> to vector<32x3xbf16>
    %c0_446 = arith.constant 0 : index
    %c0_447 = arith.constant 0 : index
    %c0_448 = arith.constant 0 : index
    %c0_449 = arith.constant 0 : index
    %446 = vector.load %arg5[%c0_446, %c0_447, %c0_448, %c0_449] : memref<3x3x3x32xbf16, #tpu.memory_space<vmem>>, vector<1x1x3x32xbf16>
    %447 = vector.shape_cast %446 : vector<1x1x3x32xbf16> to vector<3x32xbf16>
    %cst_450 = arith.constant dense<0.000000e+00> : vector<32x32xf32>
    %448 = tpu.matmul %445, %447, %cst_450 {dimension_numbers = #tpu.dot_dimension_numbers<[1], [0], [0], [1], [0, 0, 1, 1], [], []>} : vector<32x3xbf16>, vector<3x32xbf16>, vector<32x32xf32> -> vector<32x32xf32>
    %449 = arith.addf %442, %448 : vector<32x32xf32>
    %450 = vector.extract_strided_slice %444 {offsets = [1, 0], sizes = [32, 3], strides = [1, 1]} : vector<34x3xbf16> to vector<32x3xbf16>
    %c0_451 = arith.constant 0 : index
    %c1_452 = arith.constant 1 : index
    %c0_453 = arith.constant 0 : index
    %c0_454 = arith.constant 0 : index
    %451 = vector.load %arg5[%c0_451, %c1_452, %c0_453, %c0_454] : memref<3x3x3x32xbf16, #tpu.memory_space<vmem>>, vector<1x1x3x32xbf16>
    %452 = vector.shape_cast %451 : vector<1x1x3x32xbf16> to vector<3x32xbf16>
    %cst_455 = arith.constant dense<0.000000e+00> : vector<32x32xf32>
    %453 = tpu.matmul %450, %452, %cst_455 {dimension_numbers = #tpu.dot_dimension_numbers<[1], [0], [0], [1], [0, 0, 1, 1], [], []>} : vector<32x3xbf16>, vector<3x32xbf16>, vector<32x32xf32> -> vector<32x32xf32>
    %454 = arith.addf %449, %453 : vector<32x32xf32>
    %455 = vector.extract_strided_slice %444 {offsets = [2, 0], sizes = [32, 3], strides = [1, 1]} : vector<34x3xbf16> to vector<32x3xbf16>
    %c0_456 = arith.constant 0 : index
    %c2_457 = arith.constant 2 : index
    %c0_458 = arith.constant 0 : index
    %c0_459 = arith.constant 0 : index
    %456 = vector.load %arg5[%c0_456, %c2_457, %c0_458, %c0_459] : memref<3x3x3x32xbf16, #tpu.memory_space<vmem>>, vector<1x1x3x32xbf16>
    %457 = vector.shape_cast %456 : vector<1x1x3x32xbf16> to vector<3x32xbf16>
    %cst_460 = arith.constant dense<0.000000e+00> : vector<32x32xf32>
    %458 = tpu.matmul %455, %457, %cst_460 {dimension_numbers = #tpu.dot_dimension_numbers<[1], [0], [0], [1], [0, 0, 1, 1], [], []>} : vector<32x3xbf16>, vector<3x32xbf16>, vector<32x32xf32> -> vector<32x32xf32>
    %459 = arith.addf %454, %458 : vector<32x32xf32>
    %c0_461 = arith.constant 0 : index
    %c0_462 = arith.constant 0 : index
    %c0_463 = arith.constant 0 : index
    %c0_464 = arith.constant 0 : index
    %460 = vector.load %arg4[%c0_461, %c0_462, %c0_463, %c0_464] : memref<1x8x34x3xbf16, #tpu.memory_space<vmem>>, vector<1x1x34x3xbf16>
    %461 = vector.shape_cast %460 : vector<1x1x34x3xbf16> to vector<34x3xbf16>
    %462 = vector.extract_strided_slice %461 {offsets = [0, 0], sizes = [32, 3], strides = [1, 1]} : vector<34x3xbf16> to vector<32x3xbf16>
    %c1_465 = arith.constant 1 : index
    %c0_466 = arith.constant 0 : index
    %c0_467 = arith.constant 0 : index
    %c0_468 = arith.constant 0 : index
    %463 = vector.load %arg5[%c1_465, %c0_466, %c0_467, %c0_468] : memref<3x3x3x32xbf16, #tpu.memory_space<vmem>>, vector<1x1x3x32xbf16>
    %464 = vector.shape_cast %463 : vector<1x1x3x32xbf16> to vector<3x32xbf16>
    %cst_469 = arith.constant dense<0.000000e+00> : vector<32x32xf32>
    %465 = tpu.matmul %462, %464, %cst_469 {dimension_numbers = #tpu.dot_dimension_numbers<[1], [0], [0], [1], [0, 0, 1, 1], [], []>} : vector<32x3xbf16>, vector<3x32xbf16>, vector<32x32xf32> -> vector<32x32xf32>
    %466 = arith.addf %459, %465 : vector<32x32xf32>
    %467 = vector.extract_strided_slice %461 {offsets = [1, 0], sizes = [32, 3], strides = [1, 1]} : vector<34x3xbf16> to vector<32x3xbf16>
    %c1_470 = arith.constant 1 : index
    %c1_471 = arith.constant 1 : index
    %c0_472 = arith.constant 0 : index
    %c0_473 = arith.constant 0 : index
    %468 = vector.load %arg5[%c1_470, %c1_471, %c0_472, %c0_473] : memref<3x3x3x32xbf16, #tpu.memory_space<vmem>>, vector<1x1x3x32xbf16>
    %469 = vector.shape_cast %468 : vector<1x1x3x32xbf16> to vector<3x32xbf16>
    %cst_474 = arith.constant dense<0.000000e+00> : vector<32x32xf32>
    %470 = tpu.matmul %467, %469, %cst_474 {dimension_numbers = #tpu.dot_dimension_numbers<[1], [0], [0], [1], [0, 0, 1, 1], [], []>} : vector<32x3xbf16>, vector<3x32xbf16>, vector<32x32xf32> -> vector<32x32xf32>
    %471 = arith.addf %466, %470 : vector<32x32xf32>
    %472 = vector.extract_strided_slice %461 {offsets = [2, 0], sizes = [32, 3], strides = [1, 1]} : vector<34x3xbf16> to vector<32x3xbf16>
    %c1_475 = arith.constant 1 : index
    %c2_476 = arith.constant 2 : index
    %c0_477 = arith.constant 0 : index
    %c0_478 = arith.constant 0 : index
    %473 = vector.load %arg5[%c1_475, %c2_476, %c0_477, %c0_478] : memref<3x3x3x32xbf16, #tpu.memory_space<vmem>>, vector<1x1x3x32xbf16>
    %474 = vector.shape_cast %473 : vector<1x1x3x32xbf16> to vector<3x32xbf16>
    %cst_479 = arith.constant dense<0.000000e+00> : vector<32x32xf32>
    %475 = tpu.matmul %472, %474, %cst_479 {dimension_numbers = #tpu.dot_dimension_numbers<[1], [0], [0], [1], [0, 0, 1, 1], [], []>} : vector<32x3xbf16>, vector<3x32xbf16>, vector<32x32xf32> -> vector<32x32xf32>
    %476 = arith.addf %471, %475 : vector<32x32xf32>
    %c0_480 = arith.constant 0 : index
    %c1_481 = arith.constant 1 : index
    %c0_482 = arith.constant 0 : index
    %c0_483 = arith.constant 0 : index
    %477 = vector.load %arg4[%c0_480, %c1_481, %c0_482, %c0_483] : memref<1x8x34x3xbf16, #tpu.memory_space<vmem>>, vector<1x1x34x3xbf16>
    %478 = vector.shape_cast %477 : vector<1x1x34x3xbf16> to vector<34x3xbf16>
    %479 = vector.extract_strided_slice %478 {offsets = [0, 0], sizes = [32, 3], strides = [1, 1]} : vector<34x3xbf16> to vector<32x3xbf16>
    %c2_484 = arith.constant 2 : index
    %c0_485 = arith.constant 0 : index
    %c0_486 = arith.constant 0 : index
    %c0_487 = arith.constant 0 : index
    %480 = vector.load %arg5[%c2_484, %c0_485, %c0_486, %c0_487] : memref<3x3x3x32xbf16, #tpu.memory_space<vmem>>, vector<1x1x3x32xbf16>
    %481 = vector.shape_cast %480 : vector<1x1x3x32xbf16> to vector<3x32xbf16>
    %cst_488 = arith.constant dense<0.000000e+00> : vector<32x32xf32>
    %482 = tpu.matmul %479, %481, %cst_488 {dimension_numbers = #tpu.dot_dimension_numbers<[1], [0], [0], [1], [0, 0, 1, 1], [], []>} : vector<32x3xbf16>, vector<3x32xbf16>, vector<32x32xf32> -> vector<32x32xf32>
    %483 = arith.addf %476, %482 : vector<32x32xf32>
    %484 = vector.extract_strided_slice %478 {offsets = [1, 0], sizes = [32, 3], strides = [1, 1]} : vector<34x3xbf16> to vector<32x3xbf16>
    %c2_489 = arith.constant 2 : index
    %c1_490 = arith.constant 1 : index
    %c0_491 = arith.constant 0 : index
    %c0_492 = arith.constant 0 : index
    %485 = vector.load %arg5[%c2_489, %c1_490, %c0_491, %c0_492] : memref<3x3x3x32xbf16, #tpu.memory_space<vmem>>, vector<1x1x3x32xbf16>
    %486 = vector.shape_cast %485 : vector<1x1x3x32xbf16> to vector<3x32xbf16>
    %cst_493 = arith.constant dense<0.000000e+00> : vector<32x32xf32>
    %487 = tpu.matmul %484, %486, %cst_493 {dimension_numbers = #tpu.dot_dimension_numbers<[1], [0], [0], [1], [0, 0, 1, 1], [], []>} : vector<32x3xbf16>, vector<3x32xbf16>, vector<32x32xf32> -> vector<32x32xf32>
    %488 = arith.addf %483, %487 : vector<32x32xf32>
    %489 = vector.extract_strided_slice %478 {offsets = [2, 0], sizes = [32, 3], strides = [1, 1]} : vector<34x3xbf16> to vector<32x3xbf16>
    %c2_494 = arith.constant 2 : index
    %c2_495 = arith.constant 2 : index
    %c0_496 = arith.constant 0 : index
    %c0_497 = arith.constant 0 : index
    %490 = vector.load %arg5[%c2_494, %c2_495, %c0_496, %c0_497] : memref<3x3x3x32xbf16, #tpu.memory_space<vmem>>, vector<1x1x3x32xbf16>
    %491 = vector.shape_cast %490 : vector<1x1x3x32xbf16> to vector<3x32xbf16>
    %cst_498 = arith.constant dense<0.000000e+00> : vector<32x32xf32>
    %492 = tpu.matmul %489, %491, %cst_498 {dimension_numbers = #tpu.dot_dimension_numbers<[1], [0], [0], [1], [0, 0, 1, 1], [], []>} : vector<32x3xbf16>, vector<3x32xbf16>, vector<32x32xf32> -> vector<32x32xf32>
    %493 = arith.addf %488, %492 : vector<32x32xf32>
    %494 = vector.broadcast %0 : vector<1x32xf32> to vector<32x32xf32>
    %495 = arith.addf %493, %494 : vector<32x32xf32>
    %cst_499 = arith.constant 0.000000e+00 : f32
    %496 = vector.broadcast %cst_499 : f32 to vector<32x32xf32>
    %497 = arith.cmpf ogt, %495, %496 : vector<32x32xf32>
    %cst_500 = arith.constant 0.00999999977 : f32
    %498 = vector.broadcast %cst_500 : f32 to vector<32x32xf32>
    %499 = arith.mulf %498, %495 : vector<32x32xf32>
    %500 = arith.select %497, %495, %499 : vector<32x32xi1>, vector<32x32xf32>
    %501 = arith.truncf %500 : vector<32x32xf32> to vector<32x32xbf16>
    %c0_501 = arith.constant 0 : index
    %c7_502 = arith.constant 7 : index
    %c0_503 = arith.constant 0 : index
    %c0_504 = arith.constant 0 : index
    %502 = vector.load %arg7[%c0_501, %c7_502, %c0_503, %c0_504] : memref<1x8x32x32xbf16, #tpu.memory_space<vmem>>, vector<1x1x32x32xbf16>
    %503 = vector.shape_cast %502 : vector<1x1x32x32xbf16> to vector<32x32xbf16>
    %504 = vector.shape_cast %501 : vector<32x32xbf16> to vector<1x1x32x32xbf16>
    tpu.vector_store %arg7[%c0_501, %c7_502, %c0_503, %c0_504], %504 {strides = array<i32>} : memref<1x8x32x32xbf16, #tpu.memory_space<vmem>>, vector<1x1x32x32xbf16>,
    return
  }
  func.func @transform_0(%arg0: i32, %arg1: i32, %arg2: i32) -> (i32, i32, i32, i32) {
    %c0_i32 = arith.constant 0 : i32
    %0 = arith.addi %arg1, %c0_i32 : i32
    %c0_i32_0 = arith.constant 0 : i32
    %c0_i32_1 = arith.constant 0 : i32
    %c0_i32_2 = arith.constant 0 : i32
    return %arg0, %0, %c0_i32_0, %c0_i32_1 : i32, i32, i32, i32
  }
  func.func @transform_1(%arg0: i32, %arg1: i32, %arg2: i32) -> (i32, i32, i32, i32) {
    %c1_i32 = arith.constant 1 : i32
    %0 = arith.addi %arg1, %c1_i32 : i32
    %c0_i32 = arith.constant 0 : i32
    %c0_i32_0 = arith.constant 0 : i32
    %c0_i32_1 = arith.constant 0 : i32
    return %arg0, %0, %c0_i32, %c0_i32_0 : i32, i32, i32, i32
  }
  func.func @transform_2(%arg0: i32, %arg1: i32, %arg2: i32) -> (i32, i32, i32, i32) {
    %c0_i32 = arith.constant 0 : i32
    %c0_i32_0 = arith.constant 0 : i32
    %c0_i32_1 = arith.constant 0 : i32
    %c0_i32_2 = arith.constant 0 : i32
    return %c0_i32, %c0_i32_0, %c0_i32_1, %arg2 : i32, i32, i32, i32
  }
  func.func @transform_3(%arg0: i32, %arg1: i32, %arg2: i32) -> (i32, i32) {
    %c0_i32 = arith.constant 0 : i32
    %c0_i32_0 = arith.constant 0 : i32
    return %c0_i32, %arg2 : i32, i32
  }
  func.func @transform_4(%arg0: i32, %arg1: i32, %arg2: i32) -> (i32, i32, i32, i32) {
    %c0_i32 = arith.constant 0 : i32
    %c0_i32_0 = arith.constant 0 : i32
    return %arg0, %arg1, %c0_i32, %arg2 : i32, i32, i32, i32
  }
}

</mosaic_0001>

<bundles_post_ra>
// kernel: tpu_custom_call.1
= control target key start
LH: loop header
LB: loop body
LE: loop exit
PB: predicated region body
PF: predicated region fallthrough
CT: control target
= control target key end

     0   :  { %9 = vsyncpa [#allocation3], 0  ;;  %s8997_s0 = inlined_call_operand.vmem [shape: bf16[2,40,34,3], index: 0, kind: input, shape index: {}]   ;;  %s8998_s1 = inlined_call_operand.vmem [shape: bf16[2,40,34,3], index: 1, kind: input, shape index: {}]   ;;  %s8999_s2 = inlined_call_operand.vmem [shape: bf16[3,3,3,32], index: 2, kind: input, shape index: {}]   ;;  %s9000_s3 = inlined_call_operand.vmem [shape: f32[1,32], index: 3, kind: input, shape index: {}]   ;;  %s9001_s4 = inlined_call_operand.hbm [shape: bf16[2,32,32,32], index: 4, kind: output, shape index: {}]  }
   0x1   :  { %11 = vsyncpa [#allocation3 + $0x1], 0  ;;  %s7675_s15 = smov 0   ;;  %s7677_s16 = smov 0  }
   0x2   :  { %s7679_s17 = smov 0   ;;  %s7681_s18 = smov 0  }
   0x3   :  { %s7683_s19 = smov 0   ;;  %s7685_s20 = smov 0  }
   0x4   :  { %s7687_s21 = smov 0   ;;  %s7689_s22 = smov 0  }
   0x5 LB: > { %s6254_s23 = sadd.s32 4294967295, %s7644_s22   ;;  %s6255_s24 = sadd.s32 4294967294, %s7644_s22   ;;  %s7644_s22 = sphi %s7689_s22, %s17_s22   ;;  %s7640_s21 = sphi %s7687_s21, %s9010_s21   ;;  %s7636_s20 = sphi %s7685_s20, %s9009_s20   ;;  %s7632_s19 = sphi %s7683_s19, %s9008_s19   ;;  %s7628_s18 = sphi %s7681_s18, %s9007_s18   ;;  %s7624_s17 = sphi %s7679_s17, %s9006_s17   ;;  %s7620_s16 = sphi %s7677_s16, %s9005_s16   ;;  %s7616_s15 = sphi %s7675_s15, %s9004_s15  }
   0x6   : > { %s32_s25 = sadd.s32 1, %s7636_s20  ;;  %s36_s26 = sadd.s32 1, %s7640_s21 }
   0x7   : > { %p34_p0 = scmp.ge.s32.totalorder %s32_s25, 4  ;;  %p167_p1 = scmp.ne.s32.totalorder %s7624_s17, %s7620_s16 }
   0x8   : > { %p168_p2 = scmp.eq.s32.totalorder %s6254_s23, 7  ;;  %p173_p5 = scmp.ne.s32.totalorder %s7620_s16, %s7616_s15 }
   0x9   : > { %s9012_s25 = smov (%p34_p0, %s32_s25), 0  ;;  %s9014_s26 = smov (!%p34_p0, %s36_s26), %s7640_s21 }
   0xa   : > { %s151_s27 = ssub.s32 %s7636_s20, %s9012_s25  ;;  %p7726_p3 = por %p168_p2, %p167_p1 }
   0xb   : > { %p38_p4 = scmp.ge.s32.totalorder %s9014_s26, 2  ;;  %p174_p6 = scmp.eq.s32.totalorder %s6255_s24, 7 }
   0xc   : > { %p6260_p7 = scmp.ge.s32.totalorder %s7644_s22, 1  ;;  %p235_p9 = scmp.lt.s32.totalorder %s7644_s22, 9 }
   0xd   : > { %s9016_s26 = smov (%p38_p4, %s9014_s26), 0  ;;  %p7735_p8 = por %p174_p6, %p173_p5 }
   0xe   : > { %s150_s30 = ssub.s32 %s7640_s21, %s9016_s26  ;;  %s157_s5 = sadd.s32 1, %s7624_s17 }
   0xf   : > { %s152_s6 = sor.u32 %s151_s27, %s150_s30  ;;  %p236_p10 = pnand %p6260_p7, %p235_p9 }
  0x10   : > { %p155_p11 = scmp.eq.s32.totalorder %s152_s6, 0  ;;  %s7750_s10 = sshll.u32 (!%p236_p10), %s7628_s18, 3 }
  0x11   : > { %239 = sbr.rel (%p236_p10) target bundleno = 544 (0x220), region = 36  ;;  %p285_p12 = scmp.lt.s32.totalorder (!%p236_p10), %s7632_s19, 1 }
  0x12   : > { %s7744_s7 = scalar_select %p155_p11, %s7624_s17, %s157_s5  }
  0x13   : > { %p287_p13 = scmp.lt.s32.totalorder (!%p236_p10), %s7750_s10, 39 }
  0x16   : > { %v323_v0 = vld [vmem:[%s8999_s2] sm:$0x3]  ;;  %vm367_vm0 = vcmask 1040384   ;;  %vm368_vm1 = vcmask 1041408   ;;  %v7646_v1 = vmov 65535   ;;  %s7765_s23 = scalar_select %p285_p12, %s7632_s19, 1 }
  0x17   : > { %v369_v2 = vsel %vm367_vm0, 4294967295, %v7646_v1  ;;  %v6266_v3 = vld [vmem:[%s8999_s2 + $0x2] sm:$0x3]  ;;  %v6274_v5 = vld [vmem:[%s8999_s2 + $0x4] sm:$0x3]  ;;  %s288_s30 = scalar_select %p287_p13, %s7750_s10, 39 }
  0x18   : > { %v7757_v4 = vsel %vm368_vm1, %v369_v2, 0  ;;  %v6282_v9 = vld [vmem:[%s8999_s2 + $0x6] sm:$0x3]  ;;  %s7403_s5 = smul.u32 200, %s7765_s23  ;;  %v6291_v11 = vld [vmem:[%s8999_s2 + $0xa] sm:$0x3] }
  0x19   : > { %v428_v6 = vand.u32 %v7757_v4, %v323_v0  ;;  %v372_v7 = vand.u32 %v6266_v3, %v7757_v4  ;;  %v7768_v8 = vand.u32 %v6274_v5, %v7757_v4  ;;  %v574_v10 = vand.u32 %v6282_v9, %v7757_v4  ;;  %s7402_s6 = smul.u32 5, %s288_s30  ;;  %v6287_v21 = vld [vmem:[%s8999_s2 + $0x8] sm:$0x3]  ;;  %v6304_v22 = vld [vmem:[%s8999_s2 + $0xe] sm:$0x3]  ;;  %s281_s23 = sand.u32 1, %s7620_s16  }
  0x1a   : > { %vm360_vm2 = vcmask 23552   ;;  %vm339_vm3 = vsmask.f32 7424  ;;  %v728_v14 = vand.u32 %v6291_v11, %v7757_v4  ;;  %vm481_vm4 = vcmask 1046528   ;;  %v6299_v51 = vld [vmem:[%s8999_s2 + $0xc] sm:$0x3] }
  0x1b   : > { %6976 = vmatprep.subr.bf16.mxu1 %v428_v6  ;;  %6970 = vmatprep.subr.bf16.mxu0 %v372_v7  ;;  %s291_s8 = sadd.s32 %s7403_s5, %s7402_s6  ;;  %v659_v38 = vand.u32 %v6287_v21, %v7757_v4  ;;  %v893_v40 = vand.u32 %v6304_v22, %v7757_v4  ;;  %v6321_v58 = vld [vmem:[%s8999_s2 + $0x2] sm:$0x3]  ;;  %v808_v3 = vand.u32 %v6299_v51, %v7757_v4  ;;  %v6329_v22 = vld [vmem:[%s8999_s2 + $0x4] sm:$0x3]  ;;  %vm1055_vm5 = vcmask 257024   ;;  %s8640_s11 = sshll.u32 %s281_s23, 7 }
  0x1c   : > { %6977 = vmatpush3.bf16.msra.mxu1 %v428_v6  ;;  %6971 = vmatpush3.bf16.msra.mxu0 %v372_v7  ;;  %s6263_s9 = sshll.u32 %s291_s8, 2  ;;  %s6720_s8 = sadd.s32 8, %s7750_s10 }
  0x1d   : > { %6982 = vmatprep.subr.bf16.mxu0 %v7768_v8  ;;  %6988 = vmatprep.subr.bf16.mxu1 %v574_v10  ;;  %s7785_s24 = scalar_lea.vmem %s8997_s0, %s6263_s9  ;;  %p299_p0 = scmp.lt.s32.totalorder %s6720_s8, 39 }
  0x1e   : > { %v7479_v12 = vld [vmem:[%s7785_s24] sm:$0xff]   ;;  %v7789_v13 = vld [vmem:[%s7785_s24 + $0x8] sm:$0xff]   ;;  %v7481_v19 = vld [vmem:[%s7785_s24 + $0x10] ss:$0 sps:$4 sm:$0x11]   ;;  %s8673_s12 = scalar_lea.vmem [#allocation2], %s8640_s11 }
  0x1f   : > { %6978 = vmatprep.mubr.msk.bf16.mxu1 %vm360_vm2, %v7479_v12  ;;  %v341_v15 = vshrl.u32 %v7479_v12, 16  ;;  %v343_v16 = vshll.u32 %v7479_v12, 16  ;;  %v348_v17 = vshll.u32 %v7789_v13, 16  ;;  %v352_v18 = vshrl.u32 %v7789_v13, 16  ;;  %v7482_v20 = vld [vmem:[%s7785_s24 + $0x14] sm:$0xff]   ;;  %v7806_v24 = vld [vmem:[%s7785_s24 + $0x1c] sm:$0xff]  }
  0x20   : > { %6979 = vmatmul.mubr.msk.bf16.vlgmr.msra.gmra.mxu1 %vm360_vm2, %v7789_v13  ;;  %v356_v26 = vshll.u32 %v7481_v19, 16  ;;  %v482_v27 = vrot.slane %v7479_v12, 1  ;;  %v483_v28 = vrot.slane %v7789_v13, 1  ;;  %v716_v30 = vrot.slane %v7482_v20, 1  ;;  %v7812_v32 = vld [vmem:[%s7785_s24 + $0x28] sm:$0xff]   ;;  %v7816_v36 = vld [vmem:[%s7785_s24 + $0x30] sm:$0xff]  }
  0x21   : > { %v345_v23 = vrot.slane %v343_v16, 1  ;;  %6989 = vmatpush3.bf16.msra.mxu1 %v574_v10  ;;  %v350_v25 = vrot.slane %v348_v17, 1  ;;  %6990 = vmatprep.mubr.msk.bf16.mxu1 %vm360_vm2, %v7482_v20  ;;  %v717_v31 = vrot.slane %v7806_v24, 1  ;;  %v7484_v35 = vld [vmem:[%s7785_s24 + $0x24] ss:$0 sps:$4 sm:$0x11]   ;;  %v1107_v10 = vand.u32 %v6321_v58, %v7757_v4 }
  0x22   : > { %7000 = vmatprep.subr.bf16.mxu1 %v728_v14  ;;  %v358_v34 = vrot.slane %v356_v26, 1  ;;  %v636_v39 = vshll.u32 %v7482_v20, 16  ;;  %v484_v42 = vsel %vm481_vm4, %v482_v27, %v483_v28  ;;  %v634_v43 = vshrl.u32 %v7482_v20, 16  ;;  %v7830_v49 = vld [vmem:[%s7785_s24 + $0x14] sm:$0xff]   ;;  %v7848_v59 = vld [vmem:[%s7785_s24 + $0x1c] sm:$0xff]   ;;  %s9018_s8 = smov (!%p299_p0, %s6720_s8), 39 }
  0x23   : > { %v346_v29 = vor.u32 %v345_v23, %v341_v15  ;;  %v354_v33 = vor.u32 %v352_v18, %v350_v25  ;;  %v640_v44 = vshll.u32 %v7806_v24, 16  ;;  %v718_v45 = vsel %vm481_vm4, %v716_v30, %v717_v31  ;;  %v7841_v55 = vld [vmem:[%s7785_s24 + $0x38] ss:$0 sps:$4 sm:$0x11]   ;;  %v6308_v18 = vld [vmem:[%s8999_s2 + $0x10] sm:$0x3] }
  0x24   : > { %v638_v46 = vrot.slane %v636_v39, 1  ;;  %v868_v47 = vshrl.u32 %v7812_v32, 16  ;;  %v870_v48 = vshll.u32 %v7812_v32, 16  ;;  %v485_v50 = vrot.slane %v7481_v19, 1  ;;  %v7897_v39 = vld [vmem:[%s7785_s24 + $0x30] sm:$0xff]   ;;  %s7404_s13 = smul.u32 5, %s9018_s8 }
  0x25   : > { %v351_v37 = vsel %vm339_vm3, %v346_v29, %v350_v25  ;;  %v359_v41 = vsel %vm339_vm3, %v354_v33, %v358_v34  ;;  %v874_v52 = vshll.u32 %v7816_v36, 16  ;;  %v719_v53 = vrot.slane %v7484_v35, 1  ;;  %v7490_v17 = vld [vmem:[%s7785_s24 + $0x24] ss:$0 sps:$4 sm:$0x11]   ;;  %v7881_v29 = vld [vmem:[%s7785_s24 + $0x28] sm:$0xff]  }
  0x26   : > { %6972 = vmatprep.mubr.msk.bf16.mxu0 %vm360_vm2, %v351_v37  ;;  %v872_v54 = vrot.slane %v870_v48, 1  ;;  %v639_v56 = vor.u32 %v638_v46, %v634_v43  ;;  %v642_v57 = vrot.slane %v640_v44, 1  ;;  %v1083_v62 = vshll.u32 %v7830_v49, 16  ;;  %v1065_v33 = vld [vmem:[%s8999_s2] sm:$0x3]  ;;  %s303_s14 = sadd.s32 %s7404_s13, %s7403_s5  ;;  %s6753_s5 = sshll.u32 %s7628_s18, 5 }
  0x27   : > { %6973 = vmatmul.mubr.msk.bf16.vlgmr.msra.gmra.mxu0 %vm360_vm2, %v359_v41  ;;  %v876_v61 = vrot.slane %v874_v52, 1  ;;  %v486_v63 = vsel %vm481_vm4, %v483_v28, %v485_v50  ;;  %v644_v0 = vshrl.u32 %v7806_v24, 16  ;;  %v648_v1 = vshll.u32 %v7484_v35, 16  ;;  %v6342_v34 = vld [vmem:[%s8999_s2 + $0x8] sm:$0x3]  ;;  %s6265_s27 = sshll.u32 %s303_s14, 2 }
  0x28   : > { %6983 = vmatpush3.bf16.msra.mxu0 %v7768_v8  ;;  %6991 = vmatmul.mubr.msk.bf16.vlgmr.msra.gmra.mxu1 %vm360_vm2, %v7806_v24  ;;  %v873_v60 = vor.u32 %v872_v54, %v868_v47  ;;  %v720_v2 = vsel %vm481_vm4, %v717_v31, %v719_v53  ;;  %v878_v5 = vshrl.u32 %v7816_v36, 16  ;;  %v882_v6 = vshll.u32 %v7841_v55, 16  ;;  %v7913_v51 = vld [vmem:[%s7785_s24 + $0x38] ss:$0 sps:$4 sm:$0x11]   ;;  %s8142_s8 = scalar_lea.vmem %s8998_s1, %s6265_s27  ;;  %s6715_s9 = sshll.u32 %s7632_s19, 7 }
  0x29   : > { %6984 = vmatprep.mubr.msk.bf16.mxu0 %vm360_vm2, %v484_v42  ;;  %6994 = vmatprep.subr.bf16.mxu0 %v659_v38  ;;  %v643_v7 = vsel %vm339_vm3, %v639_v56, %v642_v57  ;;  %v1081_v8 = vshrl.u32 %v7830_v49, 16  ;;  %v1085_v11 = vrot.slane %v1083_v62, 1  ;;  %v1088_v12 = vshll.u32 %v7848_v59, 16  ;;  %s6114_s11 = sadd.s32 %s6753_s5, %s6715_s9  ;;  %s6117_s19 = sshll.u32 %s8673_s12, 4  ;;  %s8940_s19 = int_to_ptr.vmem [resolvable:$true] %s6117_s19 }
  0x2a   : > { %7001 = vmatpush3.bf16.msra.mxu1 %v728_v14  ;;  %7002 = vmatprep.mubr.msk.bf16.mxu1 %vm360_vm2, %v718_v45  ;;  %v877_v9 = vsel %vm339_vm3, %v873_v60, %v876_v61  ;;  %v646_v13 = vor.u32 %v644_v0, %v642_v57  ;;  %v650_v14 = vrot.slane %v648_v1, 1  ;;  %v880_v15 = vor.u32 %v878_v5, %v876_v61  ;;  %s6716_s18 = sshll.u32 %s6114_s11, 6  ;;  %s8946_s14 = scalar_lea.sflag [#allocation3], %s281_s23 }
  0x2b   : > { %7012 = vmatprep.subr.bf16.mxu1 %v893_v40  ;;  %v884_v16 = vrot.slane %v882_v6, 1  ;;  %v1086_v19 = vor.u32 %v1085_v11, %v1081_v8  ;;  %v1090_v20 = vrot.slane %v1088_v12, 1  ;;  %v962_v24 = vand.u32 %v6308_v18, %v7757_v4  ;;  %v7494_v6 = vld [vmem:[%s7785_s24 + $0x3c] sm:$0xff]   ;;  %v6359_v8 = vld [vmem:[%s8999_s2 + $0xe] sm:$0x3]  ;;  %s8938_s13 = scalar_lea.hbm %s9001_s4, %s6716_s18  ;;  %s7552_s27 = scalar_lea.vmem %s8940_s19, 2048 }
  0x2c   : > { %v651_v21 = vsel %vm339_vm3, %v646_v13, %v650_v14  ;;  %v1092_v25 = vshrl.u32 %v7848_v59, 16  ;;  %v1096_v26 = vshll.u32 %v7490_v17, 16  ;;  %v1227_v28 = vand.u32 %v6329_v22, %v7757_v4  ;;  %v1785_v14 = vld [vmem:[%s8999_s2] sm:$0x3]  ;;  %p7553_p1 = scmp.ne.s32.totalorder %s8940_s19, %s7552_s27  ;;  %s7647_s30 = smov [#allocation2]  }
  0x2d   : > { %v885_v23 = vsel %vm339_vm3, %v880_v15, %v884_v16  ;;  %v1091_v27 = vsel %vm339_vm3, %v1086_v19, %v1090_v20  ;;  %v950_v35 = vrot.slane %v7812_v32, 1  ;;  %v951_v37 = vrot.slane %v7816_v36, 1  ;;  %v7496_v16 = vld [vmem:[%s7785_s24 + $0x4c] ss:$0 sps:$4 sm:$0x11]  }
  0x2e   : > { %v1094_v30 = vor.u32 %v1092_v25, %v1090_v20  ;;  %v1098_v31 = vrot.slane %v1096_v26, 1  ;;  %v1366_v41 = vshll.u32 %v7881_v29, 16  ;;  %v1163_v43 = vand.u32 %v1065_v33, %v7757_v4  ;;  %v6379_v26 = vld [vmem:[%s8999_s2 + $0x2] sm:$0x3]  ;;  %p7554_p2 = pnand %p7553_p1, %p7726_p3 }
  0x2f   : > { %6985 = vmatmul.mubr.msk.bf16.vlgmr.msra.gmra.mxu0 %vm360_vm2, %v486_v63  ;;  %v952_v44 = vsel %vm481_vm4, %v950_v35, %v951_v37  ;;  %v1364_v46 = vshrl.u32 %v7881_v29, 16  ;;  %v1370_v48 = vshll.u32 %v7897_v39, 16  ;;  %v953_v50 = vrot.slane %v7841_v55, 1  ;;  %v6354_v55 = vld [vmem:[%s8999_s2 + $0xc] sm:$0x3] }
  0x30   : > { %6995 = vmatpush3.bf16.msra.mxu0 %v659_v38  ;;  %7003 = vmatmul.mubr.msk.bf16.vlgmr.msra.gmra.mxu1 %vm360_vm2, %v720_v2  ;;  %v1215_v38 = vrot.slane %v7830_v49, 1  ;;  %v1099_v42 = vsel %vm339_vm3, %v1094_v30, %v1098_v31  ;;  %v1368_v47 = vrot.slane %v1366_v41, 1  ;;  %v1218_v52 = vrot.slane %v7490_v17, 1  ;;  %v6346_v2 = vld [vmem:[%s8999_s2 + $0xa] sm:$0x3]  ;;  %p7555_p4 = pneg %p7554_p2 }
  0x31   : > { %6996 = vmatprep.mubr.msk.bf16.mxu0 %vm360_vm2, %v643_v7  ;;  %7006 = vmatprep.subr.bf16.mxu0 %v808_v3  ;;  %v1372_v54 = vrot.slane %v1370_v48, 1  ;;  %v954_v56 = vsel %vm481_vm4, %v951_v37, %v953_v50  ;;  %v1374_v60 = vshrl.u32 %v7897_v39, 16  ;;  %v1378_v61 = vshll.u32 %v7913_v51, 16  ;;  %v6395_v31 = vld [vmem:[%s8999_s2 + $0x6] sm:$0x3] }
  0x32   : > { %7013 = vmatpush3.bf16.msra.mxu1 %v893_v40  ;;  %7014 = vmatprep.mubr.msk.bf16.mxu1 %vm360_vm2, %v877_v9  ;;  %v1216_v40 = vrot.slane %v7848_v59, 1  ;;  %v1369_v53 = vor.u32 %v1368_v47, %v1364_v46  ;;  %v1536_v63 = vand.u32 %v6354_v55, %v7757_v4  ;;  %v7495_v9 = vld [vmem:[%s7785_s24 + $0x44] sm:$0xff]   ;;  %v1597_v11 = vshll.u32 %v7494_v6, 16 }
  0x33   : > { %7024 = vmatprep.subr.bf16.mxu1 %v1107_v10  ;;  %v1376_v0 = vor.u32 %v1374_v60, %v1372_v54  ;;  %v1380_v1 = vrot.slane %v1378_v61, 1  ;;  %v1676_v12 = vrot.slane %v7494_v6, 1  ;;  %v1677_v13 = vrot.slane %v7495_v9, 1  ;;  %v6387_v48 = vld [vmem:[%s8999_s2 + $0x4] sm:$0x3] }
  0x34   : > { %v1217_v45 = vsel %vm481_vm4, %v1215_v38, %v1216_v40  ;;  %v1219_v57 = vsel %vm481_vm4, %v1216_v40, %v1218_v52  ;;  %v1373_v62 = vsel %vm339_vm3, %v1369_v53, %v1372_v54  ;;  %v1620_v15 = vand.u32 %v6359_v8, %v7757_v4  ;;  %v8019_v61 = vld [vmem:[%s7785_s24 + $0x44] sm:$0xff]  }
  0x35   : > { %v1381_v5 = vsel %vm339_vm3, %v1376_v0, %v1380_v1  ;;  %v1595_v18 = vshrl.u32 %v7494_v6, 16  ;;  %v1599_v19 = vrot.slane %v1597_v11, 1  ;;  %v1601_v20 = vshll.u32 %v7495_v9, 16  ;;  %v6400_v0 = vld [vmem:[%s8999_s2 + $0x8] sm:$0x3] }
  0x36   : > { %v1678_v22 = vsel %vm481_vm4, %v1676_v12, %v1677_v13  ;;  %v1679_v25 = vrot.slane %v7496_v16, 1  ;;  %v1609_v35 = vshll.u32 %v7496_v16, 16  ;;  %v1827_v38 = vand.u32 %v6379_v26, %v7757_v4 }
  0x37   : > { %6997 = vmatmul.mubr.msk.bf16.vlgmr.msra.gmra.mxu0 %vm360_vm2, %v651_v21  ;;  %v7964_v21 = vld [vmem:[%s7785_s24 + $0x28] sm:$0xff]   ;;  %v1947_v53 = vand.u32 %v6387_v48, %v7757_v4 }
  0x38   : > { %7007 = vmatpush3.bf16.msra.mxu0 %v808_v3  ;;  %7015 = vmatmul.mubr.msk.bf16.vlgmr.msra.gmra.mxu1 %vm360_vm2, %v885_v23  ;;  %v6363_v3 = vld [vmem:[%s8999_s2 + $0x10] sm:$0x3]  ;;  %v1883_v23 = vand.u32 %v1785_v14, %v7757_v4  ;;  %v1803_v30 = vshll.u32 %v7964_v21, 16  ;;  %v1680_v37 = vsel %vm481_vm4, %v1677_v13, %v1679_v25  ;;  %v1801_v40 = vshrl.u32 %v7964_v21, 16 }
  0x39   : > { %7008 = vmatprep.mubr.msk.bf16.mxu0 %vm360_vm2, %v7812_v32  ;;  %7018 = vmatprep.subr.bf16.mxu0 %v962_v24  ;;  %v1389_v32 = vand.u32 %v6342_v34, %v7757_v4  ;;  %v1688_v7 = vand.u32 %v6363_v3, %v7757_v4  ;;  %v1605_v34 = vshrl.u32 %v7495_v9, 16  ;;  %v2090_v13 = vshll.u32 %v8019_v61, 16 }
  0x3a   : > { %7025 = vmatpush3.bf16.msra.mxu1 %v1107_v10  ;;  %7026 = vmatprep.mubr.msk.bf16.mxu1 %vm360_vm2, %v1091_v27  ;;  %v1446_v10 = vrot.slane %v7897_v39, 1  ;;  %v1600_v27 = vor.u32 %v1599_v19, %v1595_v18  ;;  %v1805_v41 = vrot.slane %v1803_v30, 1  ;;  %v8047_v18 = vld [vmem:[%s7785_s24 + $0x3c] sm:$0xff]   ;;  %v2094_v30 = vshrl.u32 %v8019_v61, 16 }
  0x3b   : > { %7036 = vmatprep.subr.bf16.mxu1 %v1227_v28 }
  0x3c   : > { %v1806_v46 = vor.u32 %v1805_v41, %v1801_v40  ;;  %v2521_v40 = vshrl.u32 %v8047_v18, 16 }
  0x3f   : > { %7009 = vmatmul.mubr.msk.bf16.vlgmr.msra.gmra.mxu0 %vm360_vm2, %v7816_v36  ;;  %v6337_v36 = vld [vmem:[%s8999_s2 + $0x6] sm:$0x3] }
  0x40   : > { %7019 = vmatpush3.bf16.msra.mxu0 %v962_v24  ;;  %7027 = vmatmul.mubr.msk.bf16.vlgmr.msra.gmra.mxu1 %vm360_vm2, %v1099_v42  ;;  %v1305_v58 = vand.u32 %v6337_v36, %v7757_v4  ;;  %v1448_v24 = vrot.slane %v7913_v51, 1  ;;  %v6404_v36 = vld [vmem:[%s8999_s2 + $0xa] sm:$0x3] }
  0x41   : > { %7020 = vmatprep.mubr.msk.bf16.mxu0 %vm360_vm2, %v952_v44  ;;  %7030 = vmatprep.subr.bf16.mxu0 %v1163_v43  ;;  %v2177_v55 = vand.u32 %v6404_v36, %v7757_v4 }
  0x42   : > { %7037 = vmatpush3.bf16.msra.mxu1 %v1227_v28  ;;  %7038 = vmatprep.mubr.msk.bf16.mxu1 %vm360_vm2, %v1217_v45  ;;  %v1603_v28 = vrot.slane %v1601_v20, 1  ;;  %v1449_v33 = vsel %vm481_vm4, %v1446_v10, %v1448_v24  ;;  %v7994_v45 = vld [vmem:[%s7785_s24 + $0x38] ss:$0 sps:$4 sm:$0x11]   ;;  %v6412_v24 = vld [vmem:[%s8999_s2 + $0xc] sm:$0x3] }
  0x43   : > { %7048 = vmatprep.subr.bf16.mxu1 %v1389_v32  ;;  %v1816_v52 = vshll.u32 %v7994_v45, 16  ;;  %v1938_v19 = vrot.slane %v7994_v45, 1  ;;  %v8053_v20 = vld [vmem:[%s7785_s24 + $0x60] ss:$0 sps:$4 sm:$0x11]  }
  0x44   : > { %v1607_v44 = vor.u32 %v1605_v34, %v1603_v28 }
  0x45   : > { %v1818_v60 = vrot.slane %v1816_v52, 1 }
  0x47   : > { %7021 = vmatmul.mubr.msk.bf16.vlgmr.msra.gmra.mxu0 %vm360_vm2, %v954_v56  ;;  %v7500_v56 = vld [vmem:[%s7785_s24 + $0x3c] sm:$0xff]  }
  0x48   : > { %7031 = vmatpush3.bf16.msra.mxu0 %v1163_v43  ;;  %7039 = vmatmul.mubr.msk.bf16.vlgmr.msra.gmra.mxu1 %vm360_vm2, %v1219_v57  ;;  %v2025_v43 = vand.u32 %v6395_v31, %v7757_v4  ;;  %v8014_v57 = vld [vmem:[%s7785_s24 + $0x50] sm:$0xff]   ;;  %v2165_v1 = vrot.slane %v7500_v56, 1  ;;  %v2086_v3 = vshll.u32 %v7500_v56, 16  ;;  %v2084_v11 = vshrl.u32 %v7500_v56, 16 }
  0x49   : > { %7032 = vmatprep.mubr.msk.bf16.mxu0 %vm360_vm2, %v7830_v49  ;;  %7042 = vmatprep.subr.bf16.mxu0 %v1305_v58  ;;  %v1457_v49 = vand.u32 %v6346_v2, %v7757_v4  ;;  %v2166_v2 = vrot.slane %v8019_v61, 1 }
  0x4a   : > { %7049 = vmatpush3.bf16.msra.mxu1 %v1389_v32  ;;  %7050 = vmatprep.mubr.msk.bf16.mxu1 %vm360_vm2, %v1373_v62  ;;  %v1611_v32 = vrot.slane %v1609_v35, 1  ;;  %v1935_v62 = vrot.slane %v7964_v21, 1  ;;  %v2088_v12 = vrot.slane %v2086_v3, 1  ;;  %v2256_v35 = vand.u32 %v6412_v24, %v7757_v4  ;;  %v2505_v3 = vld [vmem:[%s8999_s2] sm:$0x3] }
  0x4b   : > { %7060 = vmatprep.subr.bf16.mxu1 %v1536_v63 }
  0x4c   : > { %v1612_v50 = vsel %vm339_vm3, %v1607_v44, %v1611_v32 }
  0x4f   : > { %7033 = vmatmul.mubr.msk.bf16.vlgmr.msra.gmra.mxu0 %vm360_vm2, %v7848_v59  ;;  %v1445_v59 = vrot.slane %v7881_v29, 1 }
  0x50   : > { %7043 = vmatpush3.bf16.msra.mxu0 %v1305_v58  ;;  %7051 = vmatmul.mubr.msk.bf16.vlgmr.msra.gmra.mxu1 %vm360_vm2, %v1381_v5  ;;  %v6417_v5 = vld [vmem:[%s8999_s2 + $0xe] sm:$0x3] }
  0x51   : > { %7044 = vmatprep.mubr.msk.bf16.mxu0 %vm360_vm2, %v7881_v29  ;;  %7054 = vmatprep.subr.bf16.mxu0 %v1457_v49  ;;  %v1447_v17 = vsel %vm481_vm4, %v1445_v59, %v1446_v10  ;;  %v7978_v29 = vld [vmem:[%s7785_s24 + $0x30] sm:$0xff]   ;;  %v7502_v59 = vld [vmem:[%s7785_s24 + $0x4c] ss:$0 sps:$4 sm:$0x11]   ;;  %v2167_v10 = vsel %vm481_vm4, %v2165_v1, %v2166_v2  ;;  %v2340_v14 = vand.u32 %v6417_v5, %v7757_v4  ;;  %v2396_v1 = vrot.slane %v8014_v57, 1  ;;  %v8113_v5 = vld [vmem:[%s7785_s24 + $0x58] sm:$0xff]  }
  0x52   : > { %7061 = vmatpush3.bf16.msra.mxu1 %v1536_v63  ;;  %7062 = vmatprep.mubr.msk.bf16.mxu1 %vm360_vm2, %v7494_v6  ;;  %v1808_v42 = vshll.u32 %v7978_v29, 16  ;;  %v1812_v51 = vshrl.u32 %v7978_v29, 16  ;;  %v1936_v63 = vrot.slane %v7978_v29, 1  ;;  %v2317_v6 = vshll.u32 %v8014_v57, 16 }
  0x53   : > { %7072 = vmatprep.subr.bf16.mxu1 %v1688_v7  ;;  %v2098_v31 = vshll.u32 %v7502_v59, 16 }
  0x54   : > { %v1810_v47 = vrot.slane %v1808_v42, 1  ;;  %v1937_v8 = vsel %vm481_vm4, %v1935_v62, %v1936_v63  ;;  %v2319_v16 = vrot.slane %v2317_v6, 1  ;;  %v2655_v6 = vrot.slane %v8047_v18, 1 }
  0x55   : > { %v2100_v45 = vrot.slane %v2098_v31, 1 }
  0x56   : > { %v1811_v54 = vsel %vm339_vm3, %v1806_v46, %v1810_v47  ;;  %v1814_v58 = vor.u32 %v1812_v51, %v1810_v47  ;;  %v8081_v46 = vld [vmem:[%s7785_s24 + $0x4c] ss:$0 sps:$4 sm:$0x11]  }
  0x57   : > { %7045 = vmatmul.mubr.msk.bf16.vlgmr.msra.gmra.mxu0 %vm360_vm2, %v7897_v39  ;;  %v1604_v39 = vsel %vm339_vm3, %v1600_v27, %v1603_v28  ;;  %v8061_v27 = vld [vmem:[%s7785_s24 + $0x44] sm:$0xff]   ;;  %v2523_v28 = vshll.u32 %v8047_v18, 16 }
  0x58   : > { %7055 = vmatpush3.bf16.msra.mxu0 %v1457_v49  ;;  %7063 = vmatmul.mubr.msk.bf16.vlgmr.msra.gmra.mxu1 %vm360_vm2, %v7495_v9  ;;  %v8033_v49 = vld [vmem:[%s7785_s24 + $0x58] sm:$0xff]   ;;  %v2109_v9 = vand.u32 %v6400_v0, %v7757_v4  ;;  %v2528_v44 = vshll.u32 %v8061_v27, 16 }
  0x59   : > { %7056 = vmatprep.mubr.msk.bf16.mxu0 %vm360_vm2, %v1447_v17  ;;  %7066 = vmatprep.subr.bf16.mxu0 %v1620_v15  ;;  %v2321_v17 = vshll.u32 %v8033_v49, 16 }
  0x5a   : > { %7073 = vmatpush3.bf16.msra.mxu1 %v1688_v7  ;;  %7074 = vmatprep.mubr.msk.bf16.mxu1 %vm360_vm2, %v1678_v22  ;;  %v1819_v7 = vsel %vm339_vm3, %v1814_v58, %v1818_v60  ;;  %v2089_v22 = vor.u32 %v2088_v12, %v2084_v11  ;;  %v2530_v52 = vrot.slane %v2528_v44, 1  ;;  %v8097_v60 = vld [vmem:[%s7785_s24 + $0x50] sm:$0xff]  }
  0x5b   : > { %7084 = vmatprep.subr.bf16.mxu1 %v1883_v23  ;;  %v2323_v26 = vrot.slane %v2321_v17, 1  ;;  %v8137_v17 = vld [vmem:[%s7785_s24 + $0x60] ss:$0 sps:$4 sm:$0x11]  }
  0x5f   : > { %7057 = vmatmul.mubr.msk.bf16.vlgmr.msra.gmra.mxu0 %vm360_vm2, %v1449_v33  ;;  %v6437_v33 = vld [vmem:[%s8999_s2 + $0x2] sm:$0x3] }
  0x60   : > { %7067 = vmatpush3.bf16.msra.mxu0 %v1620_v15  ;;  %7075 = vmatmul.mubr.msk.bf16.vlgmr.msra.gmra.mxu1 %vm360_vm2, %v1680_v37  ;;  %v2315_v15 = vshrl.u32 %v8014_v57, 16  ;;  %v2325_v37 = vshrl.u32 %v8033_v49, 16  ;;  %v2547_v42 = vand.u32 %v6437_v33, %v7757_v4 }
  0x61   : > { %7068 = vmatprep.mubr.msk.bf16.mxu0 %vm360_vm2, %v1604_v39  ;;  %7078 = vmatprep.subr.bf16.mxu0 %v1827_v38 }
  0x62   : > { %7085 = vmatpush3.bf16.msra.mxu1 %v1883_v23  ;;  %7086 = vmatprep.mubr.msk.bf16.mxu1 %vm360_vm2, %v7964_v21  ;;  %v2168_v21 = vrot.slane %v7502_v59, 1  ;;  %v2092_v23 = vrot.slane %v2090_v13, 1  ;;  %v2320_v25 = vor.u32 %v2319_v16, %v2315_v15  ;;  %v2327_v47 = vor.u32 %v2325_v37, %v2323_v26 }
  0x63   : > { %7096 = vmatprep.subr.bf16.mxu1 %v2025_v43  ;;  %v2603_v59 = vand.u32 %v2505_v3, %v7757_v4  ;;  %v2804_v13 = vshrl.u32 %v8097_v60, 16  ;;  %v2810_v15 = vshll.u32 %v8113_v5, 16  ;;  %v2399_v16 = vrot.slane %v8053_v20, 1  ;;  %v6511_v3 = vld [vmem:[%s8999_s2 + $0x6] sm:$0x3] }
  0x64   : > { %v2169_v34 = vsel %vm481_vm4, %v2166_v2, %v2168_v21  ;;  %v2093_v39 = vsel %vm339_vm3, %v2089_v22, %v2092_v23  ;;  %v2324_v41 = vsel %vm339_vm3, %v2320_v25, %v2323_v26  ;;  %v2096_v32 = vor.u32 %v2094_v30, %v2092_v23  ;;  %v6470_v23 = vld [vmem:[%s8999_s2 + $0xc] sm:$0x3] }
  0x65   : > { %v2397_v2 = vrot.slane %v8033_v49, 1  ;;  %v2812_v21 = vrot.slane %v2810_v15, 1  ;;  %v2814_v26 = vshrl.u32 %v8113_v5, 16  ;;  %v2976_v30 = vand.u32 %v6470_v23, %v7757_v4  ;;  %v6503_v15 = vld [vmem:[%s8999_s2 + $0x4] sm:$0x3] }
  0x66   : > { %v2101_v36 = vsel %vm339_vm3, %v2096_v32, %v2100_v45  ;;  %v3225_v45 = vld [vmem:[%s8999_s2] sm:$0x3] }
  0x67   : > { %7069 = vmatmul.mubr.msk.bf16.vlgmr.msra.gmra.mxu0 %vm360_vm2, %v1612_v50  ;;  %v6421_v50 = vld [vmem:[%s8999_s2 + $0x10] sm:$0x3]  ;;  %v2400_v22 = vsel %vm481_vm4, %v2397_v2, %v2399_v16  ;;  %v2816_v31 = vor.u32 %v2814_v26, %v2812_v21 }
  0x68   : > { %7079 = vmatpush3.bf16.msra.mxu0 %v1827_v38  ;;  %7087 = vmatmul.mubr.msk.bf16.vlgmr.msra.gmra.mxu1 %vm360_vm2, %v7978_v29  ;;  %v1939_v29 = vsel %vm481_vm4, %v1936_v63, %v1938_v19  ;;  %v2329_v38 = vshll.u32 %v8053_v20, 16  ;;  %v2408_v58 = vand.u32 %v6421_v50, %v7757_v4  ;;  %v6453_v19 = vld [vmem:[%s8999_s2 + $0x6] sm:$0x3] }
  0x69   : > { %7080 = vmatprep.mubr.msk.bf16.mxu0 %vm360_vm2, %v1811_v54  ;;  %7090 = vmatprep.subr.bf16.mxu0 %v1947_v53  ;;  %v2536_v54 = vshll.u32 %v8081_v46, 16  ;;  %v2745_v25 = vand.u32 %v6453_v19, %v7757_v4  ;;  %v6520_v19 = vld [vmem:[%s8999_s2 + $0xa] sm:$0x3] }
  0x6a   : > { %7097 = vmatpush3.bf16.msra.mxu1 %v2025_v43  ;;  %7098 = vmatprep.mubr.msk.bf16.mxu1 %vm360_vm2, %v7500_v56  ;;  %v2525_v43 = vrot.slane %v2523_v28, 1  ;;  %v2331_v48 = vrot.slane %v2329_v38, 1  ;;  %v6445_v56 = vld [vmem:[%s8999_s2 + $0x4] sm:$0x3]  ;;  %v2818_v28 = vshll.u32 %v8137_v17, 16  ;;  %v3617_v23 = vand.u32 %v6520_v19, %v7757_v4 }
  0x6b   : > { %7108 = vmatprep.subr.bf16.mxu1 %v2177_v55  ;;  %v2667_v62 = vand.u32 %v6445_v56, %v7757_v4  ;;  %v2538_v0 = vrot.slane %v2536_v54, 1  ;;  %v7512_v38 = vld [vmem:[%s7785_s24 + $0x64] sm:$0xff]   ;;  %v3323_v54 = vand.u32 %v3225_v45, %v7757_v4  ;;  %v2888_v56 = vrot.slane %v8137_v17, 1 }
  0x6c   : > { %v2526_v51 = vor.u32 %v2525_v43, %v2521_v40  ;;  %v2820_v33 = vrot.slane %v2818_v28, 1  ;;  %v7513_v40 = vld [vmem:[%s7785_s24 + $0x6c] sm:$0xff]   ;;  %v3037_v43 = vshll.u32 %v7512_v38, 16  ;;  %v3116_v44 = vrot.slane %v7512_v38, 1 }
  0x6d   : > { %v3117_v32 = vrot.slane %v7513_v40, 1  ;;  %v3035_v50 = vshrl.u32 %v7512_v38, 16  ;;  %v8247_v28 = vld [vmem:[%s7785_s24 + $0x6c] sm:$0xff]  }
  0x6e   : > { %v2821_v37 = vsel %vm339_vm3, %v2816_v31, %v2820_v33  ;;  %v6516_v31 = vld [vmem:[%s8999_s2 + $0x8] sm:$0x3] }
  0x6f   : > { %7081 = vmatmul.mubr.msk.bf16.vlgmr.msra.gmra.mxu0 %vm360_vm2, %v1819_v7  ;;  %v2656_v7 = vrot.slane %v8061_v27, 1 }
  0x70   : > { %7091 = vmatpush3.bf16.msra.mxu0 %v1947_v53  ;;  %7099 = vmatmul.mubr.msk.bf16.vlgmr.msra.gmra.mxu1 %vm360_vm2, %v8019_v61  ;;  %v2532_v53 = vshrl.u32 %v8061_v27, 16  ;;  %v2531_v61 = vsel %vm339_vm3, %v2526_v51, %v2530_v52  ;;  %v3039_v51 = vrot.slane %v3037_v43, 1 }
  0x71   : > { %7092 = vmatprep.mubr.msk.bf16.mxu0 %vm360_vm2, %v1937_v8  ;;  %7102 = vmatprep.subr.bf16.mxu0 %v2109_v9  ;;  %v6458_v8 = vld [vmem:[%s8999_s2 + $0x8] sm:$0x3]  ;;  %v2657_v12 = vsel %vm481_vm4, %v2655_v6, %v2656_v7 }
  0x72   : > { %7109 = vmatpush3.bf16.msra.mxu1 %v2177_v55  ;;  %7110 = vmatprep.mubr.msk.bf16.mxu1 %vm360_vm2, %v2167_v10  ;;  %v2332_v55 = vsel %vm339_vm3, %v2327_v47, %v2331_v48  ;;  %v2534_v63 = vor.u32 %v2532_v53, %v2530_v52  ;;  %v2398_v10 = vsel %vm481_vm4, %v2396_v1, %v2397_v2  ;;  %v7514_v47 = vld [vmem:[%s7785_s24 + $0x74] ss:$0 sps:$4 sm:$0x11]   ;;  %v3041_v52 = vshll.u32 %v7513_v40, 16 }
  0x73   : > { %7120 = vmatprep.subr.bf16.mxu1 %v2340_v14  ;;  %v2829_v11 = vand.u32 %v6458_v8, %v7757_v4  ;;  %v3118_v53 = vsel %vm481_vm4, %v3116_v44, %v3117_v32  ;;  %v3045_v1 = vshrl.u32 %v7513_v40, 16  ;;  %v3049_v2 = vshll.u32 %v7514_v47, 16 }
  0x77   : > { %7093 = vmatmul.mubr.msk.bf16.vlgmr.msra.gmra.mxu0 %vm360_vm2, %v1939_v29 }
  0x78   : > { %7103 = vmatpush3.bf16.msra.mxu0 %v2109_v9  ;;  %7111 = vmatmul.mubr.msk.bf16.vlgmr.msra.gmra.mxu1 %vm360_vm2, %v2169_v34  ;;  %v2539_v9 = vsel %vm339_vm3, %v2534_v63, %v2538_v0  ;;  %v6462_v34 = vld [vmem:[%s8999_s2 + $0xa] sm:$0x3] }
  0x79   : > { %7104 = vmatprep.mubr.msk.bf16.mxu0 %vm360_vm2, %v2093_v39  ;;  %7114 = vmatprep.subr.bf16.mxu0 %v2256_v35 }
  0x7a   : > { %7121 = vmatpush3.bf16.msra.mxu1 %v2340_v14  ;;  %7122 = vmatprep.mubr.msk.bf16.mxu1 %vm360_vm2, %v2324_v41  ;;  %v2885_v41 = vrot.slane %v8097_v60, 1 }
  0x7b   : > { %7132 = vmatprep.subr.bf16.mxu1 %v2547_v42 }
  0x7f   : > { %7105 = vmatmul.mubr.msk.bf16.vlgmr.msra.gmra.mxu0 %vm360_vm2, %v2101_v36  ;;  %v8192_v36 = vld [vmem:[%s7785_s24 + $0x50] sm:$0xff]  }
  0x80   : > { %7115 = vmatpush3.bf16.msra.mxu0 %v2256_v35  ;;  %7123 = vmatmul.mubr.msk.bf16.vlgmr.msra.gmra.mxu1 %vm360_vm2, %v2332_v55  ;;  %v6479_v35 = vld [vmem:[%s8999_s2 + $0x10] sm:$0x3]  ;;  %v3119_v55 = vrot.slane %v7514_v47, 1  ;;  %v3243_v63 = vshll.u32 %v8192_v36, 16  ;;  %v3241_v8 = vshrl.u32 %v8192_v36, 16 }
  0x81   : > { %7116 = vmatprep.mubr.msk.bf16.mxu0 %vm360_vm2, %v8014_v57  ;;  %7126 = vmatprep.subr.bf16.mxu0 %v2408_v58  ;;  %v2806_v57 = vshll.u32 %v8097_v60, 16  ;;  %v3128_v39 = vand.u32 %v6479_v35, %v7757_v4 }
  0x82   : > { %7133 = vmatpush3.bf16.msra.mxu1 %v2547_v42  ;;  %7134 = vmatprep.mubr.msk.bf16.mxu1 %vm360_vm2, %v2531_v61  ;;  %v2886_v42 = vrot.slane %v8113_v5, 1  ;;  %v6495_v61 = vld [vmem:[%s8999_s2 + $0x2] sm:$0x3] }
  0x83   : > { %7144 = vmatprep.subr.bf16.mxu1 %v2667_v62  ;;  %v2808_v14 = vrot.slane %v2806_v57, 1  ;;  %v3267_v6 = vand.u32 %v6495_v61, %v7757_v4  ;;  %v3245_v57 = vrot.slane %v3243_v63, 1  ;;  %v3534_v63 = vshrl.u32 %v8247_v28, 16 }
  0x84   : > { %v2887_v48 = vsel %vm481_vm4, %v2885_v41, %v2886_v42  ;;  %v2889_v0 = vsel %vm481_vm4, %v2886_v42, %v2888_v56  ;;  %v3549_v41 = vand.u32 %v6516_v31, %v7757_v4  ;;  %v7520_v42 = vld [vmem:[%s7785_s24 + $0x74] ss:$0 sps:$4 sm:$0x11]   ;;  %v6528_v56 = vld [vmem:[%s8999_s2 + $0xc] sm:$0x3] }
  0x85   : > { %v2809_v20 = vor.u32 %v2808_v14, %v2804_v13  ;;  %v3246_v13 = vor.u32 %v3245_v57, %v3241_v8 }
  0x87   : > { %7117 = vmatmul.mubr.msk.bf16.vlgmr.msra.gmra.mxu0 %vm360_vm2, %v8033_v49  ;;  %v2658_v49 = vrot.slane %v8081_v46, 1  ;;  %v2813_v29 = vsel %vm339_vm3, %v2809_v20, %v2812_v21  ;;  %v3387_v20 = vand.u32 %v6503_v15, %v7757_v4  ;;  %v7526_v15 = vld [vmem:[%s7785_s24 + $0x74] ss:$0 sps:$4 sm:$0x11]  }
  0x88   : > { %7127 = vmatpush3.bf16.msra.mxu0 %v2408_v58  ;;  %7135 = vmatmul.mubr.msk.bf16.vlgmr.msra.gmra.mxu1 %vm360_vm2, %v2539_v9  ;;  %v3040_v58 = vor.u32 %v3039_v51, %v3035_v50  ;;  %v8275_v50 = vld [vmem:[%s7785_s24 + $0x64] sm:$0xff]  }
  0x89   : > { %7128 = vmatprep.mubr.msk.bf16.mxu0 %vm360_vm2, %v2398_v10  ;;  %7138 = vmatprep.subr.bf16.mxu0 %v2603_v59  ;;  %v2659_v24 = vsel %vm481_vm4, %v2656_v7, %v2658_v49  ;;  %v3963_v61 = vshll.u32 %v8275_v50, 16  ;;  %v3961_v8 = vshrl.u32 %v8275_v50, 16 }
  0x8a   : > { %7145 = vmatpush3.bf16.msra.mxu1 %v2667_v62  ;;  %7146 = vmatprep.mubr.msk.bf16.mxu1 %vm360_vm2, %v2657_v12  ;;  %v8206_v62 = vld [vmem:[%s7785_s24 + $0x58] sm:$0xff]   ;;  %v8222_v12 = vld [vmem:[%s7785_s24 + $0x60] ss:$0 sps:$4 sm:$0x11]  }
  0x8b   : > { %7156 = vmatprep.subr.bf16.mxu1 %v2829_v11  ;;  %v3248_v9 = vshll.u32 %v8206_v62, 16  ;;  %v3252_v49 = vshrl.u32 %v8206_v62, 16  ;;  %v3256_v17 = vshll.u32 %v8222_v12, 16  ;;  %v3378_v51 = vrot.slane %v8222_v12, 1 }
  0x8d   : > { %v3250_v14 = vrot.slane %v3248_v9, 1  ;;  %v3258_v26 = vrot.slane %v3256_v17, 1 }
  0x8f   : > { %7129 = vmatmul.mubr.msk.bf16.vlgmr.msra.gmra.mxu0 %vm360_vm2, %v2400_v22  ;;  %v3251_v21 = vsel %vm339_vm3, %v3246_v13, %v3250_v14  ;;  %v7518_v22 = vld [vmem:[%s7785_s24 + $0x64] sm:$0xff]  }
  0x90   : > { %7139 = vmatpush3.bf16.msra.mxu0 %v2603_v59  ;;  %7147 = vmatmul.mubr.msk.bf16.vlgmr.msra.gmra.mxu1 %vm360_vm2, %v2659_v24  ;;  %v3465_v59 = vand.u32 %v6511_v3, %v7757_v4  ;;  %v8242_v24 = vld [vmem:[%s7785_s24 + $0x78] sm:$0xff]   ;;  %v3605_v33 = vrot.slane %v7518_v22, 1  ;;  %v3526_v35 = vshll.u32 %v7518_v22, 16  ;;  %v3524_v43 = vshrl.u32 %v7518_v22, 16 }
  0x91   : > { %7140 = vmatprep.mubr.msk.bf16.mxu0 %vm360_vm2, %v8047_v18  ;;  %7150 = vmatprep.subr.bf16.mxu0 %v2745_v25  ;;  %v2897_v18 = vand.u32 %v6462_v34, %v7757_v4  ;;  %v3606_v34 = vrot.slane %v8247_v28, 1  ;;  %v3696_v3 = vand.u32 %v6528_v56, %v7757_v4 }
  0x92   : > { %7157 = vmatpush3.bf16.msra.mxu1 %v2829_v11  ;;  %7158 = vmatprep.mubr.msk.bf16.mxu1 %vm360_vm2, %v2813_v29  ;;  %v3051_v11 = vrot.slane %v3049_v2, 1  ;;  %v3375_v29 = vrot.slane %v8192_v36, 1  ;;  %v3528_v44 = vrot.slane %v3526_v35, 1  ;;  %v3945_v35 = vld [vmem:[%s8999_s2] sm:$0x3] }
  0x93   : > { %7168 = vmatprep.subr.bf16.mxu1 %v2976_v30 }
  0x97   : > { %7141 = vmatmul.mubr.msk.bf16.vlgmr.msra.gmra.mxu0 %vm360_vm2, %v8061_v27  ;;  %v6475_v27 = vld [vmem:[%s8999_s2 + $0xe] sm:$0x3] }
  0x98   : > { %7151 = vmatpush3.bf16.msra.mxu0 %v2745_v25  ;;  %7159 = vmatmul.mubr.msk.bf16.vlgmr.msra.gmra.mxu1 %vm360_vm2, %v2821_v37  ;;  %v3060_v46 = vand.u32 %v6475_v27, %v7757_v4  ;;  %v3254_v25 = vor.u32 %v3252_v49, %v3250_v14  ;;  %v8258_v37 = vld [vmem:[%s7785_s24 + $0x80] sm:$0xff]   ;;  %v3607_v27 = vsel %vm481_vm4, %v3605_v33, %v3606_v34  ;;  %v3836_v33 = vrot.slane %v8242_v24, 1 }
  0x99   : > { %7152 = vmatprep.mubr.msk.bf16.mxu0 %vm360_vm2, %v8097_v60  ;;  %7162 = vmatprep.subr.bf16.mxu0 %v2897_v18  ;;  %v3043_v60 = vrot.slane %v3041_v52, 1  ;;  %v3608_v52 = vrot.slane %v7520_v42, 1 }
  0x9a   : > { %7169 = vmatpush3.bf16.msra.mxu1 %v2976_v30  ;;  %7170 = vmatprep.mubr.msk.bf16.mxu1 %vm360_vm2, %v7512_v38  ;;  %v3376_v30 = vrot.slane %v8206_v62, 1  ;;  %v3259_v38 = vsel %vm339_vm3, %v3254_v25, %v3258_v26  ;;  %v3976_v25 = vshll.u32 %v7526_v15, 16 }
  0x9b   : > { %7180 = vmatprep.subr.bf16.mxu1 %v3128_v39  ;;  %v3044_v7 = vsel %vm339_vm3, %v3040_v58, %v3043_v60  ;;  %v3047_v10 = vor.u32 %v3045_v1, %v3043_v60  ;;  %v8289_v60 = vld [vmem:[%s7785_s24 + $0x6c] sm:$0xff]   ;;  %v6553_v1 = vld [vmem:[%s8999_s2 + $0x2] sm:$0x3]  ;;  %v3609_v2 = vsel %vm481_vm4, %v3606_v34, %v3608_v52  ;;  %v3837_v34 = vrot.slane %v8258_v37, 1 }
  0x9c   : > { %v3987_v9 = vand.u32 %v6553_v1, %v7757_v4  ;;  %v3978_v31 = vrot.slane %v3976_v25, 1 }
  0x9d   : > { %v3052_v16 = vsel %vm339_vm3, %v3047_v10, %v3051_v11  ;;  %v3968_v10 = vshll.u32 %v8289_v60, 16 }
  0x9f   : > { %7153 = vmatmul.mubr.msk.bf16.vlgmr.msra.gmra.mxu0 %vm360_vm2, %v8113_v5  ;;  %v3120_v5 = vsel %vm481_vm4, %v3117_v32, %v3119_v55  ;;  %v3530_v32 = vshll.u32 %v8247_v28, 16  ;;  %v3970_v17 = vrot.slane %v3968_v10, 1  ;;  %v6591_v10 = vld [vmem:[%s8999_s2 + $0xe] sm:$0x3] }
  0xa0   : > { %7163 = vmatpush3.bf16.msra.mxu0 %v2897_v18  ;;  %7171 = vmatmul.mubr.msk.bf16.vlgmr.msra.gmra.mxu1 %vm360_vm2, %v7513_v40  ;;  %v3757_v18 = vshll.u32 %v8242_v24, 16  ;;  %v3377_v40 = vsel %vm481_vm4, %v3375_v29, %v3376_v30  ;;  %v8325_v29 = vld [vmem:[%s7785_s24 + $0x78] sm:$0xff]  }
  0xa1   : > { %7164 = vmatprep.mubr.msk.bf16.mxu0 %vm360_vm2, %v2887_v48  ;;  %7174 = vmatprep.subr.bf16.mxu0 %v3060_v46  ;;  %v3761_v48 = vshll.u32 %v8258_v37, 16 }
  0xa2   : > { %7181 = vmatpush3.bf16.msra.mxu1 %v3128_v39  ;;  %7182 = vmatprep.mubr.msk.bf16.mxu1 %vm360_vm2, %v3118_v53  ;;  %v6533_v39 = vld [vmem:[%s8999_s2 + $0xe] sm:$0x3]  ;;  %v3759_v47 = vrot.slane %v3757_v18, 1  ;;  %v3529_v53 = vor.u32 %v3528_v44, %v3524_v43  ;;  %v4095_v18 = vrot.slane %v8275_v50, 1 }
  0xa3   : > { %7192 = vmatprep.subr.bf16.mxu1 %v3323_v54  ;;  %v3780_v45 = vand.u32 %v6533_v39, %v7757_v4  ;;  %v3763_v58 = vrot.slane %v3761_v48, 1  ;;  %v6574_v39 = vld [vmem:[%s8999_s2 + $0x8] sm:$0x3]  ;;  %v4098_v48 = vrot.slane %v7526_v15, 1  ;;  %v4665_v15 = vld [vmem:[%s8999_s2] sm:$0x3] }
  0xa4   : > { %v4269_v43 = vand.u32 %v6574_v39, %v7757_v4  ;;  %v6611_v39 = vld [vmem:[%s8999_s2 + $0x2] sm:$0x3] }
  0xa7   : > { %7165 = vmatmul.mubr.msk.bf16.vlgmr.msra.gmra.mxu0 %vm360_vm2, %v2889_v0  ;;  %v3538_v0 = vshll.u32 %v7520_v42, 16  ;;  %v4043_v42 = vand.u32 %v3945_v35, %v7757_v4 }
  0xa8   : > { %7175 = vmatpush3.bf16.msra.mxu0 %v3060_v46  ;;  %7183 = vmatmul.mubr.msk.bf16.vlgmr.msra.gmra.mxu1 %vm360_vm2, %v3120_v5  ;;  %v3755_v46 = vshrl.u32 %v8242_v24, 16  ;;  %v3765_v5 = vshrl.u32 %v8258_v37, 16 }
  0xa9   : > { %7176 = vmatprep.mubr.msk.bf16.mxu0 %vm360_vm2, %v3044_v7  ;;  %7186 = vmatprep.subr.bf16.mxu0 %v3267_v6  ;;  %v3540_v12 = vrot.slane %v3538_v0, 1 }
  0xaa   : > { %7193 = vmatpush3.bf16.msra.mxu1 %v3323_v54  ;;  %7194 = vmatprep.mubr.msk.bf16.mxu1 %vm360_vm2, %v8192_v36  ;;  %v8282_v36 = vld [vmem:[%s7785_s24 + $0x88] ss:$0 sps:$4 sm:$0x11]   ;;  %v3532_v54 = vrot.slane %v3530_v32, 1  ;;  %v3760_v55 = vor.u32 %v3759_v47, %v3755_v46  ;;  %v3767_v13 = vor.u32 %v3765_v5, %v3763_v58  ;;  %v4244_v32 = vshrl.u32 %v8325_v29, 16 }
  0xab   : > { %7204 = vmatprep.subr.bf16.mxu1 %v3465_v59  ;;  %v3839_v47 = vrot.slane %v8282_v36, 1 }
  0xac   : > { %v3533_v7 = vsel %vm339_vm3, %v3529_v53, %v3532_v54  ;;  %v3764_v57 = vsel %vm339_vm3, %v3760_v55, %v3763_v58  ;;  %v3536_v11 = vor.u32 %v3534_v63, %v3532_v54 }
  0xad   : > { %v3840_v54 = vsel %vm481_vm4, %v3837_v34, %v3839_v47 }
  0xae   : > { %v3541_v19 = vsel %vm339_vm3, %v3536_v11, %v3540_v12 }
  0xaf   : > { %7177 = vmatmul.mubr.msk.bf16.vlgmr.msra.gmra.mxu0 %vm360_vm2, %v3052_v16  ;;  %v6537_v16 = vld [vmem:[%s8999_s2 + $0x10] sm:$0x3] }
  0xb0   : > { %7187 = vmatpush3.bf16.msra.mxu0 %v3267_v6  ;;  %7195 = vmatmul.mubr.msk.bf16.vlgmr.msra.gmra.mxu1 %vm360_vm2, %v8206_v62  ;;  %v3379_v62 = vsel %vm481_vm4, %v3376_v30, %v3378_v51  ;;  %v3769_v6 = vshll.u32 %v8282_v36, 16  ;;  %v8358_v51 = vld [vmem:[%s7785_s24 + $0x88] ss:$0 sps:$4 sm:$0x11]   ;;  %v6586_v36 = vld [vmem:[%s8999_s2 + $0xc] sm:$0x3] }
  0xb1   : > { %7188 = vmatprep.mubr.msk.bf16.mxu0 %vm360_vm2, %v3251_v21  ;;  %7198 = vmatprep.subr.bf16.mxu0 %v3387_v20  ;;  %v4416_v63 = vand.u32 %v6586_v36, %v7757_v4 }
  0xb2   : > { %7205 = vmatpush3.bf16.msra.mxu1 %v3465_v59  ;;  %7206 = vmatprep.mubr.msk.bf16.mxu1 %vm360_vm2, %v7518_v22  ;;  %v3965_v59 = vrot.slane %v3963_v61, 1  ;;  %v3771_v14 = vrot.slane %v3769_v6, 1  ;;  %v3848_v22 = vand.u32 %v6537_v16, %v7757_v4  ;;  %v4258_v61 = vshll.u32 %v8358_v51, 16  ;;  %v7530_v6 = vld [vmem:[%s7785_s24 + $0x8c] sm:$0xff]  }
  0xb3   : > { %7216 = vmatprep.subr.bf16.mxu1 %v3617_v23  ;;  %v4477_v11 = vshll.u32 %v7530_v6, 16  ;;  %v4556_v12 = vrot.slane %v7530_v6, 1  ;;  %v4500_v16 = vand.u32 %v6591_v10, %v7757_v4 }
  0xb4   : > { %v3966_v49 = vor.u32 %v3965_v59, %v3961_v8  ;;  %v3772_v21 = vsel %vm339_vm3, %v3767_v13, %v3771_v14  ;;  %v4260_v1 = vrot.slane %v4258_v61, 1 }
  0xb6   : > { %v3971_v26 = vsel %vm339_vm3, %v3966_v49, %v3970_v17  ;;  %v7532_v49 = vld [vmem:[%s7785_s24 + $0x9c] ss:$0 sps:$4 sm:$0x11]  }
  0xb7   : > { %7189 = vmatmul.mubr.msk.bf16.vlgmr.msra.gmra.mxu0 %vm360_vm2, %v3259_v38  ;;  %v4096_v38 = vrot.slane %v8289_v60, 1 }
  0xb8   : > { %7199 = vmatpush3.bf16.msra.mxu0 %v3387_v20  ;;  %7207 = vmatmul.mubr.msk.bf16.vlgmr.msra.gmra.mxu1 %vm360_vm2, %v8247_v28  ;;  %v6561_v20 = vld [vmem:[%s8999_s2 + $0x4] sm:$0x3] }
  0xb9   : > { %7200 = vmatprep.mubr.msk.bf16.mxu0 %vm360_vm2, %v3377_v40  ;;  %7210 = vmatprep.subr.bf16.mxu0 %v3549_v41  ;;  %v4107_v28 = vand.u32 %v6561_v20, %v7757_v4  ;;  %v8342_v40 = vld [vmem:[%s7785_s24 + $0x80] sm:$0xff]   ;;  %v4097_v44 = vsel %vm481_vm4, %v4095_v18, %v4096_v38  ;;  %v4099_v56 = vsel %vm481_vm4, %v4096_v38, %v4098_v48  ;;  %v4475_v20 = vshrl.u32 %v7530_v6, 16  ;;  %v8455_v48 = vld [vmem:[%s7785_s24 + $0x88] ss:$0 sps:$4 sm:$0x11]  }
  0xba   : > { %7217 = vmatpush3.bf16.msra.mxu1 %v3617_v23  ;;  %7218 = vmatprep.mubr.msk.bf16.mxu1 %vm360_vm2, %v3607_v27  ;;  %v3972_v23 = vshrl.u32 %v8289_v60, 16  ;;  %v3838_v27 = vsel %vm481_vm4, %v3836_v33, %v3837_v34  ;;  %v4250_v46 = vshll.u32 %v8342_v40, 16  ;;  %v4254_v58 = vshrl.u32 %v8342_v40, 16  ;;  %v8433_v34 = vld [vmem:[%s7785_s24 + $0x80] sm:$0xff]  }
  0xbb   : > { %7228 = vmatprep.subr.bf16.mxu1 %v3780_v45  ;;  %v4326_v59 = vrot.slane %v8342_v40, 1  ;;  %v4559_v33 = vrot.slane %v7532_v49, 1  ;;  %v4688_v47 = vshll.u32 %v8433_v34, 16 }
  0xbc   : > { %v3974_v30 = vor.u32 %v3972_v23, %v3970_v17  ;;  %v4252_v53 = vrot.slane %v4250_v46, 1  ;;  %v8420_v23 = vld [vmem:[%s7785_s24 + $0x78] sm:$0xff]   ;;  %v4707_v46 = vand.u32 %v6611_v39, %v7757_v4  ;;  %v4818_v39 = vrot.slane %v8455_v48, 1 }
  0xbe   : > { %v4256_v0 = vor.u32 %v4254_v58, %v4252_v53 }
  0xbf   : > { %7201 = vmatmul.mubr.msk.bf16.vlgmr.msra.gmra.mxu0 %vm360_vm2, %v3379_v62 }
  0xc0   : > { %7211 = vmatpush3.bf16.msra.mxu0 %v3549_v41  ;;  %7219 = vmatmul.mubr.msk.bf16.vlgmr.msra.gmra.mxu1 %vm360_vm2, %v3609_v2  ;;  %v4246_v41 = vshll.u32 %v8325_v29, 16  ;;  %v6578_v2 = vld [vmem:[%s8999_s2 + $0xa] sm:$0x3]  ;;  %v4261_v5 = vsel %vm339_vm3, %v4256_v0, %v4260_v1  ;;  %v4696_v0 = vshll.u32 %v8455_v48, 16 }
  0xc1   : > { %7212 = vmatprep.mubr.msk.bf16.mxu0 %vm360_vm2, %v3533_v7  ;;  %7222 = vmatprep.subr.bf16.mxu0 %v3696_v3 }
  0xc2   : > { %7229 = vmatpush3.bf16.msra.mxu1 %v3780_v45  ;;  %7230 = vmatprep.mubr.msk.bf16.mxu1 %vm360_vm2, %v3764_v57  ;;  %v4248_v45 = vrot.slane %v4246_v41, 1  ;;  %v8397_v57 = vld [vmem:[%s7785_s24 + $0x94] sm:$0xff]  }
  0xc3   : > { %7240 = vmatprep.subr.bf16.mxu1 %v3987_v9  ;;  %v4557_v13 = vrot.slane %v8397_v57, 1 }
  0xc4   : > { %v4249_v52 = vor.u32 %v4248_v45, %v4244_v32 }
  0xc5   : > { %v4560_v45 = vsel %vm481_vm4, %v4557_v13, %v4559_v33 }
  0xc6   : > { %v4253_v62 = vsel %vm339_vm3, %v4249_v52, %v4252_v53  ;;  %v4681_v52 = vshrl.u32 %v8420_v23, 16 }
  0xc7   : > { %7213 = vmatmul.mubr.msk.bf16.vlgmr.msra.gmra.mxu0 %vm360_vm2, %v3541_v19 }
  0xc8   : > { %7223 = vmatpush3.bf16.msra.mxu0 %v3696_v3  ;;  %7231 = vmatmul.mubr.msk.bf16.vlgmr.msra.gmra.mxu1 %vm360_vm2, %v3772_v21  ;;  %v6595_v3 = vld [vmem:[%s8999_s2 + $0x10] sm:$0x3]  ;;  %v4479_v21 = vrot.slane %v4477_v11, 1  ;;  %v4698_v11 = vrot.slane %v4696_v0, 1 }
  0xc9   : > { %7224 = vmatprep.mubr.msk.bf16.mxu0 %vm360_vm2, %v8242_v24  ;;  %7234 = vmatprep.subr.bf16.mxu0 %v3848_v22  ;;  %v3979_v24 = vsel %vm339_vm3, %v3974_v30, %v3978_v31  ;;  %v4568_v7 = vand.u32 %v6595_v3, %v7757_v4  ;;  %v4328_v30 = vrot.slane %v8358_v51, 1  ;;  %v6619_v3 = vld [vmem:[%s8999_s2 + $0x4] sm:$0x3] }
  0xca   : > { %7241 = vmatpush3.bf16.msra.mxu1 %v3987_v9  ;;  %7242 = vmatprep.mubr.msk.bf16.mxu1 %vm360_vm2, %v3971_v26  ;;  %v4558_v26 = vsel %vm481_vm4, %v4556_v12, %v4557_v13  ;;  %v4480_v18 = vor.u32 %v4479_v21, %v4475_v20  ;;  %v8484_v10 = vand.u32 %v6619_v3, %v7757_v4 }
  0xcb   : > { %7252 = vmatprep.subr.bf16.mxu1 %v4107_v28 }
  0xcf   : > { %7225 = vmatmul.mubr.msk.bf16.vlgmr.msra.gmra.mxu0 %vm360_vm2, %v8258_v37  ;;  %v6569_v37 = vld [vmem:[%s8999_s2 + $0x6] sm:$0x3] }
  0xd0   : > { %7235 = vmatpush3.bf16.msra.mxu0 %v3848_v22  ;;  %7243 = vmatmul.mubr.msk.bf16.vlgmr.msra.gmra.mxu1 %vm360_vm2, %v3979_v24  ;;  %v4185_v55 = vand.u32 %v6569_v37, %v7757_v4  ;;  %v4481_v22 = vshll.u32 %v8397_v57, 16 }
  0xd1   : > { %7236 = vmatprep.mubr.msk.bf16.mxu0 %vm360_vm2, %v3838_v27  ;;  %7246 = vmatprep.subr.bf16.mxu0 %v4043_v42  ;;  %v4485_v27 = vshrl.u32 %v8397_v57, 16 }
  0xd2   : > { %7253 = vmatpush3.bf16.msra.mxu1 %v4107_v28  ;;  %7254 = vmatprep.mubr.msk.bf16.mxu1 %vm360_vm2, %v4097_v44  ;;  %v4763_v28 = vand.u32 %v4665_v15, %v7757_v4  ;;  %v4483_v38 = vrot.slane %v4481_v22, 1  ;;  %v6627_v44 = vld [vmem:[%s8999_s2 + $0x6] sm:$0x3] }
  0xd3   : > { %7264 = vmatprep.subr.bf16.mxu1 %v4269_v43  ;;  %v4905_v36 = vand.u32 %v6627_v44, %v7757_v4  ;;  %v7538_v44 = vld [vmem:[%s7785_s24 + $0x9c] ss:$0 sps:$4 sm:$0x11]  }
  0xd4   : > { %v4484_v37 = vsel %vm339_vm3, %v4480_v18, %v4483_v38  ;;  %v5048_v3 = vrot.slane %v7538_v44, 1 }
  0xd7   : > { %7237 = vmatmul.mubr.msk.bf16.vlgmr.msra.gmra.mxu0 %vm360_vm2, %v3840_v54 }
  0xd8   : > { %7247 = vmatpush3.bf16.msra.mxu0 %v4043_v42  ;;  %7255 = vmatmul.mubr.msk.bf16.vlgmr.msra.gmra.mxu1 %vm360_vm2, %v4099_v56  ;;  %v4329_v42 = vsel %vm481_vm4, %v4326_v59, %v4328_v30 }
  0xd9   : > { %7248 = vmatprep.mubr.msk.bf16.mxu0 %vm360_vm2, %v8275_v50  ;;  %7258 = vmatprep.subr.bf16.mxu0 %v4185_v55  ;;  %v4337_v50 = vand.u32 %v6578_v2, %v7757_v4 }
  0xda   : > { %7265 = vmatpush3.bf16.msra.mxu1 %v4269_v43  ;;  %7266 = vmatprep.mubr.msk.bf16.mxu1 %vm360_vm2, %v4253_v62  ;;  %v4489_v43 = vshll.u32 %v7532_v49, 16  ;;  %v4690_v62 = vrot.slane %v4688_v47, 1  ;;  %v8494_v49 = vld [vmem:[%s8142_s8] sm:$0xff]  }
  0xdb   : > { %7276 = vmatprep.subr.bf16.mxu1 %v4416_v63 }
  0xdc   : > { %v4491_v58 = vrot.slane %v4489_v43, 1 }
  0xdf   : > { %7249 = vmatmul.mubr.msk.bf16.vlgmr.msra.gmra.mxu0 %vm360_vm2, %v8289_v60  ;;  %v4325_v60 = vrot.slane %v8325_v29, 1 }
  0xe0   : > { %7259 = vmatpush3.bf16.msra.mxu0 %v4185_v55  ;;  %v8391_v8 = vpop.f32.mrf.mxu1  ;;  %7267 = vmatmul.mubr.msk.bf16.vlgmr.msra.gmra.mxu1 %vm360_vm2, %v4261_v5  ;;  %v4487_v55 = vor.u32 %v4485_v27, %v4483_v38 }
  0xe1   : > { %7260 = vmatprep.mubr.msk.bf16.mxu0 %vm360_vm2, %v8325_v29  ;;  %7270 = vmatprep.subr.bf16.mxu0 %v4337_v50  ;;  %v4327_v19 = vsel %vm481_vm4, %v4325_v60, %v4326_v59 }
  0xe2   : > { %v8399_v9 = vpop.f32.mrf.mxu1  ;;  %7277 = vmatpush3.bf16.msra.mxu1 %v4416_v63  ;;  %7278 = vmatprep.mubr.msk.bf16.mxu1 %vm360_vm2, %v7530_v6  ;;  %v4692_v63 = vshrl.u32 %v8433_v34, 16 }
  0xe3   : > { %7288 = vmatprep.subr.bf16.mxu1 %v4568_v7 }
  0xe4   : > { %v8408_v14 = vpop.f32.mrf.mxu1  ;;  %v4694_v59 = vor.u32 %v4692_v63, %v4690_v62 }
  0xe6   : > { %v8415_v17 = vpop.f32.mrf.mxu1  ;;  %v4699_v30 = vsel %vm339_vm3, %v4694_v59, %v4698_v11  ;;  %v4978_v11 = vshll.u32 %v7538_v44, 16 }
  0xe7   : > { %v6974_v25 = vpop.f32.mrf.mxu0  ;;  %7261 = vmatmul.mubr.msk.bf16.vlgmr.msra.gmra.mxu0 %vm360_vm2, %v8342_v40  ;;  %v4683_v40 = vshll.u32 %v8420_v23, 16 }
  0xe8   : > { %7271 = vmatpush3.bf16.msra.mxu0 %v4337_v50  ;;  %v8426_v29 = vpop.f32.mrf.mxu1  ;;  %7279 = vmatmul.mubr.msk.bf16.vlgmr.msra.gmra.mxu1 %vm360_vm2, %v8397_v57  ;;  %v473_v50 = vadd.f32 %v8391_v8, %v6974_v25  ;;  %v6636_v57 = vld [vmem:[%s8999_s2 + $0xa] sm:$0x3]  ;;  %v4815_v25 = vrot.slane %v8420_v23, 1 }
  0xe9   : > { %v408_v31 = vpop.f32.mrf.mxu0  ;;  %7272 = vmatprep.mubr.msk.bf16.mxu0 %vm360_vm2, %v4327_v19  ;;  %7282 = vmatprep.subr.bf16.mxu0 %v4500_v16  ;;  %v4685_v53 = vrot.slane %v4683_v40, 1  ;;  %v8498_v20 = vand.u32 %v6636_v57, %v7757_v4  ;;  %v8524_v40 = vld [vmem:[%s8142_s8 + $0x8] sm:$0xff]  }
  0xea   : > { %v8435_v35 = vpop.f32.mrf.mxu1  ;;  %7289 = vmatpush3.bf16.msra.mxu1 %v4568_v7  ;;  %7290 = vmatprep.mubr.msk.bf16.mxu1 %vm360_vm2, %v4558_v26  ;;  %v4492_v7 = vsel %vm339_vm3, %v4487_v55, %v4491_v58  ;;  %v465_v12 = vadd.f32 %v8399_v9, %v408_v31  ;;  %v4816_v26 = vrot.slane %v8433_v34, 1  ;;  %v6632_v31 = vld [vmem:[%s8999_s2 + $0x8] sm:$0x3]  ;;  %v5200_v63 = vshll.u32 %v8524_v40, 16 }
  0xeb   : > { %v6975_v41 = vpop.f32.mrf.mxu0  ;;  %7300 = vmatprep.subr.bf16.mxu1 %v4763_v28  ;;  %v4686_v2 = vor.u32 %v4685_v53, %v4681_v52 }
  0xec   : > { %v8442_v24 = vpop.f32.mrf.mxu1  ;;  %v476_v21 = vadd.f32 %v8408_v14, %v6975_v41  ;;  %v8511_v14 = vld [vmem:[%s7785_s24 + $0x94] sm:$0xff]   ;;  %v5196_v41 = vshll.u32 %v8494_v49, 16 }
  0xed   : > { %v8449_v32 = vpop.f32.mrf.mxu0  ;;  %v4691_v8 = vsel %vm339_vm3, %v4686_v2, %v4690_v62  ;;  %v5046_v43 = vrot.slane %v8511_v14, 1  ;;  %v4974_v59 = vshrl.u32 %v8511_v14, 16 }
  0xee   : > { %v8457_v51 = vpop.f32.mrf.mxu1  ;;  %v5198_v62 = vrot.slane %v5196_v41, 1  ;;  %v4980_v41 = vrot.slane %v4978_v11, 1 }
  0xef   : > { %v6986_v54 = vpop.f32.mrf.mxu0  ;;  %7273 = vmatmul.mubr.msk.bf16.vlgmr.msra.gmra.mxu0 %vm360_vm2, %v4329_v42  ;;  %v468_v42 = vadd.f32 %v8415_v17, %v8449_v32  ;;  %v8541_v17 = vand.u32 %v6632_v31, %v7757_v4  ;;  %v6644_v32 = vld [vmem:[%s8999_s2 + $0xe] sm:$0x3] }
  0xf0   : > { %7283 = vmatpush3.bf16.msra.mxu0 %v4500_v16  ;;  %v8463_v56 = vpop.f32.mrf.mxu1  ;;  %7291 = vmatmul.mubr.msk.bf16.vlgmr.msra.gmra.mxu1 %vm360_vm2, %v4560_v45  ;;  %v547_v13 = vadd.f32 %v6986_v54, %v473_v50  ;;  %v8491_v16 = vld [vmem:[%s7785_s24 + $0x8c] sm:$0xff]   ;;  %v4970_v45 = vshll.u32 %v8511_v14, 16  ;;  %v8555_v50 = vand.u32 %v6644_v32, %v7757_v4 }
  0xf1   : > { %v530_v61 = vpop.f32.mrf.mxu0  ;;  %7284 = vmatprep.mubr.msk.bf16.mxu0 %vm360_vm2, %v4484_v37  ;;  %7294 = vmatprep.subr.bf16.mxu0 %v4707_v46  ;;  %v4966_v33 = vshll.u32 %v8491_v16, 16  ;;  %v4817_v37 = vsel %vm481_vm4, %v4815_v25, %v4816_v26  ;;  %v4964_v54 = vshrl.u32 %v8491_v16, 16  ;;  %v8582_v25 = vld [vmem:[%s7785_s24 + $0x94] sm:$0xff]  }
  0xf2   : > { %v8469_v1 = vpop.f32.mrf.mxu1  ;;  %7301 = vmatpush3.bf16.msra.mxu1 %v4763_v28  ;;  %7302 = vmatprep.mubr.msk.bf16.mxu1 %vm360_vm2, %v8420_v23  ;;  %v545_v22 = vadd.f32 %v530_v61, %v465_v12  ;;  %v627_v23 = vadd.f32 %v8426_v29, %v547_v13  ;;  %v5045_v29 = vrot.slane %v8491_v16, 1 }
  0xf3   : > { %v6987_v5 = vpop.f32.mrf.mxu0  ;;  %7312 = vmatprep.subr.bf16.mxu1 %v4905_v36 }
  0xf4   : > { %v8477_v6 = vpop.f32.mrf.mxu1  ;;  %v548_v18 = vadd.f32 %v6987_v5, %v476_v21  ;;  %v625_v47 = vadd.f32 %v8435_v35, %v545_v22  ;;  %v5194_v35 = vshrl.u32 %v8494_v49, 16  ;;  %v5047_v2 = vsel %vm481_vm4, %v5045_v29, %v5046_v43 }
  0xf5   : > { %v533_v60 = vpop.f32.mrf.mxu0  ;;  %v4972_v5 = vrot.slane %v4970_v45, 1  ;;  %v5202_v22 = vrot.slane %v5200_v63, 1  ;;  %v8627_v63 = vld [vmem:[%s7785_s24 + $0x9c] ss:$0 sps:$4 sm:$0x11]  }
  0xf6   : > { %v8487_v15 = vpop.f32.mrf.mxu1  ;;  %v546_v52 = vadd.f32 %v533_v60, %v468_v42  ;;  %v628_v58 = vadd.f32 %v8442_v24, %v548_v18  ;;  %v5199_v21 = vor.u32 %v5198_v62, %v5194_v35  ;;  %v6664_v42 = vld [vmem:[%s8999_s2 + $0x2] sm:$0x3] }
  0xf7   : > { %v6998_v19 = vpop.f32.mrf.mxu0  ;;  %7285 = vmatmul.mubr.msk.bf16.vlgmr.msra.gmra.mxu0 %vm360_vm2, %v4492_v7  ;;  %v8558_v7 = vld [vmem:[%s7785_s24 + $0x8c] sm:$0xff]  }
  0xf8   : > { %7295 = vmatpush3.bf16.msra.mxu0 %v4707_v46  ;;  %v8501_v9 = vpop.f32.mrf.mxu1  ;;  %7303 = vmatmul.mubr.msk.bf16.vlgmr.msra.gmra.mxu1 %vm360_vm2, %v8433_v34  ;;  %v712_v46 = vadd.f32 %v6998_v19, %v627_v23  ;;  %v626_v12 = vadd.f32 %v8457_v51, %v546_v52  ;;  %v6639_v51 = vld [vmem:[%s8999_s2 + $0xc] sm:$0x3]  ;;  %v4976_v23 = vor.u32 %v4974_v59, %v4972_v5  ;;  %v5411_v59 = vshrl.u32 %v8582_v25, 16 }
  0xf9   : > { %v695_v28 = vpop.f32.mrf.mxu0  ;;  %7296 = vmatprep.mubr.msk.bf16.mxu0 %vm360_vm2, %v4691_v8  ;;  %7306 = vmatprep.subr.bf16.mxu0 %v8484_v10  ;;  %v5203_v45 = vsel %vm339_vm3, %v5199_v21, %v5202_v22  ;;  %v8615_v52 = vand.u32 %v6664_v42, %v7757_v4 }
  0xfa   : > { %v8518_v38 = vpop.f32.mrf.mxu1  ;;  %7313 = vmatpush3.bf16.msra.mxu1 %v4905_v36  ;;  %7314 = vmatprep.mubr.msk.bf16.mxu1 %vm360_vm2, %v8491_v16  ;;  %v4968_v36 = vrot.slane %v4966_v33, 1  ;;  %v710_v55 = vadd.f32 %v695_v28, %v625_v47  ;;  %v781_v24 = vadd.f32 %v8463_v56, %v712_v46  ;;  %v8571_v56 = vld [vmem:[%s8142_s8 + $0x10] ss:$0 sps:$4 sm:$0x11]   ;;  %v5407_v46 = vshll.u32 %v8582_v25, 16 }
  0xfb   : > { %v6999_v27 = vpop.f32.mrf.mxu0  ;;  %7324 = vmatprep.subr.bf16.mxu1 %v8498_v20  ;;  %v5208_v29 = vshll.u32 %v8571_v56, 16 }
  0xfc   : > { %v8535_v48 = vpop.f32.mrf.mxu1  ;;  %v713_v57 = vadd.f32 %v6999_v27, %v628_v58  ;;  %v4969_v8 = vor.u32 %v4968_v36, %v4964_v54  ;;  %v779_v16 = vadd.f32 %v8469_v1, %v710_v55  ;;  %v4819_v1 = vsel %vm481_vm4, %v4816_v26, %v4818_v39 }
  0xfd   : > { %v698_v53 = vpop.f32.mrf.mxu0  ;;  %v8598_v39 = vand.u32 %v6639_v51, %v7757_v4  ;;  %v5204_v27 = vshrl.u32 %v8524_v40, 16  ;;  %v5210_v62 = vrot.slane %v5208_v29, 1 }
  0xfe   : > { %v8549_v61 = vpop.f32.mrf.mxu1  ;;  %v711_v28 = vadd.f32 %v698_v53, %v626_v12  ;;  %v782_v33 = vadd.f32 %v8477_v6, %v713_v57  ;;  %v4973_v26 = vsel %vm339_vm3, %v4969_v8, %v4972_v5  ;;  %v4981_v57 = vsel %vm339_vm3, %v4976_v23, %v4980_v41  ;;  %v6672_v8 = vld [vmem:[%s8999_s2 + $0x4] sm:$0x3] }
  0xff   : > { %v7010_v0 = vpop.f32.mrf.mxu0  ;;  %7297 = vmatmul.mubr.msk.bf16.vlgmr.msra.gmra.mxu0 %vm360_vm2, %v4699_v30  ;;  %v5206_v58 = vor.u32 %v5204_v27, %v5202_v22  ;;  %v5415_v22 = vshll.u32 %v8627_v63, 16  ;;  %v8663_v23 = vand.u32 %v6672_v8, %v7757_v4  ;;  %v8666_v41 = vld [vmem:[%s8142_s8] sm:$0xff]  }
 0x100   : > { %7307 = vmatpush3.bf16.msra.mxu0 %v8484_v10  ;;  %v8562_v60 = vpop.f32.mrf.mxu1  ;;  %7315 = vmatmul.mubr.msk.bf16.vlgmr.msra.gmra.mxu1 %vm360_vm2, %v8511_v14  ;;  %v861_v10 = vadd.f32 %v7010_v0, %v781_v24  ;;  %v5049_v14 = vsel %vm481_vm4, %v5046_v43, %v5048_v3  ;;  %v780_v47 = vadd.f32 %v8487_v15, %v711_v28  ;;  %v6648_v3 = vld [vmem:[%s8999_s2 + $0x10] sm:$0x3] }
 0x101   : > { %v844_v13 = vpop.f32.mrf.mxu0  ;;  %7308 = vmatprep.mubr.msk.bf16.mxu0 %vm360_vm2, %v4817_v37  ;;  %7318 = vmatprep.subr.bf16.mxu0 %v8541_v17  ;;  %v8611_v37 = vld [vmem:[%s9000_s3] ss:$0 sm:$0xff]  ;;  %v5211_v51 = vsel %vm339_vm3, %v5206_v58, %v5210_v62  ;;  %v8654_v21 = vand.u32 %v6648_v3, %v7757_v4  ;;  %v6680_v62 = vld [vmem:[%s8999_s2 + $0x8] sm:$0x3] }
 0x102   : > { %v8574_v19 = vpop.f32.mrf.mxu1  ;;  %7325 = vmatpush3.bf16.msra.mxu1 %v8498_v20  ;;  %7326 = vmatprep.mubr.msk.bf16.mxu1 %vm360_vm2, %v5047_v2  ;;  %v5402_v20 = vshll.u32 %v8558_v7, 16  ;;  %v859_v31 = vadd.f32 %v844_v13, %v779_v16  ;;  %v946_v43 = vadd.f32 %v8501_v9, %v861_v10  ;;  %v5400_v9 = vshrl.u32 %v8558_v7, 16 }
 0x103   : > { %v7011_v30 = vpop.f32.mrf.mxu0  ;;  %7336 = vmatprep.subr.bf16.mxu1 %v8555_v50 }
 0x104   : > { %v8591_v18 = vpop.f32.mrf.mxu1  ;;  %v862_v6 = vadd.f32 %v7011_v30, %v782_v33  ;;  %v5404_v53 = vrot.slane %v5402_v20, 1  ;;  %v944_v15 = vadd.f32 %v8518_v38, %v859_v31 }
 0x105   : > { %v847_v34 = vpop.f32.mrf.mxu0 }
 0x106   : > { %v8603_v44 = vpop.f32.mrf.mxu1  ;;  %v860_v35 = vadd.f32 %v847_v34, %v780_v47  ;;  %v947_v38 = vadd.f32 %v8535_v48, %v862_v6  ;;  %v5405_v24 = vor.u32 %v5404_v53, %v5400_v9  ;;  %v5409_v48 = vrot.slane %v5407_v46, 1  ;;  %v5384_v9 = vld [vmem:[%s8999_s2] sm:$0x3] }
 0x107   : > { %v7022_v32 = vpop.f32.mrf.mxu0  ;;  %7309 = vmatmul.mubr.msk.bf16.vlgmr.msra.gmra.mxu0 %vm360_vm2, %v4819_v1  ;;  %v5534_v53 = vrot.slane %v8558_v7, 1  ;;  %v5482_v3 = vand.u32 %v5384_v9, %v7757_v4 }
 0x108   : > { %v1015_v54 = vadd.f32 %v7022_v32, %v946_v43  ;;  %7319 = vmatpush3.bf16.msra.mxu0 %v8541_v17  ;;  %v8621_v36 = vpop.f32.mrf.mxu1  ;;  %7327 = vmatmul.mubr.msk.bf16.vlgmr.msra.gmra.mxu1 %vm360_vm2, %v5049_v14  ;;  %v945_v10 = vadd.f32 %v8549_v61, %v860_v35  ;;  %v5410_v33 = vsel %vm339_vm3, %v5405_v24, %v5409_v48  ;;  %v5276_v32 = vrot.slane %v8524_v40, 1 }
 0x109   : > { %v998_v55 = vpop.f32.mrf.mxu0  ;;  %7320 = vmatprep.mubr.msk.bf16.mxu0 %vm360_vm2, %v4973_v26  ;;  %7330 = vmatprep.subr.bf16.mxu0 %v8598_v39  ;;  %v5413_v27 = vor.u32 %v5411_v59, %v5409_v48 }
 0x10a   : > { %v1025_v0 = vadd.f32 %v8611_v37, %v1015_v54  ;;  %v1013_v17 = vadd.f32 %v998_v55, %v944_v15  ;;  %v8631_v2 = vpop.f32.mrf.mxu1  ;;  %7337 = vmatpush3.bf16.msra.mxu1 %v8555_v50  ;;  %7338 = vmatprep.mubr.msk.bf16.mxu1 %vm360_vm2, %v5203_v45  ;;  %v5275_v45 = vrot.slane %v8494_v49, 1  ;;  %v5535_v54 = vrot.slane %v8582_v25, 1 }
 0x10b   : > { %v7023_v5 = vpop.f32.mrf.mxu0  ;;  %7348 = vmatprep.subr.bf16.mxu1 %v8615_v52  ;;  %v5685_v55 = vshll.u32 %v8666_v41, 16 }
 0x10c   : > { %vm1029_vm6 = vcmp.gt.f32.partialorder %v1025_v0, 0.0  ;;  %v1033_v50 = vmul.f32 0.01, %v1025_v0  ;;  %v1023_v11 = vadd.f32 %v8611_v37, %v1013_v17  ;;  %v1016_v12 = vadd.f32 %v7023_v5, %v947_v38  ;;  %v8646_v13 = vpop.f32.mrf.mxu1 }
 0x10d   : > { %v1001_v16 = vpop.f32.mrf.mxu0  ;;  %v5277_v48 = vsel %vm481_vm4, %v5275_v45, %v5276_v32  ;;  %v5536_v59 = vsel %vm481_vm4, %v5534_v53, %v5535_v54  ;;  %v5687_v8 = vrot.slane %v5685_v55, 1 }
 0x10e   : > { %v1037_v28 = vsel %vm1029_vm6, %v1025_v0, %v1033_v50  ;;  %vm1027_vm7 = vcmp.gt.f32.partialorder %v1023_v11, 0.0  ;;  %v1031_v30 = vmul.f32 0.01, %v1023_v11  ;;  %v1026_v1 = vadd.f32 %v8611_v37, %v1016_v12  ;;  %v8658_v14 = vpop.f32.mrf.mxu1 }
 0x10f   : > { %v6723_v20 = vpack.c.bf16 %v1037_v28, %v1037_v28  ;;  %v1014_v31 = vadd.f32 %v1001_v16, %v945_v10  ;;  %v7034_v61 = vpop.f32.mrf.mxu0  ;;  %7321 = vmatmul.mubr.msk.bf16.vlgmr.msra.gmra.mxu0 %vm360_vm2, %v4981_v57  ;;  %v5683_v12 = vshrl.u32 %v8666_v41, 16  ;;  %v8729_v28 = vld [vmem:[%s8142_s8 + $0x10] ss:$0 sps:$4 sm:$0x11]  }
 0x110   : > { %v1035_v42 = vsel %vm1027_vm7, %v1023_v11, %v1031_v30  ;;  %vm1030_vm8 = vcmp.gt.f32.partialorder %v1026_v1, 0.0  ;;  %v1034_v34 = vmul.f32 0.01, %v1026_v1  ;;  %7331 = vmatpush3.bf16.msra.mxu0 %v8598_v39  ;;  %v8669_v26 = vpop.f32.mrf.mxu1  ;;  %7339 = vmatmul.mubr.msk.bf16.vlgmr.msra.gmra.mxu1 %vm360_vm2, %v5211_v51  ;;  %v5417_v39 = vrot.slane %v5415_v22, 1 }
 0x111   : > { %1058 = vst.msk [vmem:[%s8673_s12 + $0x8] sm:$0xf] %vm1055_vm5, %v6723_v20  ;;  %v6721_v29 = vpack.c.bf16 %v1035_v42, %v1035_v42  ;;  %v1024_v6 = vadd.f32 %v8611_v37, %v1014_v31  ;;  %v1199_v43 = vpop.f32.mrf.mxu0  ;;  %7332 = vmatprep.mubr.msk.bf16.mxu0 %vm360_vm2, %v8494_v49  ;;  %7342 = vmatprep.subr.bf16.mxu0 %v8654_v21  ;;  %v5278_v51 = vrot.slane %v8571_v56, 1  ;;  %v6675_v56 = vld [vmem:[%s8999_s2 + $0x6] sm:$0x3] }
 0x112   : > { %v1038_v46 = vsel %vm1030_vm8, %v1026_v1, %v1034_v34  ;;  %v8682_v47 = vpop.f32.mrf.mxu1  ;;  %7349 = vmatpush3.bf16.msra.mxu1 %v8615_v52  ;;  %7350 = vmatprep.mubr.msk.bf16.mxu1 %vm360_vm2, %v5410_v33  ;;  %v8696_v52 = vld [vmem:[%s8142_s8 + $0x8] sm:$0xff]   ;;  %v5418_v38 = vsel %vm339_vm3, %v5413_v27, %v5417_v39  ;;  %v1208_v57 = vadd.f32 %v7034_v61, %v8562_v60 }
 0x113   : > { %1056 = vst.msk [vmem:[%s8673_s12] sm:$0xf] %vm1055_vm5, %v6721_v29  ;;  %v6724_v49 = vpack.c.bf16 %v1038_v46, %v1038_v46  ;;  %vm1028_vm9 = vcmp.gt.f32.partialorder %v1024_v6, 0.0  ;;  %v1032_v15 = vmul.f32 0.01, %v1024_v6  ;;  %v7035_v35 = vpop.f32.mrf.mxu0  ;;  %7360 = vmatprep.subr.bf16.mxu1 %v8663_v23  ;;  %v5708_v11 = vand.u32 %v6680_v62, %v7757_v4 }
 0x114   : > { %v8699_v58 = vpop.f32.mrf.mxu1  ;;  %v5689_v10 = vshll.u32 %v8696_v52, 16  ;;  %v1200_v60 = vadd.f32 %v1199_v43, %v8574_v19  ;;  %v1211_v30 = vadd.f32 %v7035_v35, %v8591_v18  ;;  %v1280_v19 = vadd.f32 %v8621_v36, %v1208_v57 }
 0x115   : > { %1059 = vst.msk [vmem:[%s8673_s12 + $0xc] sm:$0xf] %vm1055_vm5, %v6724_v49  ;;  %v1036_v0 = vsel %vm1028_vm9, %v1024_v6, %v1032_v15  ;;  %v1202_v17 = vpop.f32.mrf.mxu0  ;;  %v5279_v36 = vsel %vm481_vm4, %v5276_v32, %v5278_v51  ;;  %v5624_v27 = vand.u32 %v6675_v56, %v7757_v4  ;;  %v5693_v29 = vshrl.u32 %v8696_v52, 16 }
 0x116   : > { %v6722_v5 = vpack.c.bf16 %v1036_v0, %v1036_v0  ;;  %v8709_v24 = vpop.f32.mrf.mxu1  ;;  %v5691_v20 = vrot.slane %v5689_v10, 1  ;;  %v1278_v61 = vadd.f32 %v8631_v2, %v1200_v60  ;;  %v1203_v42 = vadd.f32 %v1202_v17, %v8603_v44 }
 0x117   : > { %v7046_v50 = vpop.f32.mrf.mxu0  ;;  %7333 = vmatmul.mubr.msk.bf16.vlgmr.msra.gmra.mxu0 %vm360_vm2, %v8524_v40  ;;  %v5537_v40 = vrot.slane %v8627_v63, 1  ;;  %v5697_v6 = vshll.u32 %v8729_v28, 16  ;;  %v1281_v43 = vadd.f32 %v8646_v13, %v1211_v30  ;;  %v5765_v10 = vrot.slane %v8696_v52, 1 }
 0x118   : > { %1057 = vst.msk [vmem:[%s8673_s12 + $0x4] sm:$0xf] %vm1055_vm5, %v6722_v5  ;;  %7343 = vmatpush3.bf16.msra.mxu0 %v8654_v21  ;;  %v8722_v16 = vpop.f32.mrf.mxu1  ;;  %7351 = vmatmul.mubr.msk.bf16.vlgmr.msra.gmra.mxu1 %vm360_vm2, %v5418_v38  ;;  %v5688_v21 = vor.u32 %v5687_v8, %v5683_v12  ;;  %v1358_v31 = vadd.f32 %v7046_v50, %v1280_v19  ;;  %v5764_v8 = vrot.slane %v8666_v41, 1 }
 0x119   : > { %v1341_v22 = vpop.f32.mrf.mxu0  ;;  %7344 = vmatprep.mubr.msk.bf16.mxu0 %vm360_vm2, %v5277_v48  ;;  %7354 = vmatprep.subr.bf16.mxu0 %v5482_v3  ;;  %v5538_v33 = vsel %vm481_vm4, %v5535_v54, %v5537_v40  ;;  %v1279_v54 = vadd.f32 %v8658_v14, %v1203_v42  ;;  %v5695_v13 = vor.u32 %v5693_v29, %v5691_v20  ;;  %v5699_v15 = vrot.slane %v5697_v6, 1  ;;  %v7550_v6 = vld [vmem:[%s8142_s8 + $0x24] ss:$0 sps:$4 sm:$0x11]  }
 0x11a   : > { %v8733_v1 = vpop.f32.mrf.mxu1  ;;  %7361 = vmatpush3.bf16.msra.mxu1 %v8663_v23  ;;  %7362 = vmatprep.mubr.msk.bf16.mxu1 %vm360_vm2, %v5536_v59  ;;  %v6692_v23 = vld [vmem:[%s8999_s2 + $0xc] sm:$0x3]  ;;  %v1356_v2 = vadd.f32 %v1341_v22, %v1278_v61  ;;  %v5692_v46 = vsel %vm339_vm3, %v5688_v21, %v5691_v20  ;;  %v1442_v9 = vadd.f32 %v8669_v26, %v1358_v31  ;;  %v6684_v26 = vld [vmem:[%s8999_s2 + $0xa] sm:$0x3] }
 0x11b   : > { %v7047_v63 = vpop.f32.mrf.mxu0  ;;  %7372 = vmatprep.subr.bf16.mxu1 %v5708_v11  ;;  %v5855_v32 = vand.u32 %v6692_v23, %v7757_v4  ;;  %v5700_v5 = vsel %vm339_vm3, %v5695_v13, %v5699_v15  ;;  %v5776_v57 = vand.u32 %v6684_v26, %v7757_v4  ;;  %v5766_v20 = vsel %vm481_vm4, %v5764_v8, %v5765_v10 }
 0x11c   : > { %v8741_v18 = vpop.f32.mrf.mxu1  ;;  %v1359_v44 = vadd.f32 %v7047_v63, %v1281_v43  ;;  %v1440_v55 = vadd.f32 %v8682_v47, %v1356_v2  ;;  %v6701_v47 = vld [vmem:[%s8999_s2 + $0x10] sm:$0x3] }
 0x11d   : > { %v1344_v34 = vpop.f32.mrf.mxu0  ;;  %v6007_v60 = vand.u32 %v6701_v47, %v7757_v4 }
 0x11e   : > { %v8753_v39 = vpop.f32.mrf.mxu1  ;;  %v1357_v14 = vadd.f32 %v1344_v34, %v1279_v54 }
 0x11f   : > { %v7058_v45 = vpop.f32.mrf.mxu0  ;;  %7345 = vmatmul.mubr.msk.bf16.vlgmr.msra.gmra.mxu0 %vm360_vm2, %v5279_v36 }
 0x120   : > { %7355 = vmatpush3.bf16.msra.mxu0 %v5482_v3  ;;  %v7076_v53 = vpop.f32.mrf.mxu1  ;;  %7363 = vmatmul.mubr.msk.bf16.vlgmr.msra.gmra.mxu1 %vm360_vm2, %v5538_v33  ;;  %v1510_v35 = vadd.f32 %v7058_v45, %v1442_v9  ;;  %v1441_v12 = vadd.f32 %v8709_v24, %v1357_v14 }
 0x121   : > { %v1493_v49 = vpop.f32.mrf.mxu0  ;;  %7356 = vmatprep.mubr.msk.bf16.mxu0 %vm360_vm2, %v8558_v7  ;;  %7366 = vmatprep.subr.bf16.mxu0 %v5624_v27  ;;  %v1443_v7 = vadd.f32 %v8699_v58, %v1359_v44 }
 0x122   : > { %v1724_v62 = vpop.f32.mrf.mxu1  ;;  %7373 = vmatpush3.bf16.msra.mxu1 %v5708_v11  ;;  %7374 = vmatprep.mubr.msk.bf16.mxu1 %vm360_vm2, %v5692_v46  ;;  %v1508_v17 = vadd.f32 %v1493_v49, %v1440_v55  ;;  %v1589_v59 = vadd.f32 %v8722_v16, %v1510_v35  ;;  %v8776_v11 = vld [vmem:[%s8142_s8 + $0x14] sm:$0xff]  }
 0x123   : > { %v7059_v0 = vpop.f32.mrf.mxu0  ;;  %7384 = vmatprep.subr.bf16.mxu1 %v5855_v32  ;;  %v5916_v30 = vshll.u32 %v8776_v11, 16  ;;  %v5995_v31 = vrot.slane %v8776_v11, 1  ;;  %v5914_v2 = vshrl.u32 %v8776_v11, 16 }
 0x124   : > { %v7077_v38 = vpop.f32.mrf.mxu1  ;;  %v1511_v48 = vadd.f32 %v7059_v0, %v1443_v7  ;;  %v1587_v16 = vadd.f32 %v8733_v1, %v1508_v17 }
 0x125   : > { %v1496_v3 = vpop.f32.mrf.mxu0  ;;  %v5918_v43 = vrot.slane %v5916_v30, 1 }
 0x126   : > { %v1727_v50 = vpop.f32.mrf.mxu1  ;;  %v1509_v22 = vadd.f32 %v1496_v3, %v1441_v12  ;;  %v1590_v63 = vadd.f32 %v8741_v18, %v1511_v48 }
 0x127   : > { %v7070_v58 = vpop.f32.mrf.mxu0  ;;  %7357 = vmatmul.mubr.msk.bf16.vlgmr.msra.gmra.mxu0 %vm360_vm2, %v8582_v25  ;;  %v8791_v25 = vld [vmem:[%s8142_s8 + $0x1c] sm:$0xff]   ;;  %v5919_v7 = vor.u32 %v5918_v43, %v5914_v2  ;;  %s7556_s8 = sshll.u32 %s7647_s30, 4  ;;  %s7557_s8 = int_to_ptr.vmem [resolvable:$false] %s7556_s8 }
 0x128   : > { %v1673_v51 = vadd.f32 %v7070_v58, %v1589_v59  ;;  %7367 = vmatpush3.bf16.msra.mxu0 %v5624_v27  ;;  %v8785_v40 = vpop.f32.mrf.mxu1  ;;  %7375 = vmatmul.mubr.msk.bf16.vlgmr.msra.gmra.mxu1 %vm360_vm2, %v5700_v5  ;;  %v5996_v61 = vrot.slane %v8791_v25, 1  ;;  %v5920_v42 = vshll.u32 %v8791_v25, 16  ;;  %v1588_v34 = vadd.f32 %v8753_v39, %v1509_v22  ;;  %s7558_s6 = scalar_lea.vmem %s7557_s8, 4096  ;;  %p7559_p5 = scmp.lt.s32.totalorder %s8940_s19, %s7557_s8 }
 0x129   : > { %v1656_v24 = vpop.f32.mrf.mxu0  ;;  %7368 = vmatprep.mubr.msk.bf16.mxu0 %vm360_vm2, %v8666_v41  ;;  %7378 = vmatprep.subr.bf16.mxu0 %v5776_v57  ;;  %v6697_v41 = vld [vmem:[%s8999_s2 + $0xe] sm:$0x3]  ;;  %v5767_v39 = vrot.slane %v8729_v28, 1  ;;  %v5998_v28 = vrot.slane %v7550_v6, 1  ;;  %v5924_v59 = vshrl.u32 %v8791_v25, 16  ;;  %p7560_p6 = scmp.lt.s32.totalorder %s7558_s6, %s7552_s27 }
 0x12a   : > { %v1741_v19 = vadd.f32 %v7076_v53, %v1673_v51  ;;  %v1671_v56 = vadd.f32 %v1656_v24, %v1587_v16  ;;  %v8795_v21 = vpop.f32.mrf.mxu1  ;;  %7385 = vmatpush3.bf16.msra.mxu1 %v5855_v32  ;;  %7386 = vmatprep.mubr.msk.bf16.mxu1 %vm360_vm2, %v8776_v11  ;;  %v5939_v29 = vand.u32 %v6697_v41, %v7757_v4  ;;  %v5922_v26 = vrot.slane %v5920_v42, 1 }
 0x12b   : > { %v7071_v1 = vpop.f32.mrf.mxu0  ;;  %7396 = vmatprep.subr.bf16.mxu1 %v6007_v60  ;;  %v5997_v4 = vsel %vm481_vm4, %v5995_v31, %v5996_v61  ;;  %v5768_v48 = vsel %vm481_vm4, %v5765_v10, %v5767_v39  ;;  %v5999_v8 = vsel %vm481_vm4, %v5996_v61, %v5998_v28  ;;  %p7561_p7 = por %p7560_p6, %p7559_p5 }
 0x12c   : > { %v1745_v18 = vadd.f32 %v8611_v37, %v1741_v19  ;;  %v1739_v36 = vadd.f32 %v1724_v62, %v1671_v56  ;;  %v1674_v33 = vadd.f32 %v7071_v1, %v1590_v63  ;;  %v8808_v23 = vpop.f32.mrf.mxu1  ;;  %v5923_v51 = vsel %vm339_vm3, %v5919_v7, %v5922_v26 }
 0x12d   : > { %v1659_v27 = vpop.f32.mrf.mxu0  ;;  %v5926_v24 = vor.u32 %v5924_v59, %v5922_v26  ;;  %p7562_p9 = pnand %p7561_p7, %p7555_p4 }
 0x12e   : > { %vm1749_vm10 = vcmp.gt.f32.partialorder %v1745_v18, 0.0  ;;  %v1753_v45 = vmul.f32 0.01, %v1745_v18  ;;  %v1743_v46 = vadd.f32 %v8611_v37, %v1739_v36  ;;  %v1742_v32 = vadd.f32 %v7077_v38, %v1674_v33  ;;  %v8816_v44 = vpop.f32.mrf.mxu1 }
 0x12f   : > { %v1672_v9 = vadd.f32 %v1659_v27, %v1588_v34  ;;  %v7082_v53 = vpop.f32.mrf.mxu0  ;;  %7369 = vmatmul.mubr.msk.bf16.vlgmr.msra.gmra.mxu0 %vm360_vm2, %v8696_v52 }
 0x130   : > { %v1757_v54 = vsel %vm1749_vm10, %v1745_v18, %v1753_v45  ;;  %vm1747_vm11 = vcmp.gt.f32.partialorder %v1743_v46, 0.0  ;;  %v1751_v49 = vmul.f32 0.01, %v1743_v46  ;;  %v1746_v13 = vadd.f32 %v8611_v37, %v1742_v32  ;;  %7379 = vmatpush3.bf16.msra.mxu0 %v5776_v57  ;;  %v7100_v15 = vpop.f32.mrf.mxu1  ;;  %7387 = vmatmul.mubr.msk.bf16.vlgmr.msra.gmra.mxu1 %vm360_vm2, %v8791_v25 }
 0x131   : > { %v6727_v35 = vpack.c.bf16 %v1757_v54, %v1757_v54  ;;  %v1740_v55 = vadd.f32 %v1727_v50, %v1672_v9  ;;  %v1863_v62 = vpop.f32.mrf.mxu0  ;;  %7380 = vmatprep.mubr.msk.bf16.mxu0 %vm360_vm2, %v5766_v20  ;;  %7390 = vmatprep.subr.bf16.mxu0 %v5939_v29  ;;  %v5928_v50 = vshll.u32 %v7550_v6, 16  ;;  %v1928_v63 = vadd.f32 %v8785_v40, %v7082_v53 }
 0x132   : > { %v1755_v14 = vsel %vm1747_vm11, %v1743_v46, %v1751_v49  ;;  %vm1750_vm12 = vcmp.gt.f32.partialorder %v1746_v13, 0.0  ;;  %v1754_v0 = vmul.f32 0.01, %v1746_v13  ;;  %v2061_v17 = vpop.f32.mrf.mxu1  ;;  %7397 = vmatpush3.bf16.msra.mxu1 %v6007_v60  ;;  %7398 = vmatprep.mubr.msk.bf16.mxu1 %vm360_vm2, %v5997_v4  ;;  %v1920_v31 = vadd.f32 %v8795_v21, %v1863_v62 }
 0x133   : > { %6372 = vst.msk [vmem:[%s8673_s12 + $0x18] sm:$0xf] %vm1055_vm5, %v6727_v35  ;;  %v6725_v38 = vpack.c.bf16 %v1755_v14, %v1755_v14  ;;  %v1744_v47 = vadd.f32 %v8611_v37, %v1740_v55  ;;  %v7083_v3 = vpop.f32.mrf.mxu0  ;;  %v5930_v25 = vrot.slane %v5928_v50, 1 }
 0x134   : > { %v1758_v5 = vsel %vm1750_vm12, %v1746_v13, %v1754_v0  ;;  %v7101_v57 = vpop.f32.mrf.mxu1  ;;  %v1931_v33 = vadd.f32 %v8808_v23, %v7083_v3 }
 0x135   : > { %6370 = vst.msk [vmem:[%s8673_s12 + $0x10] sm:$0xf] %vm1055_vm5, %v6725_v38  ;;  %v6728_v11 = vpack.c.bf16 %v1758_v5, %v1758_v5  ;;  %vm1748_vm13 = vcmp.gt.f32.partialorder %v1744_v47, 0.0  ;;  %v1752_v12 = vmul.f32 0.01, %v1744_v47  ;;  %v1866_v58 = vpop.f32.mrf.mxu0  ;;  %v5931_v1 = vsel %vm339_vm3, %v5926_v24, %v5930_v25 }
 0x136   : > { %v2064_v60 = vpop.f32.mrf.mxu1  ;;  %v1923_v40 = vadd.f32 %v8816_v44, %v1866_v58 }
 0x137   : > { %6373 = vst.msk [vmem:[%s8673_s12 + $0x1c] sm:$0xf] %vm1055_vm5, %v6728_v11  ;;  %v1756_v52 = vsel %vm1748_vm13, %v1744_v47, %v1752_v12  ;;  %v7094_v16 = vpop.f32.mrf.mxu0  ;;  %7381 = vmatmul.mubr.msk.bf16.vlgmr.msra.gmra.mxu0 %vm360_vm2, %v5768_v48 }
 0x138   : > { %v6726_v10 = vpack.c.bf16 %v1756_v52, %v1756_v52  ;;  %7391 = vmatpush3.bf16.msra.mxu0 %v5939_v29  ;;  %v7112_v22 = vpop.f32.mrf.mxu1  ;;  %7399 = vmatmul.mubr.msk.bf16.vlgmr.msra.gmra.mxu1 %vm360_vm2, %v5999_v8  ;;  %v2000_v61 = vadd.f32 %v7094_v16, %v1928_v63 }
 0x139   : > { %v1983_v30 = vpop.f32.mrf.mxu0  ;;  %7392 = vmatprep.mubr.msk.bf16.mxu0 %vm360_vm2, %v5923_v51 }
 0x13a   : > { %6371 = vst.msk [vmem:[%s8673_s12 + $0x14] sm:$0xf] %vm1055_vm5, %v6726_v10  ;;  %v2213_v19 = vpop.f32.mrf.mxu1  ;;  %v1998_v42 = vadd.f32 %v1983_v30, %v1920_v31  ;;  %v2078_v6 = vadd.f32 %v7100_v15, %v2000_v61 }
 0x13b   : > { %v7095_v56 = vpop.f32.mrf.mxu0 }
 0x13c   : > { %v7113_v41 = vpop.f32.mrf.mxu1  ;;  %v2001_v29 = vadd.f32 %v7095_v56, %v1931_v33  ;;  %v2076_v46 = vadd.f32 %v2061_v17, %v1998_v42 }
 0x13d   : > { %v1986_v20 = vpop.f32.mrf.mxu0 }
 0x13e   : > { %v2216_v18 = vpop.f32.mrf.mxu1  ;;  %v1999_v21 = vadd.f32 %v1986_v20, %v1923_v40  ;;  %v2079_v39 = vadd.f32 %v7101_v57, %v2001_v29 }
 0x13f   : > { %v7106_v36 = vpop.f32.mrf.mxu0  ;;  %7393 = vmatmul.mubr.msk.bf16.vlgmr.msra.gmra.mxu0 %vm360_vm2, %v5931_v1 }
 0x140   : > { %v7124_v34 = vpop.f32.mrf.mxu1  ;;  %v2162_v45 = vadd.f32 %v7106_v36, %v2078_v6  ;;  %v2077_v35 = vadd.f32 %v2064_v60, %v1999_v21 }
 0x141   : > { %v2145_v27 = vpop.f32.mrf.mxu0 }
 0x142   : > { %v2376_v2 = vpop.f32.mrf.mxu1  ;;  %v2160_v53 = vadd.f32 %v2145_v27, %v2076_v46  ;;  %v2230_v23 = vadd.f32 %v7112_v22, %v2162_v45 }
 0x143   : > { %v7107_v43 = vpop.f32.mrf.mxu0 }
 0x144   : > { %v7125_v32 = vpop.f32.mrf.mxu1  ;;  %v2163_v49 = vadd.f32 %v7107_v43, %v2079_v39  ;;  %v2228_v15 = vadd.f32 %v2213_v19, %v2160_v53 }
 0x145   : > { %v2148_v9 = vpop.f32.mrf.mxu0 }
 0x146   : > { %v2379_v4 = vpop.f32.mrf.mxu1  ;;  %v2161_v26 = vadd.f32 %v2148_v9, %v2077_v35  ;;  %v2231_v0 = vadd.f32 %v7113_v41, %v2163_v49 }
 0x147   : > { %v7118_v54 = vpop.f32.mrf.mxu0 }
 0x148   : > { %v7136_v13 = vpop.f32.mrf.mxu1  ;;  %v2309_v62 = vadd.f32 %v7118_v54, %v2230_v23  ;;  %v2229_v5 = vadd.f32 %v2216_v18, %v2161_v26 }
 0x149   : > { %v2292_v55 = vpop.f32.mrf.mxu0 }
 0x14a   : > { %v2583_v28 = vpop.f32.mrf.mxu1  ;;  %v2307_v14 = vadd.f32 %v2292_v55, %v2228_v15  ;;  %v2393_v47 = vadd.f32 %v7124_v34, %v2309_v62 }
 0x14b   : > { %v7119_v44 = vpop.f32.mrf.mxu0 }
 0x14c   : > { %v7137_v17 = vpop.f32.mrf.mxu1  ;;  %v2310_v38 = vadd.f32 %v7119_v44, %v2231_v0  ;;  %v2391_v59 = vadd.f32 %v2376_v2, %v2307_v14 }
 0x14d   : > { %v2295_v7 = vpop.f32.mrf.mxu0 }
 0x14e   : > { %v2586_v3 = vpop.f32.mrf.mxu1  ;;  %v2308_v11 = vadd.f32 %v2295_v7, %v2229_v5  ;;  %v2394_v60 = vadd.f32 %v7125_v32, %v2310_v38 }
 0x14f   : > { %v7130_v57 = vpop.f32.mrf.mxu0 }
 0x150   : > { %v2461_v48 = vadd.f32 %v7130_v57, %v2393_v47  ;;  %v7148_v50 = vpop.f32.mrf.mxu1  ;;  %v2392_v25 = vadd.f32 %v2379_v4, %v2308_v11 }
 0x151   : > { %v2444_v12 = vpop.f32.mrf.mxu0 }
 0x152   : > { %v2465_v58 = vadd.f32 %v8611_v37, %v2461_v48  ;;  %v2459_v8 = vadd.f32 %v2444_v12, %v2391_v59  ;;  %v2703_v51 = vpop.f32.mrf.mxu1 }
 0x153   : > { %v7131_v52 = vpop.f32.mrf.mxu0 }
 0x154   : > { %vm2469_vm14 = vcmp.gt.f32.partialorder %v2465_v58, 0.0  ;;  %v2473_v16 = vmul.f32 0.01, %v2465_v58  ;;  %v2463_v10 = vadd.f32 %v8611_v37, %v2459_v8  ;;  %v2462_v22 = vadd.f32 %v7131_v52, %v2394_v60  ;;  %v7149_v24 = vpop.f32.mrf.mxu1 }
 0x155   : > { %v2447_v30 = vpop.f32.mrf.mxu0 }
 0x156   : > { %v2477_v19 = vsel %vm2469_vm14, %v2465_v58, %v2473_v16  ;;  %vm2467_vm15 = vcmp.gt.f32.partialorder %v2463_v10, 0.0  ;;  %v2471_v56 = vmul.f32 0.01, %v2463_v10  ;;  %v2466_v63 = vadd.f32 %v8611_v37, %v2462_v22  ;;  %v2706_v41 = vpop.f32.mrf.mxu1 }
 0x157   : > { %v6731_v1 = vpack.c.bf16 %v2477_v19, %v2477_v19  ;;  %v2460_v20 = vadd.f32 %v2447_v30, %v2392_v25  ;;  %v7142_v31 = vpop.f32.mrf.mxu0 }
 0x158   : > { %v2475_v61 = vsel %vm2467_vm15, %v2463_v10, %v2471_v56  ;;  %vm2470_vm0 = vcmp.gt.f32.partialorder %v2466_v63, 0.0  ;;  %v2474_v18 = vmul.f32 0.01, %v2466_v63  ;;  %v7160_v36 = vpop.f32.mrf.mxu1  ;;  %v2648_v21 = vadd.f32 %v7142_v31, %v7136_v13 }
 0x159   : > { %6430 = vst.msk [vmem:[%s8673_s12 + $0x28] sm:$0xf] %vm1055_vm5, %v6731_v1  ;;  %v6729_v33 = vpack.c.bf16 %v2475_v61, %v2475_v61  ;;  %v2464_v42 = vadd.f32 %v8611_v37, %v2460_v20  ;;  %v2639_v34 = vpop.f32.mrf.mxu0 }
 0x15a   : > { %v2478_v27 = vsel %vm2470_vm0, %v2466_v63, %v2474_v18  ;;  %v2865_v29 = vpop.f32.mrf.mxu1  ;;  %v2640_v39 = vadd.f32 %v2639_v34, %v2583_v28  ;;  %v2720_v23 = vadd.f32 %v7148_v50, %v2648_v21 }
 0x15b   : > { %6428 = vst.msk [vmem:[%s8673_s12 + $0x20] sm:$0xf] %vm1055_vm5, %v6729_v33  ;;  %v6732_v6 = vpack.c.bf16 %v2478_v27, %v2478_v27  ;;  %vm2468_vm1 = vcmp.gt.f32.partialorder %v2464_v42, 0.0  ;;  %v2472_v2 = vmul.f32 0.01, %v2464_v42  ;;  %v7143_v40 = vpop.f32.mrf.mxu0 }
 0x15c   : > { %v7161_v43 = vpop.f32.mrf.mxu1  ;;  %v2651_v49 = vadd.f32 %v7143_v40, %v7137_v17  ;;  %v2718_v15 = vadd.f32 %v2703_v51, %v2640_v39 }
 0x15d   : > { %6431 = vst.msk [vmem:[%s8673_s12 + $0x2c] sm:$0xf] %vm1055_vm5, %v6732_v6  ;;  %v2476_v45 = vsel %vm2468_vm1, %v2464_v42, %v2472_v2  ;;  %v2642_v46 = vpop.f32.mrf.mxu0 }
 0x15e   : > { %v6730_v32 = vpack.c.bf16 %v2476_v45, %v2476_v45  ;;  %v2868_v9 = vpop.f32.mrf.mxu1  ;;  %v2643_v44 = vadd.f32 %v2642_v46, %v2586_v3  ;;  %v2721_v7 = vadd.f32 %v7149_v24, %v2651_v49 }
 0x15f   : > { %v7154_v53 = vpop.f32.mrf.mxu0 }
 0x160   : > { %6429 = vst.msk [vmem:[%s8673_s12 + $0x24] sm:$0xf] %vm1055_vm5, %v6730_v32  ;;  %v7172_v4 = vpop.f32.mrf.mxu1  ;;  %v2798_v62 = vadd.f32 %v7154_v53, %v2720_v23  ;;  %v2719_v48 = vadd.f32 %v2706_v41, %v2643_v44 }
 0x161   : > { %v2781_v54 = vpop.f32.mrf.mxu0 }
 0x162   : > { %v3012_v35 = vpop.f32.mrf.mxu1  ;;  %v2796_v0 = vadd.f32 %v2781_v54, %v2718_v15  ;;  %v2882_v5 = vadd.f32 %v7160_v36, %v2798_v62 }
 0x163   : > { %v7155_v55 = vpop.f32.mrf.mxu0 }
 0x164   : > { %v7173_v26 = vpop.f32.mrf.mxu1  ;;  %v2799_v47 = vadd.f32 %v7155_v55, %v2721_v7  ;;  %v2880_v11 = vadd.f32 %v2865_v29, %v2796_v0 }
 0x165   : > { %v2784_v14 = vpop.f32.mrf.mxu0 }
 0x166   : > { %v3015_v38 = vpop.f32.mrf.mxu1  ;;  %v2797_v50 = vadd.f32 %v2784_v14, %v2719_v48  ;;  %v2883_v8 = vadd.f32 %v7161_v43, %v2799_v47 }
 0x167   : > { %v7166_v13 = vpop.f32.mrf.mxu0 }
 0x168   : > { %v7184_v57 = vpop.f32.mrf.mxu1  ;;  %v2950_v59 = vadd.f32 %v7166_v13, %v2882_v5  ;;  %v2881_v10 = vadd.f32 %v2868_v9, %v2797_v50 }
 0x169   : > { %v2933_v28 = vpop.f32.mrf.mxu0 }
 0x16a   : > { %v3164_v17 = vpop.f32.mrf.mxu1  ;;  %v2948_v58 = vadd.f32 %v2933_v28, %v2880_v11  ;;  %v3029_v52 = vadd.f32 %v7172_v4, %v2950_v59 }
 0x16b   : > { %v7167_v12 = vpop.f32.mrf.mxu0 }
 0x16c   : > { %v7185_v60 = vpop.f32.mrf.mxu1  ;;  %v2951_v3 = vadd.f32 %v7167_v12, %v2883_v8  ;;  %v3027_v25 = vadd.f32 %v3012_v35, %v2948_v58 }
 0x16d   : > { %v2936_v51 = vpop.f32.mrf.mxu0 }
 0x16e   : > { %v3167_v16 = vpop.f32.mrf.mxu1  ;;  %v2949_v19 = vadd.f32 %v2936_v51, %v2881_v10  ;;  %v3030_v1 = vadd.f32 %v7173_v26, %v2951_v3 }
 0x16f   : > { %v7178_v22 = vpop.f32.mrf.mxu0 }
 0x170   : > { %v3113_v24 = vadd.f32 %v7178_v22, %v3029_v52  ;;  %v7196_v30 = vpop.f32.mrf.mxu1  ;;  %v3028_v42 = vadd.f32 %v3015_v38, %v2949_v19 }
 0x171   : > { %v3096_v56 = vpop.f32.mrf.mxu0 }
 0x172   : > { %v3181_v63 = vadd.f32 %v7184_v57, %v3113_v24  ;;  %v3111_v41 = vadd.f32 %v3096_v56, %v3027_v25  ;;  %v3359_v20 = vpop.f32.mrf.mxu1 }
 0x173   : > { %v7179_v31 = vpop.f32.mrf.mxu0 }
 0x174   : > { %v3185_v61 = vadd.f32 %v8611_v37, %v3181_v63  ;;  %v3179_v18 = vadd.f32 %v3164_v17, %v3111_v41  ;;  %v3114_v36 = vadd.f32 %v7179_v31, %v3030_v1  ;;  %v7197_v33 = vpop.f32.mrf.mxu1 }
 0x175   : > { %v3099_v34 = vpop.f32.mrf.mxu0 }
 0x176   : > { %vm3189_vm2 = vcmp.gt.f32.partialorder %v3185_v61, 0.0  ;;  %v3193_v27 = vmul.f32 0.01, %v3185_v61  ;;  %v3183_v29 = vadd.f32 %v8611_v37, %v3179_v18  ;;  %v3182_v6 = vadd.f32 %v7185_v60, %v3114_v36  ;;  %v3362_v2 = vpop.f32.mrf.mxu1 }
 0x177   : > { %v3112_v40 = vadd.f32 %v3099_v34, %v3028_v42  ;;  %v7190_v43 = vpop.f32.mrf.mxu0 }
 0x178   : > { %v3197_v45 = vsel %vm3189_vm2, %v3185_v61, %v3193_v27  ;;  %vm3187_vm3 = vcmp.gt.f32.partialorder %v3183_v29, 0.0  ;;  %v3191_v46 = vmul.f32 0.01, %v3183_v29  ;;  %v3186_v32 = vadd.f32 %v8611_v37, %v3182_v6  ;;  %v7208_v21 = vpop.f32.mrf.mxu1 }
 0x179   : > { %v6735_v9 = vpack.c.bf16 %v3197_v45, %v3197_v45  ;;  %v3180_v53 = vadd.f32 %v3167_v16, %v3112_v40  ;;  %v3303_v39 = vpop.f32.mrf.mxu0  ;;  %v3368_v48 = vadd.f32 %v7196_v30, %v7190_v43 }
 0x17a   : > { %v3195_v4 = vsel %vm3187_vm3, %v3183_v29, %v3191_v46  ;;  %vm3190_vm4 = vcmp.gt.f32.partialorder %v3186_v32, 0.0  ;;  %v3194_v54 = vmul.f32 0.01, %v3186_v32  ;;  %v3501_v49 = vpop.f32.mrf.mxu1  ;;  %v3360_v11 = vadd.f32 %v3359_v20, %v3303_v39 }
 0x17b   : > { %6488 = vst.msk [vmem:[%s8673_s12 + $0x38] sm:$0xf] %vm1055_vm5, %v6735_v9  ;;  %v6733_v23 = vpack.c.bf16 %v3195_v4, %v3195_v4  ;;  %v3184_v35 = vadd.f32 %v8611_v37, %v3180_v53  ;;  %v7191_v55 = vpop.f32.mrf.mxu0 }
 0x17c   : > { %v3198_v62 = vsel %vm3190_vm4, %v3186_v32, %v3194_v54  ;;  %v7209_v15 = vpop.f32.mrf.mxu1  ;;  %v3371_v58 = vadd.f32 %v7197_v33, %v7191_v55 }
 0x17d   : > { %6486 = vst.msk [vmem:[%s8673_s12 + $0x30] sm:$0xf] %vm1055_vm5, %v6733_v23  ;;  %v6736_v26 = vpack.c.bf16 %v3198_v62, %v3198_v62  ;;  %vm3188_vm6 = vcmp.gt.f32.partialorder %v3184_v35, 0.0  ;;  %v3192_v44 = vmul.f32 0.01, %v3184_v35  ;;  %v3306_v14 = vpop.f32.mrf.mxu0 }
 0x17e   : > { %v3504_v0 = vpop.f32.mrf.mxu1  ;;  %v3363_v10 = vadd.f32 %v3362_v2, %v3306_v14 }
 0x17f   : > { %6489 = vst.msk [vmem:[%s8673_s12 + $0x3c] sm:$0xf] %vm1055_vm5, %v6736_v26  ;;  %v3196_v7 = vsel %vm3188_vm6, %v3184_v35, %v3192_v44  ;;  %v7202_v38 = vpop.f32.mrf.mxu0  ;;  %v8882_v35 = vld [vmem:[%s9000_s3] ss:$0 sm:$0xff] }
 0x180   : > { %v6734_v13 = vpack.c.bf16 %v3196_v7, %v3196_v7  ;;  %v7220_v47 = vpop.f32.mrf.mxu1  ;;  %v3440_v17 = vadd.f32 %v7202_v38, %v3368_v48 }
 0x181   : > { %v3423_v5 = vpop.f32.mrf.mxu0 }
 0x182   : > { %6487 = vst.msk [vmem:[%s8673_s12 + $0x34] sm:$0xf] %vm1055_vm5, %v6734_v13  ;;  %v3653_v37 = vpop.f32.mrf.mxu1  ;;  %v3438_v8 = vadd.f32 %v3423_v5, %v3360_v11  ;;  %v3518_v52 = vadd.f32 %v7208_v21, %v3440_v17 }
 0x183   : > { %v7203_v57 = vpop.f32.mrf.mxu0 }
 0x184   : > { %v7221_v28 = vpop.f32.mrf.mxu1  ;;  %v3441_v3 = vadd.f32 %v7203_v57, %v3371_v58  ;;  %v3516_v25 = vadd.f32 %v3501_v49, %v3438_v8 }
 0x185   : > { %v3426_v59 = vpop.f32.mrf.mxu0 }
 0x186   : > { %v3656_v50 = vpop.f32.mrf.mxu1  ;;  %v3439_v56 = vadd.f32 %v3426_v59, %v3363_v10  ;;  %v3519_v41 = vadd.f32 %v7209_v15, %v3441_v3 }
 0x187   : > { %v7214_v12 = vpop.f32.mrf.mxu0 }
 0x188   : > { %v7232_v60 = vpop.f32.mrf.mxu1  ;;  %v3602_v24 = vadd.f32 %v7214_v12, %v3518_v52  ;;  %v3517_v36 = vadd.f32 %v3504_v0, %v3439_v56 }
 0x189   : > { %v3585_v51 = vpop.f32.mrf.mxu0 }
 0x18a   : > { %v3816_v16 = vpop.f32.mrf.mxu1  ;;  %v3600_v63 = vadd.f32 %v3585_v51, %v3516_v25  ;;  %v3670_v61 = vadd.f32 %v7220_v47, %v3602_v24 }
 0x18b   : > { %v7215_v22 = vpop.f32.mrf.mxu0 }
 0x18c   : > { %v7233_v19 = vpop.f32.mrf.mxu1  ;;  %v3603_v31 = vadd.f32 %v7215_v22, %v3519_v41  ;;  %v3668_v34 = vadd.f32 %v3653_v37, %v3600_v63 }
 0x18d   : > { %v3588_v30 = vpop.f32.mrf.mxu0 }
 0x18e   : > { %v3819_v1 = vpop.f32.mrf.mxu1  ;;  %v3601_v29 = vadd.f32 %v3588_v30, %v3517_v36  ;;  %v3671_v40 = vadd.f32 %v7221_v28, %v3603_v31 }
 0x18f   : > { %v7226_v20 = vpop.f32.mrf.mxu0 }
 0x190   : > { %v8875_v18 = vpop.f32.mrf.mxu1  ;;  %v3749_v42 = vadd.f32 %v7226_v20, %v3670_v61  ;;  %v3669_v9 = vadd.f32 %v3656_v50, %v3601_v29 }
 0x191   : > { %v3732_v33 = vpop.f32.mrf.mxu0 }
 0x192   : > { %v4023_v27 = vpop.f32.mrf.mxu1  ;;  %v3747_v2 = vadd.f32 %v3732_v33, %v3668_v34  ;;  %v3833_v32 = vadd.f32 %v7232_v60, %v3749_v42 }
 0x193   : > { %v7227_v6 = vpop.f32.mrf.mxu0 }
 0x194   : > { %v7245_v43 = vpop.f32.mrf.mxu1  ;;  %v3750_v46 = vadd.f32 %v7227_v6, %v3671_v40  ;;  %v3831_v4 = vadd.f32 %v3816_v16, %v3747_v2 }
 0x195   : > { %v3735_v45 = vpop.f32.mrf.mxu0 }
 0x196   : > { %v8877_v21 = vpop.f32.mrf.mxu1  ;;  %v3748_v49 = vadd.f32 %v3735_v45, %v3669_v9  ;;  %v3834_v15 = vadd.f32 %v7233_v19, %v3750_v46 }
 0x197   : > { %v7238_v53 = vpop.f32.mrf.mxu0 }
 0x198   : > { %v3901_v39 = vadd.f32 %v7238_v53, %v3833_v32  ;;  %v7256_v54 = vpop.f32.mrf.mxu1  ;;  %v3832_v13 = vadd.f32 %v3819_v1, %v3748_v49 }
 0x199   : > { %v3884_v23 = vpop.f32.mrf.mxu0 }
 0x19a   : > { %v3905_v55 = vadd.f32 %v8882_v35, %v3901_v39  ;;  %v3899_v62 = vadd.f32 %v3884_v23, %v3831_v4  ;;  %v4143_v26 = vpop.f32.mrf.mxu1 }
 0x19b   : > { %v7239_v44 = vpop.f32.mrf.mxu0 }
 0x19c   : > { %vm3909_vm7 = vcmp.gt.f32.partialorder %v3905_v55, 0.0  ;;  %v3913_v14 = vmul.f32 0.01, %v3905_v55  ;;  %v3903_v0 = vadd.f32 %v8882_v35, %v3899_v62  ;;  %v3902_v7 = vadd.f32 %v7239_v44, %v3834_v15  ;;  %v7257_v38 = vpop.f32.mrf.mxu1 }
 0x19d   : > { %v3887_v47 = vpop.f32.mrf.mxu0 }
 0x19e   : > { %v3917_v5 = vsel %vm3909_vm7, %v3905_v55, %v3913_v14  ;;  %vm3907_vm8 = vcmp.gt.f32.partialorder %v3903_v0, 0.0  ;;  %v3911_v37 = vmul.f32 0.01, %v3903_v0  ;;  %v3906_v57 = vadd.f32 %v8882_v35, %v3902_v7  ;;  %v4146_v48 = vpop.f32.mrf.mxu1 }
 0x19f   : > { %v6739_v28 = vpack.c.bf16 %v3917_v5, %v3917_v5  ;;  %v3900_v59 = vadd.f32 %v3887_v47, %v3832_v13  ;;  %v7250_v11 = vpop.f32.mrf.mxu0 }
 0x1a0   : > { %v3915_v17 = vsel %vm3907_vm8, %v3903_v0, %v3911_v37  ;;  %vm3910_vm9 = vcmp.gt.f32.partialorder %v3906_v57, 0.0  ;;  %v3914_v50 = vmul.f32 0.01, %v3906_v57  ;;  %v7268_v12 = vpop.f32.mrf.mxu1  ;;  %v4088_v56 = vadd.f32 %v7250_v11, %v8875_v18 }
 0x1a1   : > { %6546 = vst.msk [vmem:[%s8673_s12 + $0x48] sm:$0xf] %vm1055_vm5, %v6739_v28  ;;  %v6737_v58 = vpack.c.bf16 %v3915_v17, %v3915_v17  ;;  %v3904_v8 = vadd.f32 %v8882_v35, %v3900_v59  ;;  %v4079_v60 = vpop.f32.mrf.mxu0 }
 0x1a2   : > { %v3918_v51 = vsel %vm3910_vm9, %v3906_v57, %v3914_v50  ;;  %v4305_v3 = vpop.f32.mrf.mxu1  ;;  %v4080_v41 = vadd.f32 %v4079_v60, %v4023_v27  ;;  %v4160_v61 = vadd.f32 %v7256_v54, %v4088_v56 }
 0x1a3   : > { %6544 = vst.msk [vmem:[%s8673_s12 + $0x40] sm:$0xf] %vm1055_vm5, %v6737_v58  ;;  %v6740_v52 = vpack.c.bf16 %v3918_v51, %v3918_v51  ;;  %vm3908_vm10 = vcmp.gt.f32.partialorder %v3904_v8, 0.0  ;;  %v3912_v16 = vmul.f32 0.01, %v3904_v8  ;;  %v7251_v10 = vpop.f32.mrf.mxu0 }
 0x1a4   : > { %v7269_v22 = vpop.f32.mrf.mxu1  ;;  %v4091_v31 = vadd.f32 %v7251_v10, %v7245_v43  ;;  %v4158_v34 = vadd.f32 %v4143_v26, %v4080_v41 }
 0x1a5   : > { %6547 = vst.msk [vmem:[%s8673_s12 + $0x4c] sm:$0xf] %vm1055_vm5, %v6740_v52  ;;  %v3916_v24 = vsel %vm3908_vm10, %v3904_v8, %v3912_v16  ;;  %v4082_v25 = vpop.f32.mrf.mxu0 }
 0x1a6   : > { %v6738_v19 = vpack.c.bf16 %v3916_v24, %v3916_v24  ;;  %v4308_v30 = vpop.f32.mrf.mxu1  ;;  %v4083_v6 = vadd.f32 %v4082_v25, %v8877_v21  ;;  %v4161_v45 = vadd.f32 %v7257_v38, %v4091_v31 }
 0x1a7   : > { %v7262_v63 = vpop.f32.mrf.mxu0 }
 0x1a8   : > { %6545 = vst.msk [vmem:[%s8673_s12 + $0x44] sm:$0xf] %vm1055_vm5, %v6738_v19  ;;  %v7280_v1 = vpop.f32.mrf.mxu1  ;;  %v4238_v42 = vadd.f32 %v7262_v63, %v4160_v61  ;;  %v4159_v27 = vadd.f32 %v4146_v48, %v4083_v6 }
 0x1a9   : > { %v4221_v20 = vpop.f32.mrf.mxu0 }
 0x1aa   : > { %v4452_v36 = vpop.f32.mrf.mxu1  ;;  %v4236_v40 = vadd.f32 %v4221_v20, %v4158_v34  ;;  %v4322_v9 = vadd.f32 %v7268_v12, %v4238_v42 }
 0x1ab   : > { %v7263_v33 = vpop.f32.mrf.mxu0 }
 0x1ac   : > { %v7281_v29 = vpop.f32.mrf.mxu1  ;;  %v4239_v32 = vadd.f32 %v7263_v33, %v4161_v45  ;;  %v4320_v43 = vadd.f32 %v4305_v3, %v4236_v40 }
 0x1ad   : > { %v4224_v2 = vpop.f32.mrf.mxu0 }
 0x1ae   : > { %v4455_v18 = vpop.f32.mrf.mxu1  ;;  %v4237_v49 = vadd.f32 %v4224_v2, %v4159_v27  ;;  %v4323_v62 = vadd.f32 %v7269_v22, %v4239_v32 }
 0x1af   : > { %v7274_v46 = vpop.f32.mrf.mxu0 }
 0x1b0   : > { %v7292_v53 = vpop.f32.mrf.mxu1  ;;  %v4390_v4 = vadd.f32 %v7274_v46, %v4322_v9  ;;  %v4321_v0 = vadd.f32 %v4308_v30, %v4237_v49 }
 0x1b1   : > { %v4373_v39 = vpop.f32.mrf.mxu0 }
 0x1b2   : > { %v4604_v54 = vpop.f32.mrf.mxu1  ;;  %v4388_v55 = vadd.f32 %v4373_v39, %v4320_v43  ;;  %v4469_v44 = vadd.f32 %v7280_v1, %v4390_v4 }
 0x1b3   : > { %v7275_v23 = vpop.f32.mrf.mxu0 }
 0x1b4   : > { %v7293_v15 = vpop.f32.mrf.mxu1  ;;  %v4391_v21 = vadd.f32 %v7275_v23, %v4323_v62  ;;  %v4467_v13 = vadd.f32 %v4452_v36, %v4388_v55 }
 0x1b5   : > { %v4376_v26 = vpop.f32.mrf.mxu0 }
 0x1b6   : > { %v4607_v14 = vpop.f32.mrf.mxu1  ;;  %v4389_v5 = vadd.f32 %v4376_v26, %v4321_v0  ;;  %v4470_v28 = vadd.f32 %v7281_v29, %v4391_v21 }
 0x1b7   : > { %v7286_v7 = vpop.f32.mrf.mxu0 }
 0x1b8   : > { %v4553_v38 = vadd.f32 %v7286_v7, %v4469_v44  ;;  %v7304_v47 = vpop.f32.mrf.mxu1  ;;  %v4468_v8 = vadd.f32 %v4455_v18, %v4389_v5 }
 0x1b9   : > { %v4536_v37 = vpop.f32.mrf.mxu0 }
 0x1ba   : > { %v4621_v57 = vadd.f32 %v7292_v53, %v4553_v38  ;;  %v4551_v48 = vadd.f32 %v4536_v37, %v4467_v13  ;;  %v4799_v59 = vpop.f32.mrf.mxu1 }
 0x1bb   : > { %v7287_v11 = vpop.f32.mrf.mxu0 }
 0x1bc   : > { %v4625_v17 = vadd.f32 %v8882_v35, %v4621_v57  ;;  %v4619_v50 = vadd.f32 %v4604_v54, %v4551_v48  ;;  %v4554_v12 = vadd.f32 %v7287_v11, %v4470_v28  ;;  %v7305_v58 = vpop.f32.mrf.mxu1 }
 0x1bd   : > { %v4539_v60 = vpop.f32.mrf.mxu0 }
 0x1be   : > { %vm4629_vm11 = vcmp.gt.f32.partialorder %v4625_v17, 0.0  ;;  %v4633_v51 = vmul.f32 0.01, %v4625_v17  ;;  %v4623_v3 = vadd.f32 %v8882_v35, %v4619_v50  ;;  %v4622_v52 = vadd.f32 %v7293_v15, %v4554_v12  ;;  %v4802_v16 = vpop.f32.mrf.mxu1 }
 0x1bf   : > { %v4552_v10 = vadd.f32 %v4539_v60, %v4468_v8  ;;  %v7298_v22 = vpop.f32.mrf.mxu0 }
 0x1c0   : > { %v4637_v24 = vsel %vm4629_vm11, %v4625_v17, %v4633_v51  ;;  %vm4627_vm12 = vcmp.gt.f32.partialorder %v4623_v3, 0.0  ;;  %v4631_v25 = vmul.f32 0.01, %v4623_v3  ;;  %v4626_v19 = vadd.f32 %v8882_v35, %v4622_v52  ;;  %v7316_v56 = vpop.f32.mrf.mxu1 }
 0x1c1   : > { %v6743_v30 = vpack.c.bf16 %v4637_v24, %v4637_v24  ;;  %v4620_v63 = vadd.f32 %v4607_v14, %v4552_v10  ;;  %v4743_v41 = vpop.f32.mrf.mxu0  ;;  %v4808_v39 = vadd.f32 %v7304_v47, %v7298_v22 }
 0x1c2   : > { %v4635_v1 = vsel %vm4627_vm12, %v4623_v3, %v4631_v25  ;;  %vm4630_vm13 = vcmp.gt.f32.partialorder %v4626_v19, 0.0  ;;  %v4634_v20 = vmul.f32 0.01, %v4626_v19  ;;  %v4941_v31 = vpop.f32.mrf.mxu1  ;;  %v4800_v54 = vadd.f32 %v4799_v59, %v4743_v41 }
 0x1c3   : > { %6604 = vst.msk [vmem:[%s8673_s12 + $0x58] sm:$0xf] %vm1055_vm5, %v6743_v30  ;;  %v6741_v61 = vpack.c.bf16 %v4635_v1, %v4635_v1  ;;  %v4624_v36 = vadd.f32 %v8882_v35, %v4620_v63  ;;  %v7299_v33 = vpop.f32.mrf.mxu0 }
 0x1c4   : > { %v4638_v42 = vsel %vm4630_vm13, %v4626_v19, %v4634_v20  ;;  %v7317_v34 = vpop.f32.mrf.mxu1  ;;  %v4811_v62 = vadd.f32 %v7305_v58, %v7299_v33 }
 0x1c5   : > { %6602 = vst.msk [vmem:[%s8673_s12 + $0x50] sm:$0xf] %vm1055_vm5, %v6741_v61  ;;  %v6744_v29 = vpack.c.bf16 %v4638_v42, %v4638_v42  ;;  %vm4628_vm14 = vcmp.gt.f32.partialorder %v4624_v36, 0.0  ;;  %v4632_v6 = vmul.f32 0.01, %v4624_v36  ;;  %v4746_v2 = vpop.f32.mrf.mxu0 }
 0x1c6   : > { %v4944_v40 = vpop.f32.mrf.mxu1  ;;  %v4803_v7 = vadd.f32 %v4802_v16, %v4746_v2 }
 0x1c7   : > { %6605 = vst.msk [vmem:[%s8673_s12 + $0x5c] sm:$0xf] %vm1055_vm5, %v6744_v29  ;;  %v4636_v45 = vsel %vm4628_vm14, %v4624_v36, %v4632_v6  ;;  %v7310_v18 = vpop.f32.mrf.mxu0 }
 0x1c8   : > { %v6742_v46 = vpack.c.bf16 %v4636_v45, %v4636_v45  ;;  %v7328_v32 = vpop.f32.mrf.mxu1  ;;  %v4880_v49 = vadd.f32 %v7310_v18, %v4808_v39 }
 0x1c9   : > { %v4863_v9 = vpop.f32.mrf.mxu0 }
 0x1ca   : > { %6603 = vst.msk [vmem:[%s8673_s12 + $0x54] sm:$0xf] %vm1055_vm5, %v6742_v46  ;;  %v5093_v53 = vpop.f32.mrf.mxu1  ;;  %v4878_v15 = vadd.f32 %v4863_v9, %v4800_v54  ;;  %v4958_v14 = vadd.f32 %v7316_v56, %v4880_v49 }
 0x1cb   : > { %v7311_v27 = vpop.f32.mrf.mxu0 }
 0x1cc   : > { %v7329_v4 = vpop.f32.mrf.mxu1  ;;  %v4881_v44 = vadd.f32 %v7311_v27, %v4811_v62  ;;  %v4956_v5 = vadd.f32 %v4941_v31, %v4878_v15 }
 0x1cd   : > { %v4866_v43 = vpop.f32.mrf.mxu0 }
 0x1ce   : > { %v5096_v23 = vpop.f32.mrf.mxu1  ;;  %v4879_v57 = vadd.f32 %v4866_v43, %v4803_v7  ;;  %v4959_v28 = vadd.f32 %v7317_v34, %v4881_v44 }
 0x1cf   : > { %v7322_v55 = vpop.f32.mrf.mxu0 }
 0x1d0   : > { %v7340_v26 = vpop.f32.mrf.mxu1  ;;  %v5042_v13 = vadd.f32 %v7322_v55, %v4958_v14  ;;  %v4957_v58 = vadd.f32 %v4944_v40, %v4879_v57 }
 0x1d1   : > { %v5025_v21 = vpop.f32.mrf.mxu0 }
 0x1d2   : > { %v5255_v0 = vpop.f32.mrf.mxu1  ;;  %v5040_v48 = vadd.f32 %v5025_v21, %v4956_v5  ;;  %v5110_v50 = vadd.f32 %v7328_v32, %v5042_v13 }
 0x1d3   : > { %v7323_v38 = vpop.f32.mrf.mxu0 }
 0x1d4   : > { %v7341_v37 = vpop.f32.mrf.mxu1  ;;  %v5043_v17 = vadd.f32 %v7323_v38, %v4959_v28  ;;  %v5108_v51 = vadd.f32 %v5093_v53, %v5040_v48 }
 0x1d5   : > { %v5028_v47 = vpop.f32.mrf.mxu0 }
 0x1d6   : > { %v5258_v59 = vpop.f32.mrf.mxu1  ;;  %v5041_v52 = vadd.f32 %v5028_v47, %v4957_v58  ;;  %v5111_v22 = vadd.f32 %v7329_v4, %v5043_v17 }
 0x1d7   : > { %v7334_v11 = vpop.f32.mrf.mxu0 }
 0x1d8   : > { %v7352_v12 = vpop.f32.mrf.mxu1  ;;  %v5188_v60 = vadd.f32 %v7334_v11, %v5110_v50  ;;  %v5109_v63 = vadd.f32 %v5096_v23, %v5041_v52 }
 0x1d9   : > { %v5171_v8 = vpop.f32.mrf.mxu0 }
 0x1da   : > { %v5462_v3 = vpop.f32.mrf.mxu1  ;;  %v5186_v10 = vadd.f32 %v5171_v8, %v5108_v51  ;;  %v5272_v56 = vadd.f32 %v7340_v26, %v5188_v60 }
 0x1db   : > { %v7335_v16 = vpop.f32.mrf.mxu0 }
 0x1dc   : > { %v7353_v24 = vpop.f32.mrf.mxu1  ;;  %v5189_v19 = vadd.f32 %v7335_v16, %v5111_v22  ;;  %v5270_v20 = vadd.f32 %v5255_v0, %v5186_v10 }
 0x1dd   : > { %v5174_v25 = vpop.f32.mrf.mxu0 }
 0x1de   : > { %v5465_v30 = vpop.f32.mrf.mxu1  ;;  %v5187_v61 = vadd.f32 %v5174_v25, %v5109_v63  ;;  %v5273_v34 = vadd.f32 %v7341_v37, %v5189_v19 }
 0x1df   : > { %v7346_v41 = vpop.f32.mrf.mxu0 }
 0x1e0   : > { %v5340_v1 = vadd.f32 %v7346_v41, %v5272_v56  ;;  %v7364_v31 = vpop.f32.mrf.mxu1  ;;  %v5271_v46 = vadd.f32 %v5258_v59, %v5187_v61 }
 0x1e1   : > { %v5323_v36 = vpop.f32.mrf.mxu0 }
 0x1e2   : > { %v5344_v33 = vadd.f32 %v8882_v35, %v5340_v1  ;;  %v5338_v42 = vadd.f32 %v5323_v36, %v5270_v20  ;;  %v5582_v29 = vpop.f32.mrf.mxu1 }
 0x1e3   : > { %v7347_v6 = vpop.f32.mrf.mxu0 }
 0x1e4   : > { %vm5348_vm15 = vcmp.gt.f32.partialorder %v5344_v33, 0.0  ;;  %v5352_v2 = vmul.f32 0.01, %v5344_v33  ;;  %v5342_v40 = vadd.f32 %v8882_v35, %v5338_v42  ;;  %v5341_v45 = vadd.f32 %v7347_v6, %v5273_v34  ;;  %v7365_v18 = vpop.f32.mrf.mxu1 }
 0x1e5   : > { %v5326_v32 = vpop.f32.mrf.mxu0 }
 0x1e6   : > { %v5356_v9 = vsel %vm5348_vm15, %v5344_v33, %v5352_v2  ;;  %vm5346_vm0 = vcmp.gt.f32.partialorder %v5342_v40, 0.0  ;;  %v5350_v53 = vmul.f32 0.01, %v5342_v40  ;;  %v5345_v27 = vadd.f32 %v8882_v35, %v5341_v45  ;;  %v5585_v39 = vpop.f32.mrf.mxu1 }
 0x1e7   : > { %v6747_v4 = vpack.c.bf16 %v5356_v9, %v5356_v9  ;;  %v5339_v43 = vadd.f32 %v5326_v32, %v5271_v46  ;;  %v7358_v54 = vpop.f32.mrf.mxu0 }
 0x1e8   : > { %v5354_v49 = vsel %vm5346_vm0, %v5342_v40, %v5350_v53  ;;  %vm5349_vm1 = vcmp.gt.f32.partialorder %v5345_v27, 0.0  ;;  %v5353_v23 = vmul.f32 0.01, %v5345_v27  ;;  %v7376_v55 = vpop.f32.mrf.mxu1  ;;  %v5527_v57 = vadd.f32 %v7358_v54, %v7352_v12 }
 0x1e9   : > { %6657 = vst.msk [vmem:[%s8673_s12 + $0x68] sm:$0xf] %vm1055_vm5, %v6747_v4  ;;  %v6745_v62 = vpack.c.bf16 %v5354_v49, %v5354_v49  ;;  %v5343_v15 = vadd.f32 %v8882_v35, %v5339_v43  ;;  %v5518_v26 = vpop.f32.mrf.mxu0 }
 0x1ea   : > { %v5357_v21 = vsel %vm5349_vm1, %v5345_v27, %v5353_v23  ;;  %v5744_v44 = vpop.f32.mrf.mxu1  ;;  %v5519_v28 = vadd.f32 %v5518_v26, %v5462_v3  ;;  %v5599_v50 = vadd.f32 %v7364_v31, %v5527_v57 }
 0x1eb   : > { %6655 = vst.msk [vmem:[%s8673_s12 + $0x60] sm:$0xf] %vm1055_vm5, %v6745_v62  ;;  %v6748_v14 = vpack.c.bf16 %v5357_v21, %v5357_v21  ;;  %vm5347_vm2 = vcmp.gt.f32.partialorder %v5343_v15, 0.0  ;;  %v5351_v0 = vmul.f32 0.01, %v5343_v15  ;;  %v7359_v7 = vpop.f32.mrf.mxu0 }
 0x1ec   : > { %v7377_v38 = vpop.f32.mrf.mxu1  ;;  %v5530_v17 = vadd.f32 %v7359_v7, %v7353_v24  ;;  %v5597_v51 = vadd.f32 %v5582_v29, %v5519_v28 }
 0x1ed   : > { %6658 = vst.msk [vmem:[%s8673_s12 + $0x6c] sm:$0xf] %vm1055_vm5, %v6748_v14  ;;  %v5355_v13 = vsel %vm5347_vm2, %v5343_v15, %v5351_v0  ;;  %v5521_v5 = vpop.f32.mrf.mxu0 }
 0x1ee   : > { %v6746_v37 = vpack.c.bf16 %v5355_v13, %v5355_v13  ;;  %v5747_v47 = vpop.f32.mrf.mxu1  ;;  %v5522_v16 = vadd.f32 %v5521_v5, %v5465_v30  ;;  %v5600_v25 = vadd.f32 %v7365_v18, %v5530_v17 }
 0x1ef   : > { %v7370_v48 = vpop.f32.mrf.mxu0 }
 0x1f0   : > { %6656 = vst.msk [vmem:[%s8673_s12 + $0x64] sm:$0xf] %vm1055_vm5, %v6746_v37  ;;  %v7388_v59 = vpop.f32.mrf.mxu1  ;;  %v5677_v60 = vadd.f32 %v7370_v48, %v5599_v50  ;;  %v5598_v41 = vadd.f32 %v5585_v39, %v5522_v16 }
 0x1f1   : > { %v5660_v11 = vpop.f32.mrf.mxu0 }
 0x1f2   : > { %v5891_v58 = vpop.f32.mrf.mxu1  ;;  %v5675_v22 = vadd.f32 %v5660_v11, %v5597_v51  ;;  %v5761_v56 = vadd.f32 %v7376_v55, %v5677_v60 }
 0x1f3   : > { %v7371_v8 = vpop.f32.mrf.mxu0 }
 0x1f4   : > { %v7389_v52 = vpop.f32.mrf.mxu1  ;;  %v5678_v12 = vadd.f32 %v7371_v8, %v5600_v25  ;;  %v5759_v20 = vadd.f32 %v5744_v44, %v5675_v22 }
 0x1f5   : > { %v5663_v10 = vpop.f32.mrf.mxu0 }
 0x1f6   : > { %v5894_v63 = vpop.f32.mrf.mxu1  ;;  %v5676_v61 = vadd.f32 %v5663_v10, %v5598_v41  ;;  %v5762_v36 = vadd.f32 %v7377_v38, %v5678_v12 }
 0x1f7   : > { %v7382_v19 = vpop.f32.mrf.mxu0 }
 0x1f8   : > { %v5829_v3 = vadd.f32 %v7382_v19, %v5761_v56  ;;  %v7400_v33 = vpop.f32.mrf.mxu1  ;;  %v5760_v30 = vadd.f32 %v5747_v47, %v5676_v61 }
 0x1f9   : > { %v5812_v1 = vpop.f32.mrf.mxu0 }
 0x1fa   : > { %v5827_v31 = vadd.f32 %v5812_v1, %v5759_v20  ;;  %v5908_v29 = vadd.f32 %v7388_v59, %v5829_v3  ;;  %v6043_v2 = vpop.f32.mrf.mxu1 }
 0x1fb   : > { %v7383_v24 = vpop.f32.mrf.mxu0 }
 0x1fc   : > { %v5830_v34 = vadd.f32 %v7383_v24, %v5762_v36  ;;  %v5906_v45 = vadd.f32 %v5891_v58, %v5827_v31  ;;  %v7401_v4 = vpop.f32.mrf.mxu1 }
 0x1fd   : > { %v5815_v42 = vpop.f32.mrf.mxu0 }
 0x1fe   : > { %v5828_v18 = vadd.f32 %v5815_v42, %v5760_v30  ;;  %v5909_v53 = vadd.f32 %v7389_v52, %v5830_v34  ;;  %v6046_v14 = vpop.f32.mrf.mxu1 }
 0x1ff   : > { %v7394_v6 = vpop.f32.mrf.mxu0 }
 0x200   : > { %v5992_v40 = vadd.f32 %v7394_v6, %v5908_v29  ;;  %v5907_v49 = vadd.f32 %v5894_v63, %v5828_v18 }
 0x201   : > { %v5975_v46 = vpop.f32.mrf.mxu0 }
 0x202   : > { %v6060_v32 = vadd.f32 %v7400_v33, %v5992_v40  ;;  %v5990_v9 = vadd.f32 %v5975_v46, %v5906_v45 }
 0x203   : > { %v7395_v27 = vpop.f32.mrf.mxu0 }
 0x204   : > { %v6064_v39 = vadd.f32 %v8882_v35, %v6060_v32  ;;  %v6058_v43 = vadd.f32 %v6043_v2, %v5990_v9  ;;  %v5993_v54 = vadd.f32 %v7395_v27, %v5909_v53 }
 0x205   : > { %v5978_v23 = vpop.f32.mrf.mxu0 }
 0x206   : > { %vm6068_vm3 = vcmp.gt.f32.partialorder %v6064_v39, 0.0  ;;  %v6072_v55 = vmul.f32 0.01, %v6064_v39  ;;  %v6062_v62 = vadd.f32 %v8882_v35, %v6058_v43  ;;  %v6061_v15 = vadd.f32 %v7401_v4, %v5993_v54 }
 0x207   : > { %v5991_v26 = vadd.f32 %v5978_v23, %v5907_v49 }
 0x208   : > { %v6076_v21 = vsel %vm6068_vm3, %v6064_v39, %v6072_v55  ;;  %vm6066_vm4 = vcmp.gt.f32.partialorder %v6062_v62, 0.0  ;;  %v6070_v44 = vmul.f32 0.01, %v6062_v62  ;;  %v6065_v0 = vadd.f32 %v8882_v35, %v6061_v15 }
 0x209   : > { %v6751_v7 = vpack.c.bf16 %v6076_v21, %v6076_v21  ;;  %v6059_v38 = vadd.f32 %v6046_v14, %v5991_v26 }
 0x20a   : > { %v6074_v13 = vsel %vm6066_vm4, %v6062_v62, %v6070_v44  ;;  %vm6069_vm6 = vcmp.gt.f32.partialorder %v6065_v0, 0.0  ;;  %v6073_v5 = vmul.f32 0.01, %v6065_v0 }
 0x20b   : > { %6710 = vst.msk [vmem:[%s8673_s12 + $0x78] sm:$0xf] %vm1055_vm5, %v6751_v7  ;;  %v6749_v37 = vpack.c.bf16 %v6074_v13, %v6074_v13  ;;  %v6063_v57 = vadd.f32 %v8882_v35, %v6059_v38 }
 0x20c   : > { %v6077_v47 = vsel %vm6069_vm6, %v6065_v0, %v6073_v5 }
 0x20d   : > { %6708 = vst.msk [vmem:[%s8673_s12 + $0x70] sm:$0xf] %vm1055_vm5, %v6749_v37  ;;  %v6752_v48 = vpack.c.bf16 %v6077_v47, %v6077_v47  ;;  %vm6067_vm7 = vcmp.gt.f32.partialorder %v6063_v57, 0.0  ;;  %v6071_v28 = vmul.f32 0.01, %v6063_v57 }
 0x20f   : > { %6711 = vst.msk [vmem:[%s8673_s12 + $0x7c] sm:$0xf] %vm1055_vm5, %v6752_v48  ;;  %v6075_v59 = vsel %vm6067_vm7, %v6063_v57, %v6071_v28 }
 0x210   : > { %v6750_v35 = vpack.c.bf16 %v6075_v59, %v6075_v59 }
 0x212   : > { %6709 = vst.msk [vmem:[%s8673_s12 + $0x74] sm:$0xf] %vm1055_vm5, %v6750_v35 }
 0x213   : > { %7565 = shalt.err (!%p7562_p9)
}
 0x214   : > { %s7566_s23 = scalar_lea.hbm %s8938_s13, 2048  ;;  %s7570_s9 = scalar_lea.hbm %s9001_s4, 16384 }
 0x215   : > { %p7567_p10 = scmp.ne.s32.totalorder %s8938_s13, %s7566_s23  ;;  %p7571_p13 = scmp.lt.s32.totalorder %s8938_s13, %s9001_s4 }
 0x216   : > { %p7572_p0 = scmp.lt.s32.totalorder %s7570_s9, %s7566_s23 }
 0x217   : > { %p7568_p11 = pnand %p7567_p10, %p7726_p3 }
 0x218   : > { %p7573_p1 = por %p7572_p0, %p7571_p13 }
 0x219   : > { %p7569_p12 = pneg %p7568_p11 }
 0x21b   : > { %p7574_p2 = pnand %p7573_p1, %p7569_p12 }
 0x21d   : > { %7577 = shalt.err (!%p7574_p2)
}
 0x21e   : > { %s7648_s24 = smov 64   ;;  %s7649_s10 = smov 4  }
 0x21f   : > { %7405 = dma.vmem_to_hbm [thread:$0]  (%p7726_p3), %s8940_s19, 2048, %s8938_s13, %s8946_s14, %s7648_s24, %s7648_s24, %s7649_s10  }
 0x220 PF: > { %p7411_p4 = scmp.ge.s32.totalorder %s7644_s22, 2  ;;  %s6132_s27 = sand.u32 1, %s7616_s15  }
 0x221   : > { %s6133_s30 = scalar_lea.sflag [#allocation3], %s6132_s27 }
 0x222   : > { %p7408_p5 = pnand %p7411_p4, %p7735_p8 }
 0x224   : > { %p7409_p6 = pneg %p7408_p5 }
 0x226   : > { %7611 = dma.done.wait (%p7409_p6), %s6133_s30, 2048  }
 0x227   : > { %7613 = vsyncadd (%p7409_p6), %s6133_s30, 4294965248  ;;  %s17_s22 = sadd.s32 1, %s7644_s22   ;;  %s9004_s15 = smov %s7620_s16 }
 0x228   : > { %p14_p7 = scmp.ge.s32.totalorder %s17_s22, 10   ;;  %s9005_s16 = smov %s7624_s17 }
 0x229   : > { %s9006_s17 = smov %s7744_s7  ;;  %s9007_s18 = smov %s7636_s20 }
 0x22a   : > { %s9008_s19 = smov %s7640_s21  ;;  %s9009_s20 = smov %s9012_s25 }
 0x22b   : > { %s9010_s21 = smov %s9016_s26  ;;  %16 = sbr.rel (!%p14_p7) target bundleno = 5 (0x5), region = 103 }
 0x230   :  { %6138 = vsyncpa [#allocation3], 1 }
 0x231   :  { %6140 = vsyncpa [#allocation3 + $0x1], 1 }

</bundles_post_ra>
